<compile_context>
chip_gen: v7x
topology: tpu7x:2x2x1
jax: 0.10.0
libtpu: 0.0.40
codegen_flags: <defaults>
</compile_context>

<pallas_src>
import functools

import jax
import jax.numpy as jnp
from jax.experimental import pallas as pl
from jax.experimental.pallas import tpu as pltpu


def _pair(v):
    return (v, v) if isinstance(v, int) else tuple(v)


def _round_up(x, m):
    return ((x + m - 1) // m) * m


def _cdiv(a, b):
    return -(-a // b)


def _mxu_lane_multiple():
    """128 on 128x128-MXU parts (<= v5), 256 on v6e/v7x-class parts."""
    try:
        kind = jax.devices()[0].device_kind.lower()
    except Exception:
        return 128
    for old in ("v2", "v3", "v4", "v5"):
        if old in kind:
            return 128
    return 256


# -----------------------------------------------------------------------------
# Kernel 1: BatchNorm (affine) + non-overlapping MaxPool + ReLU   -> bf16 NHWC
# -----------------------------------------------------------------------------
def bn_pool_relu_kernel(x_ref, scale_ref, shift_ref, o_ref):
    # x_ref:     (TR, KK, Cp) f32 -- TR pooled positions, KK window elems, Cp lanes
    # scale_ref: (1, 1, Cp) f32, shift_ref: (1, 1, Cp) f32
    # o_ref:     (TR, Cp) bf16 -- lane-dense (Cp is a 128 multiple) unmasked stores
    x_bn = x_ref[...] * scale_ref[...] + shift_ref[...]      # per-channel affine (VPU)
    pooled = jnp.max(x_bn, axis=1)                            # max over pool window
    o_ref[...] = jnp.maximum(pooled, 0.0).astype(o_ref.dtype)


def bn_pool_relu(x, gamma, beta, *, eps, kernel_size_p, stride_p, padding_p, c_pad):
    """x: (B, C, H, W) NCHW -> BN+pool+ReLU activations in NHWC: (B, Hp, Wp, c_pad) bf16.

    Channels beyond C are exact zeros (scale = shift = 0), so they can be carried
    through the conv contraction without changing the result.
    """
    B, C, H, W = x.shape
    kp, sp, pp = kernel_size_p, stride_p, padding_p
    # TODO(synk): overlapping (stride != kernel) or padded max-pool configs need a
    # windowed pooling path; the fused reshape-based path only supports this case.
    assert kp == sp and pp == 0, "fused pool path requires stride==kernel, padding=0"

    Cp = c_pad
    x32 = x.astype(jnp.float32)

    # Training-mode BN statistics from a single fused E[x]/E[x^2] reduction
    # (biased variance, matching torch BatchNorm2d training behaviour).
    mean = jnp.mean(x32, axis=(0, 2, 3))
    mean_sq = jnp.mean(x32 * x32, axis=(0, 2, 3))
    var = jnp.maximum(mean_sq - mean * mean, 0.0)
    scale = gamma.astype(jnp.float32) * jax.lax.rsqrt(var + eps)
    shift = beta.astype(jnp.float32) - mean * scale
    scale = jnp.pad(scale, (0, Cp - C)).reshape(1, 1, Cp)
    shift = jnp.pad(shift, (0, Cp - C)).reshape(1, 1, Cp)

    Hp, Wp = H // kp, W // kp
    KK = kp * kp
    # One-time layout plumbing: pooled positions -> rows, pool-window elements ->
    # sublanes, channels -> lanes (padded to a 128 multiple => lane-dense blocks).
    # TODO(synk): fuse this relayout + the stats pass into one Pallas pass over x
    # to save the remaining extra HBM read/write of the activation.
    xc = x32[:, :, :Hp * kp, :Wp * kp]                        # floor-mode crop
    xr = jnp.transpose(xc.reshape(B, C, Hp, kp, Wp, kp), (0, 2, 4, 3, 5, 1))
    xr = xr.reshape(B * Hp * Wp, KK, C)
    if Cp != C:
        xr = jnp.pad(xr, ((0, 0), (0, 0), (0, Cp - C)))

    R = B * Hp * Wp
    # Row tile sized by a ~1.5 MiB byte budget (16-row multiple for the bf16 out).
    row_bytes = KK * Cp * 4
    TR = max(16, ((3 << 19) // row_bytes) // 16 * 16)
    TR = min(TR, _round_up(R, 16))
    # Guarantee >= 2 grid steps on the parallel axis so megacore (v7x) engages.
    if R > 16 and _round_up(R, TR) // TR < 2:
        TR = max(16, _round_up(_cdiv(R, 2), 16))
    R_pad = _round_up(R, TR)
    if R_pad != R:
        xr = jnp.pad(xr, ((0, R_pad - R), (0, 0), (0, 0)))

    out = pl.pallas_call(
        bn_pool_relu_kernel,
        out_shape=jax.ShapeDtypeStruct((R_pad, Cp), jnp.bfloat16),
        grid_spec=pltpu.PrefetchScalarGridSpec(
            num_scalar_prefetch=0,
            grid=(R_pad // TR,),
            in_specs=[
                pl.BlockSpec((TR, KK, Cp), lambda i: (i, 0, 0)),
                pl.BlockSpec((1, 1, Cp), lambda i: (0, 0, 0)),
                pl.BlockSpec((1, 1, Cp), lambda i: (0, 0, 0)),
            ],
            out_specs=pl.BlockSpec((TR, Cp), lambda i: (i, 0)),
        ),
        compiler_params=pltpu.CompilerParams(
            dimension_semantics=("parallel",),
            vmem_limit_bytes=32 << 20),
    )(xr, scale, shift)

    return out[:R].reshape(B, Hp, Wp, Cp)


# -----------------------------------------------------------------------------
# Kernel 2: Conv2d as an implicit-im2col GEMM (no patch matrix in HBM)
# -----------------------------------------------------------------------------
def _make_conv_kernel(kh, kw, Ho, Wo, sh, sw):
    def conv_kernel(x_ref, w_ref, b_ref, o_ref):
        # x_ref: (H_pad, W_pad, TC) bf16 padded-activation block (batch squeezed)
        # w_ref: (kh, kw, TC, TN) bf16;  b_ref: (1, TN) f32
        # o_ref: (Ho*Wo, TN) f32 -- resident across the channel-block ("arbitrary")
        #        grid axis; accumulation happens directly in the output block.
        @pl.when(pl.program_id(2) == 0)
        def _init():
            # Fold the bias into the init instead of a separate epilogue pass.
            o_ref[...] = jnp.broadcast_to(b_ref[...], o_ref.shape)

        acc = jnp.zeros(o_ref.shape, jnp.float32)
        for di in range(kh):                      # static unroll over kernel taps
            rows = pl.ds(di, Ho) if sh == 1 else pl.ds(di, Ho, sh)
            for dj in range(kw):
                cols = pl.ds(dj, Wo) if sw == 1 else pl.ds(dj, Wo, sw)
                patch = x_ref[rows, cols, :]                      # (Ho, Wo, TC) bf16
                patch = patch.reshape(Ho * Wo, patch.shape[-1])   # (Ho*Wo, TC)
                acc = acc + jnp.dot(patch, w_ref[di, dj],
                                    preferred_element_type=jnp.float32)
        o_ref[...] += acc

    return conv_kernel


def _pick_cin_tile(Cp, H_pad, W_pad, budget_bytes=4 << 20):
    # Cp is a multiple of 128.  Prefer a single contraction block; otherwise the
    # largest 128-multiple divisor whose bf16 activation tile fits the budget.
    cands = ([Cp] if Cp <= 512 else []) + [c for c in (512, 256, 128) if Cp % c == 0]
    for c in cands:
        if H_pad * W_pad * c * 2 <= budget_bytes:
            return c
    # TODO(synk): spatially huge images would additionally need an H-tile grid
    # axis (element-offset windows); not required for this module's shapes.
    return cands[-1]


def conv2d_implicit_gemm(x_act, w, b, *, stride, padding):
    """Direct conv as an implicit-im2col GEMM.

    x_act: (B, Hp, Wp, Cp) bf16, channels already zero-padded to a 128 multiple.
    w:     (Cout, Cin, kh, kw) with Cin <= Cp.  Returns NCHW f32.
    """
    B, Hp, Wp, Cp = x_act.shape
    Cout, Cin, kh, kw = w.shape
    assert Cin <= Cp
    sh, sw = stride
    ph, pw = padding
    H_pad, W_pad = Hp + 2 * ph, Wp + 2 * pw
    Ho = (H_pad - kh) // sh + 1
    Wo = (W_pad - kw) // sw + 1
    M_hw = Ho * Wo

    if b is None:
        b = jnp.zeros((Cout,), jnp.float32)

    # Output-channel padding / tile width: lane-dense; prefer 256 alignment on
    # 256x256-MXU parts (v6e/v7x) when there are enough real channels.
    lane_mult = _mxu_lane_multiple()
    N_pad = _round_up(Cout, 256 if (lane_mult >= 256 and Cout > 128) else 128)
    TN = 512 if N_pad % 512 == 0 else (256 if N_pad % 256 == 0 else 128)
    while TN > 128 and M_hw * TN * 4 > (4 << 20):     # cap the resident out block
        TN //= 2

    # Contraction (input-channel) tile.
    TC = _pick_cin_tile(Cp, H_pad, W_pad)

    # Layout plumbing once in the wrapper: spatial zero-pad (bf16), weights as
    # (kh, kw, Cp, N_pad) bf16, bias as a (1, N_pad) f32 row.
    x_pad = jnp.pad(x_act, ((0, 0), (ph, ph), (pw, pw), (0, 0)))
    w_hwio = jnp.transpose(w.astype(jnp.float32), (2, 3, 1, 0))
    w_p = jnp.pad(w_hwio, ((0, 0), (0, 0), (0, Cp - Cin), (0, N_pad - Cout)))
    w_p = w_p.astype(jnp.bfloat16)
    b_p = jnp.pad(b.astype(jnp.float32), (0, N_pad - Cout)).reshape(1, N_pad)

    grid = (B, N_pad // TN, Cp // TC)

    out = pl.pallas_call(
        _make_conv_kernel(kh, kw, Ho, Wo, sh, sw),
        out_shape=jax.ShapeDtypeStruct((B, M_hw, N_pad), jnp.float32),
        grid_spec=pltpu.PrefetchScalarGridSpec(
            num_scalar_prefetch=0,
            grid=grid,
            in_specs=[
                pl.BlockSpec((None, H_pad, W_pad, TC),
                             lambda bi, n, c: (bi, 0, 0, c)),
                pl.BlockSpec((kh, kw, TC, TN), lambda bi, n, c: (0, 0, c, n)),
                pl.BlockSpec((1, TN), lambda bi, n, c: (0, n)),
            ],
            out_specs=pl.BlockSpec((None, M_hw, TN), lambda bi, n, c: (bi, 0, n)),
        ),
        compiler_params=pltpu.CompilerParams(
            dimension_semantics=("parallel", "parallel", "arbitrary"),
            vmem_limit_bytes=48 << 20),
    )(x_pad, w_p, b_p)

    out = out[:, :, :Cout].reshape(B, Ho, Wo, Cout)
    return jnp.transpose(out, (0, 3, 1, 2))                 # NCHW, as the module


# -----------------------------------------------------------------------------
# Full module forward: Conv2d(ReLU(MaxPool2d(BatchNorm2d(x))))
# -----------------------------------------------------------------------------
def bn_max_relu_conv(x, gamma, beta, conv_w, conv_b, *,
                     kernel_size, stride, padding,
                     kernel_size_p, stride_p, padding_p, eps=1e-5):
    del kernel_size  # implied by conv_w's spatial dims
    C = x.shape[1]
    Cp = _round_up(C, 128)           # lane-dense channel count, used end-to-end
    x_act = bn_pool_relu(x, gamma, beta, eps=eps,
                         kernel_size_p=kernel_size_p, stride_p=stride_p,
                         padding_p=padding_p, c_pad=Cp)
    return conv2d_implicit_gemm(x_act, conv_w, conv_b,
                                stride=_pair(stride), padding=_pair(padding))


# -----------------------------------------------------------------------------
# Reference (plain JAX) and self-test
# -----------------------------------------------------------------------------
def reference_forward(x, gamma, beta, conv_w, conv_b, *, eps, kp, sp, pp,
                      stride, padding, operand_dtype=jnp.float32):
    mean = jnp.mean(x, axis=(0, 2, 3), keepdims=True)
    var = jnp.var(x, axis=(0, 2, 3), keepdims=True)   # biased, like torch BN train
    x_bn = (x - mean) / jnp.sqrt(var + eps) * gamma.reshape(1, -1, 1, 1) \
        + beta.reshape(1, -1, 1, 1)
    x_pool = jax.lax.reduce_window(
        x_bn, -jnp.inf, jax.lax.max,
        window_dimensions=(1, 1, kp, kp),
        window_strides=(1, 1, sp, sp),
        padding=((0, 0), (0, 0), (pp, pp), (pp, pp)))
    x_relu = jnp.maximum(x_pool, 0.0)
    # Optionally round operands to bf16 (to mirror the kernel's MXU operand dtype).
    x_relu = x_relu.astype(operand_dtype).astype(jnp.float32)
    w_q = conv_w.astype(operand_dtype).astype(jnp.float32)
    sh, sw = _pair(stride)
    ph, pw = _pair(padding)
    out = jax.lax.conv_general_dilated(
        x_relu, w_q, window_strides=(sh, sw),
        padding=((ph, ph), (pw, pw)),
        dimension_numbers=("NCHW", "OIHW", "NCHW"),
        precision=jax.lax.Precision.HIGHEST)
    if conv_b is not None:
        out = out + conv_b.reshape(1, -1, 1, 1)
    return out


if __name__ == "__main__":
    # Shapes consistent with:
    #   BN_Max_Relu_Conv(inplanes=4, planes=8, kernel_size=3, stride=1, padding=1,
    #                    bias=True, kernel_size_p=2, stride_p=2, padding_p=0)
    B, inplanes, planes, H, W = 2, 4, 8, 16, 16
    kernel_size, stride, padding = 3, 1, 1
    kernel_size_p, stride_p, padding_p = 2, 2, 0
    eps = 1e-5

    key = jax.random.PRNGKey(0)
    kx, kwt, kb = jax.random.split(key, 3)

    x = jax.random.normal(kx, (B, inplanes, H, W), dtype=jnp.float32)
    # weight_init(): BN gamma=1, beta=0; conv weight kaiming-normal (fan_out, relu).
    gamma = jnp.ones((inplanes,), jnp.float32)
    beta = jnp.zeros((inplanes,), jnp.float32)
    fan_out = planes * kernel_size * kernel_size
    conv_w = jax.random.normal(
        kwt, (planes, inplanes, kernel_size, kernel_size), jnp.float32
    ) * (2.0 / fan_out) ** 0.5
    bound = 1.0 / (inplanes * kernel_size * kernel_size) ** 0.5
    conv_b = jax.random.uniform(kb, (planes,), jnp.float32, -bound, bound)

    fwd = jax.jit(functools.partial(
        bn_max_relu_conv,
        kernel_size=kernel_size, stride=stride, padding=padding,
        kernel_size_p=kernel_size_p, stride_p=stride_p, padding_p=padding_p,
        eps=eps))
    out = jax.block_until_ready(fwd(x, gamma, beta, conv_w, conv_b))

    ref_f32 = reference_forward(x, gamma, beta, conv_w, conv_b, eps=eps,
                                kp=kernel_size_p, sp=stride_p, pp=padding_p,
                                stride=stride, padding=padding,
                                operand_dtype=jnp.float32)
    ref_bf16 = reference_forward(x, gamma, beta, conv_w, conv_b, eps=eps,
                                 kp=kernel_size_p, sp=stride_p, pp=padding_p,
                                 stride=stride, padding=padding,
                                 operand_dtype=jnp.bfloat16)

    assert out.shape == ref_f32.shape, (out.shape, ref_f32.shape)
    # Tight check against a bf16-operand reference (same rounding points as the
    # kernel: f32 BN/pool/relu, bf16 MXU operands, f32 accumulation + bias).
    assert jnp.allclose(out, ref_bf16, atol=1e-2, rtol=1e-2), \
        float(jnp.max(jnp.abs(out - ref_bf16)))
    # Loose sanity check against the pure-f32 module semantics (expected bf16
    # operand rounding only).
    assert jnp.allclose(out, ref_f32, atol=1e-1, rtol=1e-1), \
        float(jnp.max(jnp.abs(out - ref_f32)))

    print("KERNEL_OK")
</pallas_src>

<mosaic_0001>
module attributes {stable_mosaic.version = 11 : i64} {
  func.func @bn_pool_relu_kernel(%arg0: i32, %arg1: memref<64x4x128xf32, #tpu.memory_space<vmem>>, %arg2: memref<1x1x128xf32, #tpu.memory_space<vmem>>, %arg3: memref<1x1x128xf32, #tpu.memory_space<vmem>>, %arg4: memref<64x128xbf16, #tpu.memory_space<vmem>>) attributes {dimension_semantics = [#tpu.dimension_semantics<parallel>], iteration_bounds = array<i64: 2>, scalar_prefetch = 0 : i64, scratch_operands = 0 : i64, tpu.core_type = #tpu.core_type<tc>, window_params = [{transform_indices = @transform_0, window_bounds = array<i64: 64, 4, 128>}, {pipeline_mode = #tpu.pipeline_mode<synchronous>, transform_indices = @transform_1, window_bounds = array<i64: 1, 1, 128>}, {pipeline_mode = #tpu.pipeline_mode<synchronous>, transform_indices = @transform_2, window_bounds = array<i64: 1, 1, 128>}, {transform_indices = @transform_3, window_bounds = array<i64: 64, 128>}]} {
    %c0 = arith.constant 0 : index
    %c0_0 = arith.constant 0 : index
    %c0_1 = arith.constant 0 : index
    %0 = vector.load %arg1[%c0, %c0_0, %c0_1] : memref<64x4x128xf32, #tpu.memory_space<vmem>>, vector<64x4x128xf32>
    %c0_2 = arith.constant 0 : index
    %c0_3 = arith.constant 0 : index
    %c0_4 = arith.constant 0 : index
    %1 = vector.load %arg2[%c0_2, %c0_3, %c0_4] : memref<1x1x128xf32, #tpu.memory_space<vmem>>, vector<1x1x128xf32>
    %2 = vector.broadcast %1 : vector<1x1x128xf32> to vector<64x4x128xf32>
    %3 = arith.mulf %0, %2 : vector<64x4x128xf32>
    %c0_5 = arith.constant 0 : index
    %c0_6 = arith.constant 0 : index
    %c0_7 = arith.constant 0 : index
    %4 = vector.load %arg3[%c0_5, %c0_6, %c0_7] : memref<1x1x128xf32, #tpu.memory_space<vmem>>, vector<1x1x128xf32>
    %5 = vector.broadcast %4 : vector<1x1x128xf32> to vector<64x4x128xf32>
    %6 = arith.addf %3, %5 : vector<64x4x128xf32>
    %cst = arith.constant dense<0xFF800000> : vector<64x128xf32>
    %7 = vector.multi_reduction <maximumf>, %6, %cst [1] : vector<64x4x128xf32> to vector<64x128xf32>
    %cst_8 = arith.constant 0.000000e+00 : f32
    %8 = vector.broadcast %cst_8 : f32 to vector<64x128xf32>
    %9 = arith.maximumf %7, %8 : vector<64x128xf32>
    %10 = arith.truncf %9 : vector<64x128xf32> to vector<64x128xbf16>
    %c0_9 = arith.constant 0 : index
    %c0_10 = arith.constant 0 : index
    %11 = vector.load %arg4[%c0_9, %c0_10] : memref<64x128xbf16, #tpu.memory_space<vmem>>, vector<64x128xbf16>
    tpu.vector_store %arg4[%c0_9, %c0_10], %10 {strides = array<i32>} : memref<64x128xbf16, #tpu.memory_space<vmem>>, vector<64x128xbf16>,
    return
  }
  func.func @transform_0(%arg0: i32) -> (i32, i32, i32) {
    %c0_i32 = arith.constant 0 : i32
    %c0_i32_0 = arith.constant 0 : i32
    %c0_i32_1 = arith.constant 0 : i32
    return %arg0, %c0_i32, %c0_i32_0 : i32, i32, i32
  }
  func.func @transform_1(%arg0: i32) -> (i32, i32, i32) {
    %c0_i32 = arith.constant 0 : i32
    %c0_i32_0 = arith.constant 0 : i32
    %c0_i32_1 = arith.constant 0 : i32
    %c0_i32_2 = arith.constant 0 : i32
    return %c0_i32, %c0_i32_0, %c0_i32_1 : i32, i32, i32
  }
  func.func @transform_2(%arg0: i32) -> (i32, i32, i32) {
    %c0_i32 = arith.constant 0 : i32
    %c0_i32_0 = arith.constant 0 : i32
    %c0_i32_1 = arith.constant 0 : i32
    %c0_i32_2 = arith.constant 0 : i32
    return %c0_i32, %c0_i32_0, %c0_i32_1 : i32, i32, i32
  }
  func.func @transform_3(%arg0: i32) -> (i32, i32) {
    %c0_i32 = arith.constant 0 : i32
    %c0_i32_0 = arith.constant 0 : i32
    return %arg0, %c0_i32 : i32, i32
  }
}

module attributes {stable_mosaic.version = 11 : i64} {
  func.func @conv_kernel(%arg0: i32, %arg1: i32, %arg2: i32, %arg3: memref<1x10x10x128xbf16, #tpu.memory_space<vmem>>, %arg4: memref<3x3x128x128xbf16, #tpu.memory_space<vmem>>, %arg5: memref<1x128xf32, #tpu.memory_space<vmem>>, %arg6: memref<1x64x128xf32, #tpu.memory_space<vmem>>) attributes {dimension_semantics = [#tpu.dimension_semantics<parallel>, #tpu.dimension_semantics<parallel>, #tpu.dimension_semantics<arbitrary>], iteration_bounds = array<i64: 2, 1, 1>, scalar_prefetch = 0 : i64, scratch_operands = 0 : i64, tpu.core_type = #tpu.core_type<tc>, window_params = [{transform_indices = @transform_0, window_bounds = array<i64: 1, 10, 10, 128>}, {transform_indices = @transform_1, window_bounds = array<i64: 3, 3, 128, 128>}, {transform_indices = @transform_2, window_bounds = array<i64: 1, 128>}, {transform_indices = @transform_3, window_bounds = array<i64: 1, 64, 128>}]} {
    %c0_i32 = arith.constant 0 : i32
    %0 = arith.cmpi eq, %arg2, %c0_i32 : i32
    %1 = arith.extui %0 : i1 to i32
    %c0_i32_0 = arith.constant 0 : i32
    %2 = arith.cmpi ne, %1, %c0_i32_0 : i32
    scf.if %2 {
      %c0_85 = arith.constant 0 : index
      %c0_86 = arith.constant 0 : index
      %73 = vector.load %arg5[%c0_85, %c0_86] : memref<1x128xf32, #tpu.memory_space<vmem>>, vector<1x128xf32>
      %74 = vector.shape_cast %73 : vector<1x128xf32> to vector<1x128xf32>
      %75 = vector.broadcast %74 : vector<1x128xf32> to vector<64x128xf32>
      %c0_87 = arith.constant 0 : index
      %c0_88 = arith.constant 0 : index
      %c0_89 = arith.constant 0 : index
      %76 = vector.load %arg6[%c0_87, %c0_88, %c0_89] : memref<1x64x128xf32, #tpu.memory_space<vmem>>, vector<1x64x128xf32>
      %77 = vector.shape_cast %76 : vector<1x64x128xf32> to vector<64x128xf32>
      %78 = vector.shape_cast %75 : vector<64x128xf32> to vector<1x64x128xf32>
      tpu.vector_store %arg6[%c0_87, %c0_88, %c0_89], %78 {strides = array<i32>} : memref<1x64x128xf32, #tpu.memory_space<vmem>>, vector<1x64x128xf32>,
    } else {
    }
    %cst = arith.constant 0.000000e+00 : f32
    %3 = vector.broadcast %cst : f32 to vector<64x128xf32>
    %c0 = arith.constant 0 : index
    %c0_1 = arith.constant 0 : index
    %c0_2 = arith.constant 0 : index
    %c0_3 = arith.constant 0 : index
    %4 = vector.load %arg3[%c0, %c0_1, %c0_2, %c0_3] : memref<1x10x10x128xbf16, #tpu.memory_space<vmem>>, vector<1x8x8x128xbf16>
    %5 = vector.shape_cast %4 : vector<1x8x8x128xbf16> to vector<8x8x128xbf16>
    %6 = vector.shape_cast %5 : vector<8x8x128xbf16> to vector<64x128xbf16>
    %c0_4 = arith.constant 0 : index
    %c0_5 = arith.constant 0 : index
    %c0_6 = arith.constant 0 : index
    %c0_7 = arith.constant 0 : index
    %7 = vector.load %arg4[%c0_4, %c0_5, %c0_6, %c0_7] : memref<3x3x128x128xbf16, #tpu.memory_space<vmem>>, vector<1x1x128x128xbf16>
    %8 = vector.shape_cast %7 : vector<1x1x128x128xbf16> to vector<128x128xbf16>
    %cst_8 = arith.constant dense<0.000000e+00> : vector<64x128xf32>
    %9 = tpu.matmul %6, %8, %cst_8 {dimension_numbers = #tpu.dot_dimension_numbers<[1], [0], [0], [1], [0, 0, 1, 1], [], []>} : vector<64x128xbf16>, vector<128x128xbf16>, vector<64x128xf32> -> vector<64x128xf32>
    %10 = arith.addf %3, %9 : vector<64x128xf32>
    %c0_9 = arith.constant 0 : index
    %c0_10 = arith.constant 0 : index
    %c1 = arith.constant 1 : index
    %c0_11 = arith.constant 0 : index
    %11 = vector.load %arg3[%c0_9, %c0_10, %c1, %c0_11] : memref<1x10x10x128xbf16, #tpu.memory_space<vmem>>, vector<1x8x8x128xbf16>
    %12 = vector.shape_cast %11 : vector<1x8x8x128xbf16> to vector<8x8x128xbf16>
    %13 = vector.shape_cast %12 : vector<8x8x128xbf16> to vector<64x128xbf16>
    %c0_12 = arith.constant 0 : index
    %c1_13 = arith.constant 1 : index
    %c0_14 = arith.constant 0 : index
    %c0_15 = arith.constant 0 : index
    %14 = vector.load %arg4[%c0_12, %c1_13, %c0_14, %c0_15] : memref<3x3x128x128xbf16, #tpu.memory_space<vmem>>, vector<1x1x128x128xbf16>
    %15 = vector.shape_cast %14 : vector<1x1x128x128xbf16> to vector<128x128xbf16>
    %cst_16 = arith.constant dense<0.000000e+00> : vector<64x128xf32>
    %16 = tpu.matmul %13, %15, %cst_16 {dimension_numbers = #tpu.dot_dimension_numbers<[1], [0], [0], [1], [0, 0, 1, 1], [], []>} : vector<64x128xbf16>, vector<128x128xbf16>, vector<64x128xf32> -> vector<64x128xf32>
    %17 = arith.addf %10, %16 : vector<64x128xf32>
    %c0_17 = arith.constant 0 : index
    %c0_18 = arith.constant 0 : index
    %c2 = arith.constant 2 : index
    %c0_19 = arith.constant 0 : index
    %18 = vector.load %arg3[%c0_17, %c0_18, %c2, %c0_19] : memref<1x10x10x128xbf16, #tpu.memory_space<vmem>>, vector<1x8x8x128xbf16>
    %19 = vector.shape_cast %18 : vector<1x8x8x128xbf16> to vector<8x8x128xbf16>
    %20 = vector.shape_cast %19 : vector<8x8x128xbf16> to vector<64x128xbf16>
    %c0_20 = arith.constant 0 : index
    %c2_21 = arith.constant 2 : index
    %c0_22 = arith.constant 0 : index
    %c0_23 = arith.constant 0 : index
    %21 = vector.load %arg4[%c0_20, %c2_21, %c0_22, %c0_23] : memref<3x3x128x128xbf16, #tpu.memory_space<vmem>>, vector<1x1x128x128xbf16>
    %22 = vector.shape_cast %21 : vector<1x1x128x128xbf16> to vector<128x128xbf16>
    %cst_24 = arith.constant dense<0.000000e+00> : vector<64x128xf32>
    %23 = tpu.matmul %20, %22, %cst_24 {dimension_numbers = #tpu.dot_dimension_numbers<[1], [0], [0], [1], [0, 0, 1, 1], [], []>} : vector<64x128xbf16>, vector<128x128xbf16>, vector<64x128xf32> -> vector<64x128xf32>
    %24 = arith.addf %17, %23 : vector<64x128xf32>
    %c0_25 = arith.constant 0 : index
    %c1_26 = arith.constant 1 : index
    %c0_27 = arith.constant 0 : index
    %c0_28 = arith.constant 0 : index
    %25 = vector.load %arg3[%c0_25, %c1_26, %c0_27, %c0_28] : memref<1x10x10x128xbf16, #tpu.memory_space<vmem>>, vector<1x8x8x128xbf16>
    %26 = vector.shape_cast %25 : vector<1x8x8x128xbf16> to vector<8x8x128xbf16>
    %27 = vector.shape_cast %26 : vector<8x8x128xbf16> to vector<64x128xbf16>
    %c1_29 = arith.constant 1 : index
    %c0_30 = arith.constant 0 : index
    %c0_31 = arith.constant 0 : index
    %c0_32 = arith.constant 0 : index
    %28 = vector.load %arg4[%c1_29, %c0_30, %c0_31, %c0_32] : memref<3x3x128x128xbf16, #tpu.memory_space<vmem>>, vector<1x1x128x128xbf16>
    %29 = vector.shape_cast %28 : vector<1x1x128x128xbf16> to vector<128x128xbf16>
    %cst_33 = arith.constant dense<0.000000e+00> : vector<64x128xf32>
    %30 = tpu.matmul %27, %29, %cst_33 {dimension_numbers = #tpu.dot_dimension_numbers<[1], [0], [0], [1], [0, 0, 1, 1], [], []>} : vector<64x128xbf16>, vector<128x128xbf16>, vector<64x128xf32> -> vector<64x128xf32>
    %31 = arith.addf %24, %30 : vector<64x128xf32>
    %c0_34 = arith.constant 0 : index
    %c1_35 = arith.constant 1 : index
    %c1_36 = arith.constant 1 : index
    %c0_37 = arith.constant 0 : index
    %32 = vector.load %arg3[%c0_34, %c1_35, %c1_36, %c0_37] : memref<1x10x10x128xbf16, #tpu.memory_space<vmem>>, vector<1x8x8x128xbf16>
    %33 = vector.shape_cast %32 : vector<1x8x8x128xbf16> to vector<8x8x128xbf16>
    %34 = vector.shape_cast %33 : vector<8x8x128xbf16> to vector<64x128xbf16>
    %c1_38 = arith.constant 1 : index
    %c1_39 = arith.constant 1 : index
    %c0_40 = arith.constant 0 : index
    %c0_41 = arith.constant 0 : index
    %35 = vector.load %arg4[%c1_38, %c1_39, %c0_40, %c0_41] : memref<3x3x128x128xbf16, #tpu.memory_space<vmem>>, vector<1x1x128x128xbf16>
    %36 = vector.shape_cast %35 : vector<1x1x128x128xbf16> to vector<128x128xbf16>
    %cst_42 = arith.constant dense<0.000000e+00> : vector<64x128xf32>
    %37 = tpu.matmul %34, %36, %cst_42 {dimension_numbers = #tpu.dot_dimension_numbers<[1], [0], [0], [1], [0, 0, 1, 1], [], []>} : vector<64x128xbf16>, vector<128x128xbf16>, vector<64x128xf32> -> vector<64x128xf32>
    %38 = arith.addf %31, %37 : vector<64x128xf32>
    %c0_43 = arith.constant 0 : index
    %c1_44 = arith.constant 1 : index
    %c2_45 = arith.constant 2 : index
    %c0_46 = arith.constant 0 : index
    %39 = vector.load %arg3[%c0_43, %c1_44, %c2_45, %c0_46] : memref<1x10x10x128xbf16, #tpu.memory_space<vmem>>, vector<1x8x8x128xbf16>
    %40 = vector.shape_cast %39 : vector<1x8x8x128xbf16> to vector<8x8x128xbf16>
    %41 = vector.shape_cast %40 : vector<8x8x128xbf16> to vector<64x128xbf16>
    %c1_47 = arith.constant 1 : index
    %c2_48 = arith.constant 2 : index
    %c0_49 = arith.constant 0 : index
    %c0_50 = arith.constant 0 : index
    %42 = vector.load %arg4[%c1_47, %c2_48, %c0_49, %c0_50] : memref<3x3x128x128xbf16, #tpu.memory_space<vmem>>, vector<1x1x128x128xbf16>
    %43 = vector.shape_cast %42 : vector<1x1x128x128xbf16> to vector<128x128xbf16>
    %cst_51 = arith.constant dense<0.000000e+00> : vector<64x128xf32>
    %44 = tpu.matmul %41, %43, %cst_51 {dimension_numbers = #tpu.dot_dimension_numbers<[1], [0], [0], [1], [0, 0, 1, 1], [], []>} : vector<64x128xbf16>, vector<128x128xbf16>, vector<64x128xf32> -> vector<64x128xf32>
    %45 = arith.addf %38, %44 : vector<64x128xf32>
    %c0_52 = arith.constant 0 : index
    %c2_53 = arith.constant 2 : index
    %c0_54 = arith.constant 0 : index
    %c0_55 = arith.constant 0 : index
    %46 = vector.load %arg3[%c0_52, %c2_53, %c0_54, %c0_55] : memref<1x10x10x128xbf16, #tpu.memory_space<vmem>>, vector<1x8x8x128xbf16>
    %47 = vector.shape_cast %46 : vector<1x8x8x128xbf16> to vector<8x8x128xbf16>
    %48 = vector.shape_cast %47 : vector<8x8x128xbf16> to vector<64x128xbf16>
    %c2_56 = arith.constant 2 : index
    %c0_57 = arith.constant 0 : index
    %c0_58 = arith.constant 0 : index
    %c0_59 = arith.constant 0 : index
    %49 = vector.load %arg4[%c2_56, %c0_57, %c0_58, %c0_59] : memref<3x3x128x128xbf16, #tpu.memory_space<vmem>>, vector<1x1x128x128xbf16>
    %50 = vector.shape_cast %49 : vector<1x1x128x128xbf16> to vector<128x128xbf16>
    %cst_60 = arith.constant dense<0.000000e+00> : vector<64x128xf32>
    %51 = tpu.matmul %48, %50, %cst_60 {dimension_numbers = #tpu.dot_dimension_numbers<[1], [0], [0], [1], [0, 0, 1, 1], [], []>} : vector<64x128xbf16>, vector<128x128xbf16>, vector<64x128xf32> -> vector<64x128xf32>
    %52 = arith.addf %45, %51 : vector<64x128xf32>
    %c0_61 = arith.constant 0 : index
    %c2_62 = arith.constant 2 : index
    %c1_63 = arith.constant 1 : index
    %c0_64 = arith.constant 0 : index
    %53 = vector.load %arg3[%c0_61, %c2_62, %c1_63, %c0_64] : memref<1x10x10x128xbf16, #tpu.memory_space<vmem>>, vector<1x8x8x128xbf16>
    %54 = vector.shape_cast %53 : vector<1x8x8x128xbf16> to vector<8x8x128xbf16>
    %55 = vector.shape_cast %54 : vector<8x8x128xbf16> to vector<64x128xbf16>
    %c2_65 = arith.constant 2 : index
    %c1_66 = arith.constant 1 : index
    %c0_67 = arith.constant 0 : index
    %c0_68 = arith.constant 0 : index
    %56 = vector.load %arg4[%c2_65, %c1_66, %c0_67, %c0_68] : memref<3x3x128x128xbf16, #tpu.memory_space<vmem>>, vector<1x1x128x128xbf16>
    %57 = vector.shape_cast %56 : vector<1x1x128x128xbf16> to vector<128x128xbf16>
    %cst_69 = arith.constant dense<0.000000e+00> : vector<64x128xf32>
    %58 = tpu.matmul %55, %57, %cst_69 {dimension_numbers = #tpu.dot_dimension_numbers<[1], [0], [0], [1], [0, 0, 1, 1], [], []>} : vector<64x128xbf16>, vector<128x128xbf16>, vector<64x128xf32> -> vector<64x128xf32>
    %59 = arith.addf %52, %58 : vector<64x128xf32>
    %c0_70 = arith.constant 0 : index
    %c2_71 = arith.constant 2 : index
    %c2_72 = arith.constant 2 : index
    %c0_73 = arith.constant 0 : index
    %60 = vector.load %arg3[%c0_70, %c2_71, %c2_72, %c0_73] : memref<1x10x10x128xbf16, #tpu.memory_space<vmem>>, vector<1x8x8x128xbf16>
    %61 = vector.shape_cast %60 : vector<1x8x8x128xbf16> to vector<8x8x128xbf16>
    %62 = vector.shape_cast %61 : vector<8x8x128xbf16> to vector<64x128xbf16>
    %c2_74 = arith.constant 2 : index
    %c2_75 = arith.constant 2 : index
    %c0_76 = arith.constant 0 : index
    %c0_77 = arith.constant 0 : index
    %63 = vector.load %arg4[%c2_74, %c2_75, %c0_76, %c0_77] : memref<3x3x128x128xbf16, #tpu.memory_space<vmem>>, vector<1x1x128x128xbf16>
    %64 = vector.shape_cast %63 : vector<1x1x128x128xbf16> to vector<128x128xbf16>
    %cst_78 = arith.constant dense<0.000000e+00> : vector<64x128xf32>
    %65 = tpu.matmul %62, %64, %cst_78 {dimension_numbers = #tpu.dot_dimension_numbers<[1], [0], [0], [1], [0, 0, 1, 1], [], []>} : vector<64x128xbf16>, vector<128x128xbf16>, vector<64x128xf32> -> vector<64x128xf32>
    %66 = arith.addf %59, %65 : vector<64x128xf32>
    %c0_79 = arith.constant 0 : index
    %c0_80 = arith.constant 0 : index
    %c0_81 = arith.constant 0 : index
    %67 = vector.load %arg6[%c0_79, %c0_80, %c0_81] : memref<1x64x128xf32, #tpu.memory_space<vmem>>, vector<1x64x128xf32>
    %68 = vector.shape_cast %67 : vector<1x64x128xf32> to vector<64x128xf32>
    %69 = arith.addf %68, %66 : vector<64x128xf32>
    %c0_82 = arith.constant 0 : index
    %c0_83 = arith.constant 0 : index
    %c0_84 = arith.constant 0 : index
    %70 = vector.load %arg6[%c0_82, %c0_83, %c0_84] : memref<1x64x128xf32, #tpu.memory_space<vmem>>, vector<1x64x128xf32>
    %71 = vector.shape_cast %70 : vector<1x64x128xf32> to vector<64x128xf32>
    %72 = vector.shape_cast %69 : vector<64x128xf32> to vector<1x64x128xf32>
    tpu.vector_store %arg6[%c0_82, %c0_83, %c0_84], %72 {strides = array<i32>} : memref<1x64x128xf32, #tpu.memory_space<vmem>>, vector<1x64x128xf32>,
    return
  }
  func.func @transform_0(%arg0: i32, %arg1: i32, %arg2: i32) -> (i32, i32, i32, i32) {
    %c0_i32 = arith.constant 0 : i32
    %c0_i32_0 = arith.constant 0 : i32
    %c0_i32_1 = arith.constant 0 : i32
    return %arg0, %c0_i32, %c0_i32_0, %arg2 : i32, i32, i32, i32
  }
  func.func @transform_1(%arg0: i32, %arg1: i32, %arg2: i32) -> (i32, i32, i32, i32) {
    %c0_i32 = arith.constant 0 : i32
    %c0_i32_0 = arith.constant 0 : i32
    %c0_i32_1 = arith.constant 0 : i32
    return %c0_i32, %c0_i32_0, %arg2, %arg1 : i32, i32, i32, i32
  }
  func.func @transform_2(%arg0: i32, %arg1: i32, %arg2: i32) -> (i32, i32) {
    %c0_i32 = arith.constant 0 : i32
    %c0_i32_0 = arith.constant 0 : i32
    return %c0_i32, %arg1 : i32, i32
  }
  func.func @transform_3(%arg0: i32, %arg1: i32, %arg2: i32) -> (i32, i32, i32) {
    %c0_i32 = arith.constant 0 : i32
    %c0_i32_0 = arith.constant 0 : i32
    return %arg0, %c0_i32, %arg1 : i32, i32, i32
  }
}

</mosaic_0001>

<bundles_post_ra>
// kernel: bn_max_relu_conv.2
= control target key start
LH: loop header
LB: loop body
LE: loop exit
PB: predicated region body
PF: predicated region fallthrough
CT: control target
= control target key end

     0   :  { %s1533_s12 = smov 0   ;;  %s2873_s0 = inlined_call_operand.vmem [shape: f32[128,4,128], index: 0, kind: input, shape index: {}]   ;;  %s2874_s1 = inlined_call_operand.vmem [shape: f32[1,1,128], index: 1, kind: input, shape index: {}]   ;;  %s2875_s2 = inlined_call_operand.vmem [shape: f32[1,1,128], index: 2, kind: input, shape index: {}]   ;;  %s2876_s3 = inlined_call_operand.vmem [shape: bf16[128,128], index: 3, kind: output, shape index: {}]  }
   0x1 LB: > { %s1356_s13 = sadd.s32 4294967295, %s1511_s12   ;;  %p1360_p0 = scmp.ge.s32.totalorder %s1511_s12, 1  ;;  %s1511_s12 = sphi %s1533_s12, %s13_s12  }
   0x2   : > { %p138_p1 = scmp.lt.s32.totalorder %s1511_s12, 3 }
   0x4   : > { %p139_p2 = pnand %p1360_p0, %p138_p1 }
   0x6   : > { %142 = sbr.rel (%p139_p2) target bundleno = 239 (0xef), region = 32 }
   0xd   : > { %s1361_s14 = sshll.u32 %s1356_s13, 6  ;;  %v1546_v0 = vld [vmem:[%s2874_s1] ss:$0 sm:$0xff]  ;;  %vm380_vm0 = vcmask 1043456   ;;  %s2696_s23 = sshll.u32 %s1356_s13, 3  ;;  %vm1213_vm1 = vcmask 1041409  }
   0xe   : > { %p163_p3 = scmp.lt.s32.totalorder %s1361_s14, 127  ;;  %v1556_v1 = vld [vmem:[%s2875_s2] ss:$0 sm:$0xff]  ;;  %vm1215_vm2 = vcmask 1042434   ;;  %vm1217_vm3 = vcmask 1043459   ;;  %vm1219_vm4 = vcmask 1044484  }
   0xf   : > { %vm1221_vm5 = vcmask 1045509   ;;  %vm1223_vm6 = vcmask 1046534   ;;  %vm1225_vm7 = vcmask 1047559   ;;  %p169_p4 = scmp.lt.s32.totalorder %s2696_s23, 15 }
  0x10   : > { %s3199_s14 = smov (!%p163_p3, %s1361_s14), 127 }
  0x11   : > { %s1362_s15 = sshll.u32 %s3199_s14, 2  ;;  %s3201_s23 = smov (!%p169_p4, %s2696_s23), 15 }
  0x12   : > { %s1551_s20 = scalar_lea.vmem %s2873_s0, %s1362_s15  ;;  %s1364_s24 = sshll.u32 %s3201_s23, 2 }
  0x13   : > { %v174_v2 = vld [vmem:[%s1551_s20] sm:$0xf]  ;;  %v175_v3 = vld [vmem:[%s1551_s20 + $0x4] sm:$0xf]  ;;  %v176_v4 = vld [vmem:[%s1551_s20 + $0x8] sm:$0xf]  ;;  %s172_s27 = scalar_lea.vmem %s2876_s3, %s1364_s24 }
  0x14   : > { %v177_v5 = vld [vmem:[%s1551_s20 + $0xc] sm:$0xf]  ;;  %v178_v6 = vld [vmem:[%s1551_s20 + $0x10] sm:$0xf]  ;;  %v179_v7 = vld [vmem:[%s1551_s20 + $0x14] sm:$0xf]  ;;  %v245_v8 = vmul.f32 %v1546_v0, %v174_v2  ;;  %v246_v9 = vmul.f32 %v1546_v0, %v175_v3  ;;  %v247_v10 = vmul.f32 %v1546_v0, %v176_v4 }
  0x15   : > { %v180_v11 = vld [vmem:[%s1551_s20 + $0x18] sm:$0xf]  ;;  %v181_v12 = vld [vmem:[%s1551_s20 + $0x1c] sm:$0xf]  ;;  %v182_v13 = vld [vmem:[%s1551_s20 + $0x20] sm:$0xf]  ;;  %v248_v14 = vmul.f32 %v1546_v0, %v177_v5  ;;  %v249_v15 = vmul.f32 %v1546_v0, %v178_v6  ;;  %v250_v16 = vmul.f32 %v1546_v0, %v179_v7 }
  0x16   : > { %v183_v17 = vld [vmem:[%s1551_s20 + $0x24] sm:$0xf]  ;;  %v184_v18 = vld [vmem:[%s1551_s20 + $0x28] sm:$0xf]  ;;  %v185_v19 = vld [vmem:[%s1551_s20 + $0x2c] sm:$0xf]  ;;  %v251_v20 = vmul.f32 %v1546_v0, %v180_v11  ;;  %v252_v21 = vmul.f32 %v1546_v0, %v181_v12  ;;  %v253_v22 = vmul.f32 %v1546_v0, %v182_v13  ;;  %v1580_v23 = vadd.f32 %v1556_v1, %v245_v8 }
  0x17   : > { %v186_v24 = vld [vmem:[%s1551_s20 + $0x30] sm:$0xf]  ;;  %v187_v25 = vld [vmem:[%s1551_s20 + $0x34] sm:$0xf]  ;;  %v188_v26 = vld [vmem:[%s1551_s20 + $0x38] sm:$0xf]  ;;  %v254_v27 = vmul.f32 %v1546_v0, %v183_v17  ;;  %v1587_v28 = vmul.f32 %v1546_v0, %v184_v18  ;;  %v1590_v29 = vmul.f32 %v1546_v0, %v185_v19  ;;  %v1593_v30 = vadd.f32 %v1556_v1, %v246_v9 }
  0x18   : > { %v189_v31 = vld [vmem:[%s1551_s20 + $0x3c] sm:$0xf]  ;;  %v190_v32 = vld [vmem:[%s1551_s20 + $0x40] sm:$0xf]  ;;  %v191_v33 = vld [vmem:[%s1551_s20 + $0x44] sm:$0xf]  ;;  %v1599_v34 = vmul.f32 %v1546_v0, %v186_v24  ;;  %v1602_v35 = vmul.f32 %v1546_v0, %v187_v25  ;;  %v1605_v36 = vmul.f32 %v1546_v0, %v188_v26  ;;  %v1608_v37 = vadd.f32 %v1556_v1, %v247_v10 }
  0x19   : > { %v192_v38 = vld [vmem:[%s1551_s20 + $0x48] sm:$0xf]  ;;  %v193_v39 = vld [vmem:[%s1551_s20 + $0x4c] sm:$0xf]  ;;  %v194_v40 = vld [vmem:[%s1551_s20 + $0x50] sm:$0xf]  ;;  %v1614_v41 = vmul.f32 %v1546_v0, %v189_v31  ;;  %v1617_v42 = vmul.f32 %v1546_v0, %v190_v32  ;;  %v1620_v43 = vmul.f32 %v1546_v0, %v191_v33  ;;  %v1623_v44 = vadd.f32 %v1556_v1, %v248_v14 }
  0x1a   : > { %v195_v45 = vld [vmem:[%s1551_s20 + $0x54] sm:$0xf]  ;;  %v196_v46 = vld [vmem:[%s1551_s20 + $0x58] sm:$0xf]  ;;  %v197_v47 = vld [vmem:[%s1551_s20 + $0x5c] sm:$0xf]  ;;  %v1629_v48 = vmul.f32 %v1546_v0, %v192_v38  ;;  %v1632_v49 = vmul.f32 %v1546_v0, %v193_v39  ;;  %v1635_v50 = vmul.f32 %v1546_v0, %v194_v40  ;;  %v1638_v51 = vadd.f32 %v1556_v1, %v249_v15 }
  0x1b   : > { %v198_v52 = vld [vmem:[%s1551_s20 + $0x60] sm:$0xf]  ;;  %v199_v53 = vld [vmem:[%s1551_s20 + $0x64] sm:$0xf]  ;;  %v200_v54 = vld [vmem:[%s1551_s20 + $0x68] sm:$0xf]  ;;  %v1644_v55 = vmul.f32 %v1546_v0, %v195_v45  ;;  %v1647_v56 = vmul.f32 %v1546_v0, %v196_v46  ;;  %v1650_v57 = vmul.f32 %v1546_v0, %v197_v47  ;;  %v1653_v58 = vadd.f32 %v1556_v1, %v250_v16 }
  0x1c   : > { %v201_v59 = vld [vmem:[%s1551_s20 + $0x6c] sm:$0xf]  ;;  %v202_v60 = vld [vmem:[%s1551_s20 + $0x70] sm:$0xf]  ;;  %v203_v61 = vld [vmem:[%s1551_s20 + $0x74] sm:$0xf]  ;;  %v1659_v62 = vmul.f32 %v1546_v0, %v198_v52  ;;  %v1662_v63 = vmul.f32 %v1546_v0, %v199_v53  ;;  %v1665_v2 = vmul.f32 %v1546_v0, %v200_v54  ;;  %v1668_v3 = vadd.f32 %v1556_v1, %v251_v20 }
  0x1d   : > { %v204_v4 = vld [vmem:[%s1551_s20 + $0x78] sm:$0xf]  ;;  %v205_v5 = vld [vmem:[%s1551_s20 + $0x7c] sm:$0xf]  ;;  %v206_v6 = vld [vmem:[%s1551_s20 + $0x80] sm:$0xf]  ;;  %v1674_v7 = vmul.f32 %v1546_v0, %v201_v59  ;;  %v1677_v8 = vmul.f32 %v1546_v0, %v202_v60  ;;  %v1680_v9 = vmul.f32 %v1546_v0, %v203_v61  ;;  %v1683_v10 = vadd.f32 %v1556_v1, %v252_v21 }
  0x1e   : > { %v207_v11 = vld [vmem:[%s1551_s20 + $0x84] sm:$0xf]  ;;  %v208_v12 = vld [vmem:[%s1551_s20 + $0x88] sm:$0xf]  ;;  %v209_v13 = vld [vmem:[%s1551_s20 + $0x8c] sm:$0xf]  ;;  %v1689_v14 = vmul.f32 %v1546_v0, %v204_v4  ;;  %v1692_v15 = vmul.f32 %v1546_v0, %v205_v5  ;;  %v1695_v16 = vmul.f32 %v1546_v0, %v206_v6  ;;  %v1698_v17 = vadd.f32 %v1556_v1, %v253_v22 }
  0x1f   : > { %2925 = vst [vmem:[#allocation2_spill] sm:$0xff] %v1683_v10  ;;  %v210_v18 = vld [vmem:[%s1551_s20 + $0x90] sm:$0xf]  ;;  %v211_v19 = vld [vmem:[%s1551_s20 + $0x94] sm:$0xf]  ;;  %v1704_v21 = vmul.f32 %v1546_v0, %v207_v11  ;;  %v1707_v24 = vmul.f32 %v1546_v0, %v208_v12  ;;  %v1710_v25 = vmul.f32 %v1546_v0, %v209_v13  ;;  %v1713_v26 = vadd.f32 %v1556_v1, %v254_v27 }
  0x20   : > { %2926 = vst [vmem:[#allocation3_spill] sm:$0xff] %v1698_v17  ;;  %v212_v20 = vld [vmem:[%s1551_s20 + $0x98] sm:$0xf]  ;;  %v213_v22 = vld [vmem:[%s1551_s20 + $0x9c] sm:$0xf]  ;;  %v1719_v33 = vmul.f32 %v1546_v0, %v210_v18  ;;  %v1722_v38 = vmul.f32 %v1546_v0, %v211_v19  ;;  %v1729_v40 = vadd.f32 %v1556_v1, %v1587_v28  ;;  %v1745_v54 = vadd.f32 %v1556_v1, %v1590_v29 }
  0x21   : > { %2927 = vst [vmem:[#allocation4_spill] sm:$0xff] %v1713_v26  ;;  %v214_v31 = vld [vmem:[%s1551_s20 + $0xa0] sm:$0xf]  ;;  %v215_v32 = vld [vmem:[%s1551_s20 + $0xa4] sm:$0xf]  ;;  %v1725_v39 = vmul.f32 %v1546_v0, %v212_v20  ;;  %v1735_v47 = vmul.f32 %v1546_v0, %v213_v22  ;;  %v1761_v6 = vadd.f32 %v1556_v1, %v1599_v34  ;;  %v1777_v20 = vadd.f32 %v1556_v1, %v1602_v35 }
  0x22   : > { %2928 = vst [vmem:[#allocation5_spill] sm:$0xff] %v1729_v40  ;;  %v216_v27 = vld [vmem:[%s1551_s20 + $0xa8] sm:$0xf]  ;;  %v217_v45 = vld [vmem:[%s1551_s20 + $0xac] sm:$0xf]  ;;  %v1738_v52 = vmul.f32 %v1546_v0, %v214_v31  ;;  %v1741_v53 = vmul.f32 %v1546_v0, %v215_v32  ;;  %2929 = vst [vmem:[#allocation6_spill] sm:$0xff] %v1745_v54 }
  0x23   : > { %v218_v46 = vld [vmem:[%s1551_s20 + $0xb0] sm:$0xf]  ;;  %v219_v28 = vld [vmem:[%s1551_s20 + $0xb4] sm:$0xf]  ;;  %v220_v59 = vld [vmem:[%s1551_s20 + $0xb8] sm:$0xf]  ;;  %v1751_v61 = vmul.f32 %v1546_v0, %v216_v27  ;;  %v1754_v4 = vmul.f32 %v1546_v0, %v217_v45 }
  0x24   : > { %v221_v60 = vld [vmem:[%s1551_s20 + $0xbc] sm:$0xf]  ;;  %v1757_v5 = vmul.f32 %v1546_v0, %v218_v46  ;;  %2930 = vst [vmem:[#allocation7_spill] sm:$0xff] %v1761_v6  ;;  %v222_v29 = vld [vmem:[%s1551_s20 + $0xc0] sm:$0xf]  ;;  %v1767_v13 = vmul.f32 %v1546_v0, %v219_v28  ;;  %v1770_v18 = vmul.f32 %v1546_v0, %v220_v59  ;;  %2931 = vst [vmem:[#allocation8_spill] sm:$0xff] %v1777_v20 }
  0x25   : > { %v223_v11 = vld [vmem:[%s1551_s20 + $0xc4] sm:$0xf]  ;;  %v224_v12 = vld [vmem:[%s1551_s20 + $0xc8] sm:$0xf]  ;;  %v1773_v19 = vmul.f32 %v1546_v0, %v221_v60  ;;  %v225_v34 = vld [vmem:[%s1551_s20 + $0xcc] sm:$0xf]  ;;  %v293_v32 = vmul.f32 %v1546_v0, %v222_v29  ;;  %v1787_v46 = vadd.f32 %v1556_v1, %v1605_v36 }
  0x26   : > { %v226_v22 = vld [vmem:[%s1551_s20 + $0xd0] sm:$0xf]  ;;  %v227_v31 = vld [vmem:[%s1551_s20 + $0xd4] sm:$0xf]  ;;  %v294_v27 = vmul.f32 %v1546_v0, %v223_v11  ;;  %v295_v45 = vmul.f32 %v1546_v0, %v224_v12  ;;  %v228_v28 = vld [vmem:[%s1551_s20 + $0xd8] sm:$0xf]  ;;  %v296_v60 = vmul.f32 %v1546_v0, %v225_v34  ;;  %v1797_v11 = vadd.f32 %v1556_v1, %v1614_v41 }
  0x27   : > { %2932 = vst [vmem:[#allocation9_spill] sm:$0xff] %v1787_v46  ;;  %v229_v35 = vld [vmem:[%s1551_s20 + $0xdc] sm:$0xf]  ;;  %v230_v59 = vld [vmem:[%s1551_s20 + $0xe0] sm:$0xf]  ;;  %v297_v20 = vmul.f32 %v1546_v0, %v226_v22  ;;  %v298_v29 = vmul.f32 %v1546_v0, %v227_v31  ;;  %v299_v46 = vmul.f32 %v1546_v0, %v228_v28  ;;  %v1807_v34 = vadd.f32 %v1556_v1, %v1617_v42 }
  0x28   : > { %2933 = vst [vmem:[#allocation10_spill] sm:$0xff] %v1797_v11  ;;  %v231_v12 = vld [vmem:[%s1551_s20 + $0xe4] sm:$0xf]  ;;  %v232_v6 = vld [vmem:[%s1551_s20 + $0xe8] sm:$0xf]  ;;  %v300_v54 = vmul.f32 %v1546_v0, %v229_v35  ;;  %v301_v40 = vmul.f32 %v1546_v0, %v230_v59  ;;  %v1817_v28 = vadd.f32 %v1556_v1, %v1620_v43  ;;  %v1834_v43 = vadd.f32 %v1556_v1, %v1635_v50 }
  0x29   : > { %v233_v36 = vld [vmem:[%s1551_s20 + $0xec] sm:$0xf]  ;;  %2934 = vst [vmem:[#allocation11_spill] sm:$0xff] %v1807_v34  ;;  %v234_v22 = vld [vmem:[%s1551_s20 + $0xf0] sm:$0xf]  ;;  %v302_v17 = vmul.f32 %v1546_v0, %v231_v12  ;;  %v303_v41 = vmul.f32 %v1546_v0, %v232_v6  ;;  %v1825_v34 = vadd.f32 %v1556_v1, %v1629_v48  ;;  %v1830_v6 = vadd.f32 %v1556_v1, %v1632_v49 }
  0x2a   : > { %v235_v31 = vld [vmem:[%s1551_s20 + $0xf4] sm:$0xf]  ;;  %v236_v26 = vld [vmem:[%s1551_s20 + $0xf8] sm:$0xf]  ;;  %v304_v11 = vmul.f32 %v1546_v0, %v233_v36  ;;  %v237_v35 = vld [vmem:[%s1551_s20 + $0xfc] sm:$0xf]  ;;  %v305_v59 = vmul.f32 %v1546_v0, %v234_v22  ;;  %v1838_v36 = vadd.f32 %v1556_v1, %v1644_v55  ;;  %v1850_v48 = vadd.f32 %v1556_v1, %v1659_v62 }
  0x2b   : > { %v306_v10 = vmul.f32 %v1546_v0, %v235_v31  ;;  %v307_v42 = vmul.f32 %v1546_v0, %v236_v26  ;;  %v308_v12 = vmul.f32 %v1546_v0, %v237_v35  ;;  %v1842_v26 = vadd.f32 %v1556_v1, %v1647_v56 }
  0x2c   : > { %v1846_v0 = vadd.f32 %v1556_v1, %v1650_v57  ;;  %v1854_v49 = vadd.f32 %v1556_v1, %v1662_v63  ;;  %v1858_v50 = vadd.f32 %v1556_v1, %v1665_v2  ;;  %v1862_v55 = vadd.f32 %v1556_v1, %v1674_v7 }
  0x2d   : > { %v1866_v56 = vadd.f32 %v1556_v1, %v1677_v8  ;;  %v1870_v57 = vadd.f32 %v1556_v1, %v1680_v9  ;;  %v1874_v62 = vadd.f32 %v1556_v1, %v1689_v14  ;;  %v1878_v63 = vadd.f32 %v1556_v1, %v1692_v15 }
  0x2e   : > { %v1882_v2 = vadd.f32 %v1556_v1, %v1695_v16  ;;  %v1886_v7 = vadd.f32 %v1556_v1, %v1704_v21  ;;  %v1890_v8 = vadd.f32 %v1556_v1, %v1707_v24  ;;  %v1894_v9 = vadd.f32 %v1556_v1, %v1710_v25 }
  0x2f   : > { %v1898_v14 = vadd.f32 %v1556_v1, %v1719_v33  ;;  %v1902_v15 = vadd.f32 %v1556_v1, %v1722_v38  ;;  %v1906_v16 = vadd.f32 %v1556_v1, %v1725_v39  ;;  %v1910_v21 = vadd.f32 %v1556_v1, %v1735_v47 }
  0x30   : > { %v1914_v24 = vadd.f32 %v1556_v1, %v1738_v52  ;;  %v1918_v25 = vadd.f32 %v1556_v1, %v1741_v53  ;;  %v1922_v33 = vadd.f32 %v1556_v1, %v1751_v61  ;;  %v1926_v38 = vadd.f32 %v1556_v1, %v1754_v4 }
  0x31   : > { %v1930_v39 = vadd.f32 %v1556_v1, %v1757_v5  ;;  %v1934_v47 = vadd.f32 %v1556_v1, %v1767_v13  ;;  %v1938_v52 = vadd.f32 %v1556_v1, %v1770_v18  ;;  %v1942_v53 = vadd.f32 %v1556_v1, %v1773_v19 }
  0x32   : > { %v1945_v61 = vadd.f32 %v1556_v1, %v293_v32  ;;  %v1948_v4 = vadd.f32 %v1556_v1, %v294_v27  ;;  %v1951_v5 = vadd.f32 %v1556_v1, %v295_v45  ;;  %v1954_v13 = vadd.f32 %v1556_v1, %v296_v60 }
  0x33   : > { %2935 = vst [vmem:[#allocation12_spill] sm:$0xff] %v1942_v53  ;;  %v1957_v22 = vadd.f32 %v1556_v1, %v297_v20  ;;  %v1960_v18 = vadd.f32 %v1556_v1, %v298_v29  ;;  %v1963_v19 = vadd.f32 %v1556_v1, %v299_v46  ;;  %v1966_v32 = vadd.f32 %v1556_v1, %v300_v54 }
  0x34   : > { %2936 = vst [vmem:[#allocation13_spill] sm:$0xff] %v1945_v61  ;;  %2937 = vst [vmem:[#allocation14_spill] sm:$0xff] %v1948_v4  ;;  %v1969_v27 = vadd.f32 %v1556_v1, %v301_v40  ;;  %v1972_v45 = vadd.f32 %v1556_v1, %v302_v17  ;;  %v1975_v60 = vadd.f32 %v1556_v1, %v303_v41  ;;  %v381_v17 = vsel %vm380_vm0, %v1580_v23, -inf }
  0x35   : > { %2938 = vst [vmem:[#allocation15_spill] sm:$0xff] %v1951_v5  ;;  %2939 = vst [vmem:[#allocation16_spill] sm:$0xff] %v1954_v13  ;;  %v1978_v20 = vadd.f32 %v1556_v1, %v304_v11  ;;  %v1981_v29 = vadd.f32 %v1556_v1, %v305_v59  ;;  %v1984_v46 = vadd.f32 %v1556_v1, %v306_v10  ;;  %v388_v31 = vsel %vm380_vm0, %v1593_v30, -inf }
  0x36   : > { %2940 = vst [vmem:[#allocation17_spill] sm:$0xff] %v1957_v22  ;;  %2941 = vst [vmem:[#allocation18_spill] sm:$0xff] %v1960_v18  ;;  %v1987_v54 = vadd.f32 %v1556_v1, %v307_v42  ;;  %v1990_v40 = vadd.f32 %v1556_v1, %v308_v12  ;;  %v382_v11 = vrot.slane %v381_v17, 4  ;;  %v389_v41 = vrot.slane %v388_v31, 4 }
  0x37   : > { %2942 = vst [vmem:[#allocation19_spill] sm:$0xff] %v1963_v19  ;;  %2943 = vst [vmem:[#allocation20_spill] sm:$0xff] %v1966_v32  ;;  %v395_v35 = vsel %vm380_vm0, %v1608_v37, -inf  ;;  %v402_v10 = vsel %vm380_vm0, %v1623_v44, -inf  ;;  %v409_v1 = vsel %vm380_vm0, %v1638_v51, -inf  ;;  %v416_v12 = vsel %vm380_vm0, %v1653_v58, -inf }
  0x38   : > { %2944 = vst [vmem:[#allocation21_spill] sm:$0xff] %v1969_v27  ;;  %2945 = vst [vmem:[#allocation22_spill] sm:$0xff] %v1972_v45  ;;  %v396_v59 = vrot.slane %v395_v35, 4  ;;  %v403_v42 = vrot.slane %v402_v10, 4  ;;  %v383_v23 = vmax.f32 %v381_v17, %v382_v11  ;;  %v417_v30 = vrot.slane %v416_v12, 4 }
  0x39   : > { %2946 = vst [vmem:[#allocation23_spill] sm:$0xff] %v1975_v60  ;;  %2947 = vst [vmem:[#allocation24_spill] sm:$0xff] %v1978_v20  ;;  %v423_v37 = vsel %vm380_vm0, %v1668_v3, -inf  ;;  %v2952_v20 = vld [vmem:[#allocation2_spill] sm:$0xff] }
  0x3a   : > { %2948 = vst [vmem:[#allocation25_spill] sm:$0xff] %v1981_v29  ;;  %2949 = vst [vmem:[#allocation26_spill] sm:$0xff] %v1984_v46  ;;  %v397_v46 = vmax.f32 %v395_v35, %v396_v59  ;;  %v404_v29 = vmax.f32 %v402_v10, %v403_v42  ;;  %v430_v44 = vsel %vm380_vm0, %v2952_v20, -inf  ;;  %v384_v60 = vrot.slane %v383_v23, 2 }
  0x3b   : > { %2950 = vst [vmem:[#allocation27_spill] sm:$0xff] %v1987_v54  ;;  %2951 = vst [vmem:[#allocation28_spill] sm:$0xff] %v1990_v40  ;;  %v390_v40 = vmax.f32 %v388_v31, %v389_v41  ;;  %v410_v54 = vrot.slane %v409_v1, 4  ;;  %v418_v32 = vmax.f32 %v416_v12, %v417_v30  ;;  %v424_v18 = vrot.slane %v423_v37, 4 }
  0x3c   : > { %v398_v51 = vrot.slane %v397_v46, 2  ;;  %v405_v19 = vrot.slane %v404_v29, 2  ;;  %v431_v58 = vrot.slane %v430_v44, 4  ;;  %v385_v17 = vmax.f32 %v383_v23, %v384_v60 }
  0x3d   : > { %v391_v45 = vrot.slane %v390_v40, 2  ;;  %v411_v27 = vmax.f32 %v409_v1, %v410_v54  ;;  %v419_v41 = vrot.slane %v418_v32, 2  ;;  %v425_v59 = vmax.f32 %v423_v37, %v424_v18  ;;  %v2960_v37 = vld [vmem:[#allocation4_spill] sm:$0xff] }
  0x3e   : > { %v399_v35 = vmax.f32 %v397_v46, %v398_v51  ;;  %v406_v10 = vmax.f32 %v404_v29, %v405_v19  ;;  %v432_v42 = vmax.f32 %v430_v44, %v431_v58  ;;  %v386_v3 = vrot.slane %v385_v17, 1 }
  0x3f   : > { %v392_v31 = vmax.f32 %v390_v40, %v391_v45  ;;  %v412_v11 = vrot.slane %v411_v27, 2  ;;  %v420_v20 = vmax.f32 %v418_v32, %v419_v41  ;;  %v426_v54 = vrot.slane %v425_v59, 2  ;;  %v2959_v32 = vld [vmem:[#allocation3_spill] sm:$0xff] }
  0x40   : > { %v400_v5 = vrot.slane %v399_v35, 1  ;;  %v407_v4 = vrot.slane %v406_v10, 1  ;;  %v433_v1 = vrot.slane %v432_v42, 2  ;;  %v2008_v12 = vmax.f32 %v385_v17, %v386_v3 }
  0x41   : > { %v393_v22 = vrot.slane %v392_v31, 1  ;;  %v413_v13 = vmax.f32 %v411_v27, %v412_v11  ;;  %v421_v45 = vrot.slane %v420_v20, 1  ;;  %v427_v18 = vmax.f32 %v425_v59, %v426_v54 }
  0x42   : > { %2953 = vst [vmem:[#allocation2_spill] sm:$0xff] %v2008_v12  ;;  %v2012_v40 = vmax.f32 %v399_v35, %v400_v5  ;;  %v2014_v46 = vmax.f32 %v406_v10, %v407_v4  ;;  %v434_v19 = vmax.f32 %v432_v42, %v433_v1  ;;  %v437_v23 = vsel %vm380_vm0, %v2959_v32, -inf  ;;  %v2961_v5 = vld [vmem:[#allocation5_spill] sm:$0xff]  ;;  %v2964_v35 = vld [vmem:[#allocation8_spill] sm:$0xff] }
  0x43   : > { %v2010_v30 = vmax.f32 %v392_v31, %v393_v22  ;;  %v414_v60 = vrot.slane %v413_v13, 1  ;;  %v2018_v27 = vmax.f32 %v420_v20, %v421_v45  ;;  %v444_v44 = vsel %vm380_vm0, %v2960_v37, -inf  ;;  %v2962_v31 = vld [vmem:[#allocation6_spill] sm:$0xff] }
  0x44   : > { %2955 = vst [vmem:[#allocation30_spill] sm:$0xff] %v2012_v40  ;;  %2956 = vst [vmem:[#allocation31_spill] sm:$0xff] %v2014_v46  ;;  %v428_v22 = vrot.slane %v427_v18, 1  ;;  %v435_v51 = vrot.slane %v434_v19, 1  ;;  %v438_v58 = vrot.slane %v437_v23, 4  ;;  %v445_v17 = vrot.slane %v444_v44, 4 }
  0x45   : > { %2954 = vst [vmem:[#allocation29_spill] sm:$0xff] %v2010_v30  ;;  %v2016_v29 = vmax.f32 %v413_v13, %v414_v60  ;;  %2958 = vst [vmem:[#allocation33_spill] sm:$0xff] %v2018_v27  ;;  %v451_v4 = vsel %vm380_vm0, %v2961_v5, -inf  ;;  %v458_v11 = vsel %vm380_vm0, %v2962_v31, -inf  ;;  %v2963_v13 = vld [vmem:[#allocation7_spill] sm:$0xff]  ;;  %v472_v10 = vsel %vm380_vm0, %v2964_v35, -inf }
  0x46   : > { %v465_v41 = vsel %vm380_vm0, %v2963_v13, -inf  ;;  %v2032_v59 = vmax.f32 %v427_v18, %v428_v22  ;;  %v2034_v42 = vmax.f32 %v434_v19, %v435_v51  ;;  %v439_v3 = vmax.f32 %v437_v23, %v438_v58  ;;  %v2967_v5 = vld [vmem:[#allocation9_spill] sm:$0xff]  ;;  %v2968_v27 = vld [vmem:[#allocation10_spill] sm:$0xff] }
  0x47   : > { %2957 = vst [vmem:[#allocation32_spill] sm:$0xff] %v2016_v29  ;;  %v446_v20 = vmax.f32 %v444_v44, %v445_v17  ;;  %v452_v54 = vrot.slane %v451_v4, 4  ;;  %v459_v1 = vrot.slane %v458_v11, 4  ;;  %v466_v60 = vrot.slane %v465_v41, 4 }
  0x48   : > { %2965 = vst [vmem:[#allocation3_spill] sm:$0xff] %v2032_v59  ;;  %2966 = vst [vmem:[#allocation4_spill] sm:$0xff] %v2034_v42  ;;  %v473_v45 = vrot.slane %v472_v10, 4  ;;  %v440_v32 = vrot.slane %v439_v3, 2  ;;  %v479_v31 = vsel %vm380_vm0, %v2967_v5, -inf  ;;  %v486_v13 = vsel %vm380_vm0, %v2968_v27, -inf }
  0x49   : > { %v447_v37 = vrot.slane %v446_v20, 2  ;;  %v453_v29 = vmax.f32 %v451_v4, %v452_v54  ;;  %v460_v35 = vmax.f32 %v458_v11, %v459_v1  ;;  %v467_v18 = vmax.f32 %v465_v41, %v466_v60 }
  0x4a   : > { %v474_v22 = vmax.f32 %v472_v10, %v473_v45  ;;  %v441_v19 = vmax.f32 %v439_v3, %v440_v32  ;;  %v480_v23 = vrot.slane %v479_v31, 4  ;;  %v487_v44 = vrot.slane %v486_v13, 4  ;;  %v2969_v32 = vld [vmem:[#allocation11_spill] sm:$0xff] }
  0x4b   : > { %v448_v51 = vmax.f32 %v446_v20, %v447_v37  ;;  %v454_v58 = vrot.slane %v453_v29, 2  ;;  %v461_v17 = vrot.slane %v460_v35, 2  ;;  %v468_v42 = vrot.slane %v467_v18, 2 }
  0x4c   : > { %v475_v59 = vrot.slane %v474_v22, 2  ;;  %v442_v46 = vrot.slane %v441_v19, 1  ;;  %v481_v30 = vmax.f32 %v479_v31, %v480_v23  ;;  %v488_v12 = vmax.f32 %v486_v13, %v487_v44 }
  0x4d   : > { %v449_v40 = vrot.slane %v448_v51, 1  ;;  %v455_v5 = vmax.f32 %v453_v29, %v454_v58  ;;  %v462_v61 = vmax.f32 %v460_v35, %v461_v17  ;;  %v469_v53 = vmax.f32 %v467_v18, %v468_v42 }
  0x4e   : > { %v476_v27 = vmax.f32 %v474_v22, %v475_v59  ;;  %v2040_v4 = vmax.f32 %v441_v19, %v442_v46  ;;  %v482_v41 = vrot.slane %v481_v30, 2  ;;  %v489_v10 = vrot.slane %v488_v12, 2 }
  0x4f   : > { %v2042_v11 = vmax.f32 %v448_v51, %v449_v40  ;;  %v456_v3 = vrot.slane %v455_v5, 1  ;;  %v463_v20 = vrot.slane %v462_v61, 1  ;;  %v470_v54 = vrot.slane %v469_v53, 1 }
  0x50   : > { %v477_v1 = vrot.slane %v476_v27, 1  ;;  %v483_v60 = vmax.f32 %v481_v30, %v482_v41  ;;  %v490_v45 = vmax.f32 %v488_v12, %v489_v10  ;;  %v493_v37 = vsel %vm380_vm0, %v2969_v32, -inf }
  0x51   : > { %v500_v29 = vsel %vm380_vm0, %v1817_v28, -inf  ;;  %v2048_v42 = vmax.f32 %v455_v5, %v456_v3  ;;  %v2050_v46 = vmax.f32 %v462_v61, %v463_v20  ;;  %v2052_v40 = vmax.f32 %v469_v53, %v470_v54 }
  0x52   : > { %v2054_v59 = vmax.f32 %v476_v27, %v477_v1  ;;  %v484_v31 = vrot.slane %v483_v60, 1  ;;  %v491_v13 = vrot.slane %v490_v45, 1  ;;  %v494_v35 = vrot.slane %v493_v37, 4 }
  0x53   : > { %v501_v18 = vrot.slane %v500_v29, 4  ;;  %v507_v12 = vsel %vm380_vm0, %v1825_v34, -inf  ;;  %v514_v30 = vsel %vm380_vm0, %v1830_v6, -inf  ;;  %v521_v28 = vsel %vm380_vm0, %v1834_v43, -inf }
  0x54   : > { %v528_v61 = vsel %vm380_vm0, %v1838_v36, -inf  ;;  %v2064_v53 = vmax.f32 %v483_v60, %v484_v31  ;;  %v2066_v22 = vmax.f32 %v490_v45, %v491_v13  ;;  %v495_v19 = vmax.f32 %v493_v37, %v494_v35 }
  0x55   : > { %v502_v51 = vmax.f32 %v500_v29, %v501_v18  ;;  %v508_v23 = vrot.slane %v507_v12, 4  ;;  %v515_v44 = vrot.slane %v514_v30, 4  ;;  %v522_v58 = vrot.slane %v521_v28, 4 }
  0x56   : > { %2970 = vst [vmem:[#allocation5_spill] sm:$0xff] %v2066_v22  ;;  %v529_v17 = vrot.slane %v528_v61, 4  ;;  %v496_v34 = vrot.slane %v495_v19, 2  ;;  %v535_v6 = vsel %vm380_vm0, %v1842_v26, -inf  ;;  %v542_v43 = vsel %vm380_vm0, %v1846_v0, -inf }
  0x57   : > { %v503_v5 = vrot.slane %v502_v51, 2  ;;  %v509_v27 = vmax.f32 %v507_v12, %v508_v23  ;;  %v516_v36 = vmax.f32 %v514_v30, %v515_v44  ;;  %v523_v41 = vmax.f32 %v521_v28, %v522_v58 }
  0x58   : > { %v530_v10 = vmax.f32 %v528_v61, %v529_v17  ;;  %v497_v3 = vmax.f32 %v495_v19, %v496_v34  ;;  %v536_v54 = vrot.slane %v535_v6, 4  ;;  %v543_v1 = vrot.slane %v542_v43, 4 }
  0x59   : > { %v504_v20 = vmax.f32 %v502_v51, %v503_v5  ;;  %v510_v60 = vrot.slane %v509_v27, 2  ;;  %v517_v45 = vrot.slane %v516_v36, 2  ;;  %v524_v32 = vrot.slane %v523_v41, 2 }
  0x5a   : > { %v531_v37 = vrot.slane %v530_v10, 2  ;;  %v498_v29 = vrot.slane %v497_v3, 1  ;;  %v537_v13 = vmax.f32 %v535_v6, %v536_v54  ;;  %v544_v35 = vmax.f32 %v542_v43, %v543_v1 }
  0x5b   : > { %v505_v31 = vrot.slane %v504_v20, 1  ;;  %v511_v26 = vmax.f32 %v509_v27, %v510_v60  ;;  %v518_v18 = vmax.f32 %v516_v36, %v517_v45  ;;  %v525_v22 = vmax.f32 %v523_v41, %v524_v32 }
  0x5c   : > { %v532_v0 = vmax.f32 %v530_v10, %v531_v37  ;;  %v2072_v12 = vmax.f32 %v497_v3, %v498_v29  ;;  %v538_v28 = vrot.slane %v537_v13, 2  ;;  %v545_v61 = vrot.slane %v544_v35, 2 }
  0x5d   : > { %v2074_v30 = vmax.f32 %v504_v20, %v505_v31  ;;  %v512_v19 = vrot.slane %v511_v26, 1  ;;  %v519_v51 = vrot.slane %v518_v18, 1  ;;  %v526_v23 = vrot.slane %v525_v22, 1 }
  0x5e   : > { %v533_v44 = vrot.slane %v532_v0, 1  ;;  %v539_v58 = vmax.f32 %v537_v13, %v538_v28  ;;  %v546_v17 = vmax.f32 %v544_v35, %v545_v61  ;;  %v549_v34 = vsel %vm380_vm0, %v1850_v48, -inf }
  0x5f   : > { %v556_v5 = vsel %vm380_vm0, %v1854_v49, -inf  ;;  %v2080_v6 = vmax.f32 %v511_v26, %v512_v19  ;;  %v2082_v43 = vmax.f32 %v518_v18, %v519_v51  ;;  %v2084_v27 = vmax.f32 %v525_v22, %v526_v23 }
  0x60   : > { %v2086_v36 = vmax.f32 %v532_v0, %v533_v44  ;;  %v540_v41 = vrot.slane %v539_v58, 1  ;;  %v547_v10 = vrot.slane %v546_v17, 1  ;;  %v550_v3 = vrot.slane %v549_v34, 4 }
  0x61   : > { %v557_v20 = vrot.slane %v556_v5, 4  ;;  %v563_v54 = vsel %vm380_vm0, %v1858_v50, -inf  ;;  %v570_v48 = vsel %vm380_vm0, %v1862_v55, -inf  ;;  %v577_v49 = vsel %vm380_vm0, %v1866_v56, -inf }
  0x62   : > { %v584_v1 = vsel %vm380_vm0, %v1870_v57, -inf  ;;  %v2096_v22 = vmax.f32 %v539_v58, %v540_v41  ;;  %v2098_v60 = vmax.f32 %v546_v17, %v547_v10  ;;  %v551_v45 = vmax.f32 %v549_v34, %v550_v3 }
  0x63   : > { %v558_v32 = vmax.f32 %v556_v5, %v557_v20  ;;  %v564_v37 = vrot.slane %v563_v54, 4  ;;  %v571_v29 = vrot.slane %v570_v48, 4  ;;  %v578_v31 = vrot.slane %v577_v49, 4 }
  0x64   : > { %v585_v13 = vrot.slane %v584_v1, 4  ;;  %v552_v50 = vrot.slane %v551_v45, 2  ;;  %v591_v55 = vsel %vm380_vm0, %v1874_v62, -inf  ;;  %v598_v56 = vsel %vm380_vm0, %v1878_v63, -inf }
  0x65   : > { %v559_v35 = vrot.slane %v558_v32, 2  ;;  %v565_v26 = vmax.f32 %v563_v54, %v564_v37  ;;  %v572_v57 = vmax.f32 %v570_v48, %v571_v29  ;;  %v579_v18 = vmax.f32 %v577_v49, %v578_v31 }
  0x66   : > { %v586_v0 = vmax.f32 %v584_v1, %v585_v13  ;;  %v553_v28 = vmax.f32 %v551_v45, %v552_v50  ;;  %v592_v19 = vrot.slane %v591_v55, 4  ;;  %v599_v51 = vrot.slane %v598_v56, 4 }
  0x67   : > { %v560_v61 = vmax.f32 %v558_v32, %v559_v35  ;;  %v566_v23 = vrot.slane %v565_v26, 2  ;;  %v573_v44 = vrot.slane %v572_v57, 2  ;;  %v580_v58 = vrot.slane %v579_v18, 2 }
  0x68   : > { %v587_v17 = vrot.slane %v586_v0, 2  ;;  %v554_v34 = vrot.slane %v553_v28, 1  ;;  %v593_v41 = vmax.f32 %v591_v55, %v592_v19  ;;  %v600_v10 = vmax.f32 %v598_v56, %v599_v51 }
  0x69   : > { %v561_v5 = vrot.slane %v560_v61, 1  ;;  %v567_v62 = vmax.f32 %v565_v26, %v566_v23  ;;  %v574_v3 = vmax.f32 %v572_v57, %v573_v44  ;;  %v581_v20 = vmax.f32 %v579_v18, %v580_v58 }
  0x6a   : > { %v588_v63 = vmax.f32 %v586_v0, %v587_v17  ;;  %v2104_v54 = vmax.f32 %v553_v28, %v554_v34  ;;  %v594_v49 = vrot.slane %v593_v41, 2  ;;  %v601_v1 = vrot.slane %v600_v10, 2 }
  0x6b   : > { %v2106_v48 = vmax.f32 %v560_v61, %v561_v5  ;;  %v568_v45 = vrot.slane %v567_v62, 1  ;;  %v575_v32 = vrot.slane %v574_v3, 1  ;;  %v582_v37 = vrot.slane %v581_v20, 1 }
  0x6c   : > { %v589_v29 = vrot.slane %v588_v63, 1  ;;  %v595_v31 = vmax.f32 %v593_v41, %v594_v49  ;;  %v602_v13 = vmax.f32 %v600_v10, %v601_v1  ;;  %v605_v50 = vsel %vm380_vm0, %v1882_v2, -inf }
  0x6d   : > { %v612_v35 = vsel %vm380_vm0, %v1886_v7, -inf  ;;  %v2112_v55 = vmax.f32 %v567_v62, %v568_v45  ;;  %v2114_v56 = vmax.f32 %v574_v3, %v575_v32  ;;  %v2116_v26 = vmax.f32 %v581_v20, %v582_v37 }
  0x6e   : > { %v2118_v57 = vmax.f32 %v588_v63, %v589_v29  ;;  %v596_v18 = vrot.slane %v595_v31, 1  ;;  %v603_v0 = vrot.slane %v602_v13, 1  ;;  %v606_v28 = vrot.slane %v605_v50, 4 }
  0x6f   : > { %v613_v61 = vrot.slane %v612_v35, 4  ;;  %v619_v19 = vsel %vm380_vm0, %v1890_v8, -inf  ;;  %v626_v2 = vsel %vm380_vm0, %v1894_v9, -inf  ;;  %v633_v7 = vsel %vm380_vm0, %v1898_v14, -inf }
  0x70   : > { %v640_v51 = vsel %vm380_vm0, %v1902_v15, -inf  ;;  %v2128_v23 = vmax.f32 %v595_v31, %v596_v18  ;;  %v2130_v44 = vmax.f32 %v602_v13, %v603_v0  ;;  %v607_v58 = vmax.f32 %v605_v50, %v606_v28 }
  0x71   : > { %v614_v17 = vmax.f32 %v612_v35, %v613_v61  ;;  %v620_v34 = vrot.slane %v619_v19, 4  ;;  %v627_v5 = vrot.slane %v626_v2, 4  ;;  %v634_v41 = vrot.slane %v633_v7, 4 }
  0x72   : > { %v641_v10 = vrot.slane %v640_v51, 4  ;;  %v608_v8 = vrot.slane %v607_v58, 2  ;;  %v647_v9 = vsel %vm380_vm0, %v1906_v16, -inf  ;;  %v654_v14 = vsel %vm380_vm0, %v1910_v21, -inf }
  0x73   : > { %v615_v62 = vrot.slane %v614_v17, 2  ;;  %v621_v3 = vmax.f32 %v619_v19, %v620_v34  ;;  %v628_v15 = vmax.f32 %v626_v2, %v627_v5  ;;  %v635_v20 = vmax.f32 %v633_v7, %v634_v41 }
  0x74   : > { %v642_v63 = vmax.f32 %v640_v51, %v641_v10  ;;  %v609_v49 = vmax.f32 %v607_v58, %v608_v8  ;;  %v648_v45 = vrot.slane %v647_v9, 4  ;;  %v655_v32 = vrot.slane %v654_v14, 4 }
  0x75   : > { %v616_v1 = vmax.f32 %v614_v17, %v615_v62  ;;  %v622_v37 = vrot.slane %v621_v3, 2  ;;  %v629_v29 = vrot.slane %v628_v15, 2  ;;  %v636_v31 = vrot.slane %v635_v20, 2 }
  0x76   : > { %v643_v13 = vrot.slane %v642_v63, 2  ;;  %v610_v50 = vrot.slane %v609_v49, 1  ;;  %v649_v18 = vmax.f32 %v647_v9, %v648_v45  ;;  %v656_v0 = vmax.f32 %v654_v14, %v655_v32 }
  0x77   : > { %v617_v35 = vrot.slane %v616_v1, 1  ;;  %v623_v16 = vmax.f32 %v621_v3, %v622_v37  ;;  %v630_v28 = vmax.f32 %v628_v15, %v629_v29  ;;  %v637_v61 = vmax.f32 %v635_v20, %v636_v31 }
  0x78   : > { %v644_v21 = vmax.f32 %v642_v63, %v643_v13  ;;  %v2136_v19 = vmax.f32 %v609_v49, %v610_v50  ;;  %v650_v7 = vrot.slane %v649_v18, 2  ;;  %v657_v51 = vrot.slane %v656_v0, 2 }
  0x79   : > { %v2138_v2 = vmax.f32 %v616_v1, %v617_v35  ;;  %v624_v58 = vrot.slane %v623_v16, 1  ;;  %v631_v17 = vrot.slane %v630_v28, 1  ;;  %v638_v34 = vrot.slane %v637_v61, 1 }
  0x7a   : > { %v645_v5 = vrot.slane %v644_v21, 1  ;;  %v651_v41 = vmax.f32 %v649_v18, %v650_v7  ;;  %v658_v10 = vmax.f32 %v656_v0, %v657_v51  ;;  %v661_v8 = vsel %vm380_vm0, %v1914_v24, -inf }
  0x7b   : > { %v668_v62 = vsel %vm380_vm0, %v1918_v25, -inf  ;;  %v2144_v9 = vmax.f32 %v623_v16, %v624_v58  ;;  %v2146_v14 = vmax.f32 %v630_v28, %v631_v17  ;;  %v2148_v3 = vmax.f32 %v637_v61, %v638_v34  ;;  %v2976_v28 = vld [vmem:[#allocation12_spill] sm:$0xff] }
  0x7c   : > { %v2150_v15 = vmax.f32 %v644_v21, %v645_v5  ;;  %v652_v20 = vrot.slane %v651_v41, 1  ;;  %v659_v63 = vrot.slane %v658_v10, 1  ;;  %v662_v49 = vrot.slane %v661_v8, 4 }
  0x7d   : > { %2971 = vst [vmem:[#allocation6_spill] sm:$0xff] %v2146_v14  ;;  %2972 = vst [vmem:[#allocation7_spill] sm:$0xff] %v2148_v3  ;;  %v669_v1 = vrot.slane %v668_v62, 4  ;;  %v675_v45 = vsel %vm380_vm0, %v1922_v33, -inf  ;;  %v682_v24 = vsel %vm380_vm0, %v1926_v38, -inf  ;;  %v689_v25 = vsel %vm380_vm0, %v1930_v39, -inf }
  0x7e   : > { %2973 = vst [vmem:[#allocation8_spill] sm:$0xff] %v2150_v15  ;;  %v696_v32 = vsel %vm380_vm0, %v1934_v47, -inf  ;;  %v2160_v37 = vmax.f32 %v651_v41, %v652_v20  ;;  %v2162_v29 = vmax.f32 %v658_v10, %v659_v63  ;;  %v663_v31 = vmax.f32 %v661_v8, %v662_v49 }
  0x7f   : > { %v670_v13 = vmax.f32 %v668_v62, %v669_v1  ;;  %v676_v50 = vrot.slane %v675_v45, 4  ;;  %v683_v35 = vrot.slane %v682_v24, 4  ;;  %v690_v18 = vrot.slane %v689_v25, 4 }
  0x80   : > { %2974 = vst [vmem:[#allocation9_spill] sm:$0xff] %v2160_v37  ;;  %2975 = vst [vmem:[#allocation10_spill] sm:$0xff] %v2162_v29  ;;  %v697_v0 = vrot.slane %v696_v32, 4  ;;  %v664_v33 = vrot.slane %v663_v31, 2  ;;  %v703_v38 = vsel %vm380_vm0, %v1938_v52, -inf  ;;  %v710_v39 = vsel %vm380_vm0, %v2976_v28, -inf }
  0x81   : > { %v671_v16 = vrot.slane %v670_v13, 2  ;;  %v677_v61 = vmax.f32 %v675_v45, %v676_v50  ;;  %v684_v47 = vmax.f32 %v682_v24, %v683_v35  ;;  %v691_v21 = vmax.f32 %v689_v25, %v690_v18 }
  0x82   : > { %v698_v7 = vmax.f32 %v696_v32, %v697_v0  ;;  %v665_v51 = vmax.f32 %v663_v31, %v664_v33  ;;  %v704_v17 = vrot.slane %v703_v38, 4  ;;  %v711_v34 = vrot.slane %v710_v39, 4  ;;  %v2979_v33 = vld [vmem:[#allocation13_spill] sm:$0xff] }
  0x83   : > { %v672_v58 = vmax.f32 %v670_v13, %v671_v16  ;;  %v678_v5 = vrot.slane %v677_v61, 2  ;;  %v685_v41 = vrot.slane %v684_v47, 2  ;;  %v692_v10 = vrot.slane %v691_v21, 2 }
  0x84   : > { %v699_v8 = vrot.slane %v698_v7, 2  ;;  %v666_v62 = vrot.slane %v665_v51, 1  ;;  %v705_v63 = vmax.f32 %v703_v38, %v704_v17  ;;  %v712_v49 = vmax.f32 %v710_v39, %v711_v34  ;;  %v2980_v38 = vld [vmem:[#allocation14_spill] sm:$0xff] }
  0x85   : > { %v673_v20 = vrot.slane %v672_v58, 1  ;;  %v679_v52 = vmax.f32 %v677_v61, %v678_v5  ;;  %v686_v1 = vmax.f32 %v684_v47, %v685_v41  ;;  %v693_v29 = vmax.f32 %v691_v21, %v692_v10  ;;  %v2985_v5 = vld [vmem:[#allocation15_spill] sm:$0xff]  ;;  %v2986_v10 = vld [vmem:[#allocation16_spill] sm:$0xff] }
  0x86   : > { %v700_v28 = vmax.f32 %v698_v7, %v699_v8  ;;  %v2168_v45 = vmax.f32 %v665_v51, %v666_v62  ;;  %v706_v25 = vrot.slane %v705_v63, 2  ;;  %v713_v32 = vrot.slane %v712_v49, 2  ;;  %v2987_v62 = vld [vmem:[#allocation17_spill] sm:$0xff] }
  0x87   : > { %v2170_v24 = vmax.f32 %v672_v58, %v673_v20  ;;  %v680_v31 = vrot.slane %v679_v52, 1  ;;  %v687_v13 = vrot.slane %v686_v1, 1  ;;  %v694_v50 = vrot.slane %v693_v29, 1 }
  0x88   : > { %2977 = vst [vmem:[#allocation11_spill] sm:$0xff] %v2168_v45  ;;  %v701_v35 = vrot.slane %v700_v28, 1  ;;  %v707_v18 = vmax.f32 %v705_v63, %v706_v25  ;;  %v714_v0 = vmax.f32 %v712_v49, %v713_v32  ;;  %v717_v16 = vsel %vm380_vm0, %v2979_v33, -inf  ;;  %v2988_v63 = vld [vmem:[#allocation18_spill] sm:$0xff]  ;;  %v2991_v33 = vld [vmem:[#allocation19_spill] sm:$0xff] }
  0x89   : > { %2978 = vst [vmem:[#allocation12_spill] sm:$0xff] %v2170_v24  ;;  %v724_v39 = vsel %vm380_vm0, %v2980_v38, -inf  ;;  %v2176_v61 = vmax.f32 %v679_v52, %v680_v31  ;;  %v2178_v47 = vmax.f32 %v686_v1, %v687_v13  ;;  %v2180_v21 = vmax.f32 %v693_v29, %v694_v50 }
  0x8a   : > { %v2182_v7 = vmax.f32 %v700_v28, %v701_v35  ;;  %v708_v51 = vrot.slane %v707_v18, 1  ;;  %v715_v58 = vrot.slane %v714_v0, 1  ;;  %v718_v17 = vrot.slane %v717_v16, 4 }
  0x8b   : > { %2981 = vst [vmem:[#allocation13_spill] sm:$0xff] %v2176_v61  ;;  %2982 = vst [vmem:[#allocation14_spill] sm:$0xff] %v2178_v47  ;;  %v725_v34 = vrot.slane %v724_v39, 4  ;;  %v731_v41 = vsel %vm380_vm0, %v2985_v5, -inf  ;;  %v738_v8 = vsel %vm380_vm0, %v2986_v10, -inf  ;;  %v745_v20 = vsel %vm380_vm0, %v2987_v62, -inf }
  0x8c   : > { %2983 = vst [vmem:[#allocation34_spill] sm:$0xff] %v2180_v21  ;;  %2984 = vst [vmem:[#allocation35_spill] sm:$0xff] %v2182_v7  ;;  %v752_v49 = vsel %vm380_vm0, %v2988_v63, -inf  ;;  %v2192_v29 = vmax.f32 %v707_v18, %v708_v51  ;;  %v2194_v52 = vmax.f32 %v714_v0, %v715_v58  ;;  %v719_v1 = vmax.f32 %v717_v16, %v718_v17  ;;  %v2992_v5 = vld [vmem:[#allocation20_spill] sm:$0xff] }
  0x8d   : > { %v726_v28 = vmax.f32 %v724_v39, %v725_v34  ;;  %v732_v25 = vrot.slane %v731_v41, 4  ;;  %v739_v32 = vrot.slane %v738_v8, 4  ;;  %v746_v31 = vrot.slane %v745_v20, 4 }
  0x8e   : > { %2989 = vst [vmem:[#allocation15_spill] sm:$0xff] %v2192_v29  ;;  %2990 = vst [vmem:[#allocation16_spill] sm:$0xff] %v2194_v52  ;;  %v753_v13 = vrot.slane %v752_v49, 4  ;;  %v720_v50 = vrot.slane %v719_v1, 2  ;;  %v759_v38 = vsel %vm380_vm0, %v2991_v33, -inf  ;;  %v766_v10 = vsel %vm380_vm0, %v2992_v5, -inf }
  0x8f   : > { %v727_v35 = vrot.slane %v726_v28, 2  ;;  %v733_v62 = vmax.f32 %v731_v41, %v732_v25  ;;  %v740_v63 = vmax.f32 %v738_v8, %v739_v32  ;;  %v747_v18 = vmax.f32 %v745_v20, %v746_v31 }
  0x90   : > { %v754_v51 = vmax.f32 %v752_v49, %v753_v13  ;;  %v721_v0 = vmax.f32 %v719_v1, %v720_v50  ;;  %v760_v16 = vrot.slane %v759_v38, 4  ;;  %v767_v39 = vrot.slane %v766_v10, 4  ;;  %v2995_v50 = vld [vmem:[#allocation21_spill] sm:$0xff] }
  0x91   : > { %v728_v58 = vmax.f32 %v726_v28, %v727_v35  ;;  %v734_v17 = vrot.slane %v733_v62, 2  ;;  %v741_v34 = vrot.slane %v740_v63, 2  ;;  %v748_v52 = vrot.slane %v747_v18, 2 }
  0x92   : > { %v755_v29 = vrot.slane %v754_v51, 2  ;;  %v722_v7 = vrot.slane %v721_v0, 1  ;;  %v761_v47 = vmax.f32 %v759_v38, %v760_v16  ;;  %v768_v61 = vmax.f32 %v766_v10, %v767_v39  ;;  %v2996_v38 = vld [vmem:[#allocation22_spill] sm:$0xff]  ;;  %v3003_v16 = vld [vmem:[#allocation25_spill] sm:$0xff] }
  0x93   : > { %v729_v21 = vrot.slane %v728_v58, 1  ;;  %v735_v33 = vmax.f32 %v733_v62, %v734_v17  ;;  %v742_v24 = vmax.f32 %v740_v63, %v741_v34  ;;  %v749_v45 = vmax.f32 %v747_v18, %v748_v52  ;;  %v3004_v17 = vld [vmem:[#allocation26_spill] sm:$0xff] }
  0x94   : > { %v756_v5 = vmax.f32 %v754_v51, %v755_v29  ;;  %v2200_v41 = vmax.f32 %v721_v0, %v722_v7  ;;  %v762_v20 = vrot.slane %v761_v47, 2  ;;  %v769_v49 = vrot.slane %v768_v61, 2  ;;  %v3002_v0 = vld [vmem:[#allocation24_spill] sm:$0xff] }
  0x95   : > { %v2202_v8 = vmax.f32 %v728_v58, %v729_v21  ;;  %v736_v1 = vrot.slane %v735_v33, 1  ;;  %v743_v28 = vrot.slane %v742_v24, 1  ;;  %v750_v25 = vrot.slane %v749_v45, 1  ;;  %v3025_v14 = vld [vmem:[#allocation15_spill] sm:$0xff]  ;;  %v3026_v3 = vld [vmem:[#allocation16_spill] sm:$0xff] }
  0x96   : > { %2993 = vst [vmem:[#allocation17_spill] sm:$0xff] %v2200_v41  ;;  %v757_v32 = vrot.slane %v756_v5, 1  ;;  %v763_v31 = vmax.f32 %v761_v47, %v762_v20  ;;  %v770_v13 = vmax.f32 %v768_v61, %v769_v49  ;;  %v773_v35 = vsel %vm380_vm0, %v2995_v50, -inf  ;;  %v3001_v47 = vld [vmem:[#allocation23_spill] sm:$0xff] }
  0x97   : > { %2994 = vst [vmem:[#allocation18_spill] sm:$0xff] %v2202_v8  ;;  %v780_v10 = vsel %vm380_vm0, %v2996_v38, -inf  ;;  %v2208_v52 = vmax.f32 %v735_v33, %v736_v1  ;;  %v2210_v7 = vmax.f32 %v742_v24, %v743_v28  ;;  %v2212_v21 = vmax.f32 %v749_v45, %v750_v25  ;;  %v3007_v50 = vld [vmem:[#allocation27_spill] sm:$0xff] }
  0x98   : > { %v2214_v29 = vmax.f32 %v756_v5, %v757_v32  ;;  %v764_v62 = vrot.slane %v763_v31, 1  ;;  %v771_v63 = vrot.slane %v770_v13, 1  ;;  %v774_v18 = vrot.slane %v773_v35, 4 }
  0x99   : > { %2997 = vst [vmem:[#allocation19_spill] sm:$0xff] %v2208_v52  ;;  %2998 = vst [vmem:[#allocation20_spill] sm:$0xff] %v2210_v7  ;;  %v781_v51 = vrot.slane %v780_v10, 4  ;;  %v787_v61 = vsel %vm380_vm0, %v3001_v47, -inf  ;;  %v794_v58 = vsel %vm380_vm0, %v3002_v0, -inf  ;;  %v801_v39 = vsel %vm380_vm0, %v3003_v16, -inf }
  0x9a   : > { %2999 = vst [vmem:[#allocation21_spill] sm:$0xff] %v2212_v21  ;;  %3000 = vst [vmem:[#allocation22_spill] sm:$0xff] %v2214_v29  ;;  %v808_v24 = vsel %vm380_vm0, %v3004_v17, -inf  ;;  %v2224_v45 = vmax.f32 %v763_v31, %v764_v62  ;;  %v2226_v34 = vmax.f32 %v770_v13, %v771_v63  ;;  %v775_v33 = vmax.f32 %v773_v35, %v774_v18  ;;  %v3008_v47 = vld [vmem:[#allocation28_spill] sm:$0xff] }
  0x9b   : > { %v782_v5 = vmax.f32 %v780_v10, %v781_v51  ;;  %v788_v20 = vrot.slane %v787_v61, 4  ;;  %v795_v49 = vrot.slane %v794_v58, 4  ;;  %v802_v1 = vrot.slane %v801_v39, 4 }
  0x9c   : > { %3005 = vst [vmem:[#allocation23_spill] sm:$0xff] %v2224_v45  ;;  %3006 = vst [vmem:[#allocation24_spill] sm:$0xff] %v2226_v34  ;;  %v809_v28 = vrot.slane %v808_v24, 4  ;;  %v776_v25 = vrot.slane %v775_v33, 2  ;;  %v815_v38 = vsel %vm380_vm0, %v3007_v50, -inf  ;;  %v822_v0 = vsel %vm380_vm0, %v3008_v47, -inf }
  0x9d   : > { %v783_v32 = vrot.slane %v782_v5, 2  ;;  %v789_v16 = vmax.f32 %v787_v61, %v788_v20  ;;  %v796_v17 = vmax.f32 %v794_v58, %v795_v49  ;;  %v803_v31 = vmax.f32 %v801_v39, %v802_v1  ;;  %v3027_v15 = vld [vmem:[#allocation17_spill] sm:$0xff] }
  0x9e   : > { %v810_v62 = vmax.f32 %v808_v24, %v809_v28  ;;  %v777_v13 = vmax.f32 %v775_v33, %v776_v25  ;;  %v816_v35 = vrot.slane %v815_v38, 4  ;;  %v823_v10 = vrot.slane %v822_v0, 4  ;;  %v3009_v25 = vld [vmem:[#allocation2_spill] sm:$0xff] }
  0x9f   : > { %v784_v63 = vmax.f32 %v782_v5, %v783_v32  ;;  %v790_v18 = vrot.slane %v789_v16, 2  ;;  %v797_v51 = vrot.slane %v796_v17, 2  ;;  %v804_v34 = vrot.slane %v803_v31, 2  ;;  %v3024_v32 = vld [vmem:[#allocation35_spill] sm:$0xff]  ;;  %v3028_v37 = vld [vmem:[#allocation18_spill] sm:$0xff] }
  0xa0   : > { %v811_v45 = vrot.slane %v810_v62, 2  ;;  %v778_v29 = vrot.slane %v777_v13, 1  ;;  %v817_v7 = vmax.f32 %v815_v38, %v816_v35  ;;  %v824_v52 = vmax.f32 %v822_v0, %v823_v10  ;;  %v3010_v38 = vld [vmem:[#allocation29_spill] sm:$0xff] }
  0xa1   : > { %v785_v21 = vrot.slane %v784_v63, 1  ;;  %v791_v50 = vmax.f32 %v789_v16, %v790_v18  ;;  %v798_v8 = vmax.f32 %v796_v17, %v797_v51  ;;  %v805_v41 = vmax.f32 %v803_v31, %v804_v34  ;;  %v3011_v31 = vld [vmem:[#allocation30_spill] sm:$0xff]  ;;  %v3014_v35 = vld [vmem:[#allocation33_spill] sm:$0xff]  ;;  %v3015_v18 = vld [vmem:[#allocation3_spill] sm:$0xff] }
  0xa2   : > { %v812_v47 = vmax.f32 %v810_v62, %v811_v45  ;;  %v2232_v61 = vmax.f32 %v777_v13, %v778_v29  ;;  %v818_v39 = vrot.slane %v817_v7, 2  ;;  %v825_v24 = vrot.slane %v824_v52, 2  ;;  %v3012_v13 = vld [vmem:[#allocation31_spill] sm:$0xff]  ;;  %v3017_v10 = vld [vmem:[#allocation5_spill] sm:$0xff] }
  0xa3   : > { %v2234_v58 = vmax.f32 %v784_v63, %v785_v21  ;;  %v792_v33 = vrot.slane %v791_v50, 1  ;;  %v799_v5 = vrot.slane %v798_v8, 1  ;;  %v806_v20 = vrot.slane %v805_v41, 1  ;;  %v3032_v63 = vld [vmem:[#allocation22_spill] sm:$0xff]  ;;  %v3033_v62 = vld [vmem:[#allocation23_spill] sm:$0xff]  ;;  %v3034_v0 = vld [vmem:[#allocation24_spill] sm:$0xff] }
  0xa4   : > { %v813_v49 = vrot.slane %v812_v47, 1  ;;  %v819_v1 = vmax.f32 %v817_v7, %v818_v39  ;;  %v826_v28 = vmax.f32 %v824_v52, %v825_v24  ;;  %v3013_v7 = vld [vmem:[#allocation32_spill] sm:$0xff]  ;;  %v3029_v24 = vld [vmem:[#allocation19_spill] sm:$0xff]  ;;  %v3031_v52 = vld [vmem:[#allocation21_spill] sm:$0xff]  ;;  %v3035_v51 = vmax.f32 %v3009_v25, 0.0 }
  0xa5   : > { %v2238_v16 = vmax.f32 %v791_v50, %v792_v33  ;;  %v2240_v34 = vmax.f32 %v798_v8, %v799_v5  ;;  %v2242_v29 = vmax.f32 %v805_v41, %v806_v20  ;;  %v3016_v50 = vld [vmem:[#allocation4_spill] sm:$0xff]  ;;  %v3038_v5 = vmax.f32 %v3012_v13, 0.0 }
  0xa6   : > { %v2244_v21 = vmax.f32 %v812_v47, %v813_v49  ;;  %v820_v45 = vrot.slane %v819_v1, 1  ;;  %v827_v17 = vrot.slane %v826_v28, 1  ;;  %v3030_v47 = vld [vmem:[#allocation20_spill] sm:$0xff]  ;;  %v2315_v39 = vpack.c.bf16 %v3035_v51, %v3035_v51  ;;  %v3081_v49 = vld [vmem:[#allocation6_spill] sm:$0xff] }
  0xa7   : > { %v2330_v20 = vpack.c.bf16 %v3038_v5, %v3038_v5  ;;  %v3039_v25 = vmax.f32 %v3013_v7, 0.0  ;;  %v3042_v13 = vmax.f32 %v3016_v50, 0.0  ;;  %v3044_v7 = vmax.f32 %v2040_v4, 0.0 }
  0xa8   : > { %v2252_v8 = vmax.f32 %v819_v1, %v820_v45  ;;  %v2254_v41 = vmax.f32 %v826_v28, %v827_v17  ;;  %v3036_v1 = vmax.f32 %v3010_v38, 0.0  ;;  %v3037_v17 = vmax.f32 %v3011_v31, 0.0  ;;  %v3084_v45 = vld [vmem:[#allocation7_spill] sm:$0xff] }
  0xa9   : > { %v2335_v51 = vpack.c.bf16 %v3039_v25, %v3039_v25  ;;  %v3040_v38 = vmax.f32 %v3014_v35, 0.0  ;;  %v3041_v31 = vmax.f32 %v3015_v18, 0.0  ;;  %v2350_v5 = vpack.c.bf16 %v3042_v13, %v3042_v13 }
  0xaa   : > { %v2320_v28 = vpack.c.bf16 %v3036_v1, %v3036_v1  ;;  %v2325_v33 = vpack.c.bf16 %v3037_v17, %v3037_v17  ;;  %v2355_v25 = vpack.c.bf16 %v3044_v7, %v3044_v7  ;;  %v3045_v35 = vmax.f32 %v2042_v11, 0.0 }
  0xab   : > { %v2340_v1 = vpack.c.bf16 %v3040_v38, %v3040_v38  ;;  %v2345_v17 = vpack.c.bf16 %v3041_v31, %v3041_v31  ;;  %3043 = vst [vmem:[#allocation25_spill] sm:$0xff] %v2350_v5  ;;  %v3046_v18 = vmax.f32 %v2048_v42, 0.0  ;;  %v3047_v50 = vmax.f32 %v2050_v46, 0.0 }
  0xac   : > { %v2360_v38 = vpack.c.bf16 %v3045_v35, %v3045_v35  ;;  %v3048_v4 = vmax.f32 %v2052_v40, 0.0  ;;  %v3049_v11 = vmax.f32 %v2054_v59, 0.0  ;;  %v3050_v42 = vmax.f32 %v2064_v53, 0.0 }
  0xad   : > { %v2365_v31 = vpack.c.bf16 %v3046_v18, %v3046_v18  ;;  %v2370_v13 = vpack.c.bf16 %v3047_v50, %v3047_v50  ;;  %v3052_v46 = vmax.f32 %v3017_v10, 0.0  ;;  %v3054_v40 = vmax.f32 %v2072_v12, 0.0 }
  0xae   : > { %v2375_v7 = vpack.c.bf16 %v3048_v4, %v3048_v4  ;;  %v2380_v35 = vpack.c.bf16 %v3049_v11, %v3049_v11  ;;  %v2385_v18 = vpack.c.bf16 %v3050_v42, %v3050_v42  ;;  %v3055_v59 = vmax.f32 %v2074_v30, 0.0 }
  0xaf   : > { %v2390_v50 = vpack.c.bf16 %v3052_v46, %v3052_v46  ;;  %v2395_v4 = vpack.c.bf16 %v3054_v40, %v3054_v40  ;;  %v3056_v53 = vmax.f32 %v2080_v6, 0.0  ;;  %v3057_v10 = vmax.f32 %v2082_v43, 0.0 }
  0xb0   : > { %3051 = vst [vmem:[#allocation26_spill] sm:$0xff] %v2385_v18  ;;  %v2400_v11 = vpack.c.bf16 %v3055_v59, %v3055_v59  ;;  %v3058_v12 = vmax.f32 %v2084_v27, 0.0  ;;  %v3060_v30 = vmax.f32 %v2086_v36, 0.0  ;;  %v3062_v6 = vmax.f32 %v2096_v22, 0.0 }
  0xb1   : > { %3053 = vst [vmem:[#allocation27_spill] sm:$0xff] %v2390_v50  ;;  %v2405_v42 = vpack.c.bf16 %v3056_v53, %v3056_v53  ;;  %v2410_v46 = vpack.c.bf16 %v3057_v10, %v3057_v10  ;;  %v3064_v43 = vmax.f32 %v2098_v60, 0.0  ;;  %v3066_v27 = vmax.f32 %v2104_v54, 0.0 }
  0xb2   : > { %v2415_v40 = vpack.c.bf16 %v3058_v12, %v3058_v12  ;;  %v2420_v59 = vpack.c.bf16 %v3060_v30, %v3060_v30  ;;  %v2425_v53 = vpack.c.bf16 %v3062_v6, %v3062_v6  ;;  %v3067_v36 = vmax.f32 %v2106_v48, 0.0 }
  0xb3   : > { %v2430_v10 = vpack.c.bf16 %v3064_v43, %v3064_v43  ;;  %v2435_v12 = vpack.c.bf16 %v3066_v27, %v3066_v27  ;;  %v3068_v22 = vmax.f32 %v2112_v55, 0.0  ;;  %v3069_v60 = vmax.f32 %v2114_v56, 0.0 }
  0xb4   : > { %3059 = vst [vmem:[#allocation28_spill] sm:$0xff] %v2415_v40  ;;  %3061 = vst [vmem:[#allocation2_spill] sm:$0xff] %v2420_v59  ;;  %v2440_v30 = vpack.c.bf16 %v3067_v36, %v3067_v36  ;;  %v3070_v54 = vmax.f32 %v2116_v26, 0.0  ;;  %v3072_v48 = vmax.f32 %v2118_v57, 0.0  ;;  %v3073_v55 = vmax.f32 %v2128_v23, 0.0 }
  0xb5   : > { %3063 = vst [vmem:[#allocation29_spill] sm:$0xff] %v2425_v53  ;;  %3065 = vst [vmem:[#allocation30_spill] sm:$0xff] %v2430_v10  ;;  %v2445_v6 = vpack.c.bf16 %v3068_v22, %v3068_v22  ;;  %v2450_v43 = vpack.c.bf16 %v3069_v60, %v3069_v60  ;;  %v3074_v56 = vmax.f32 %v2130_v44, 0.0  ;;  %v3075_v26 = vmax.f32 %v2136_v19, 0.0 }
  0xb6   : > { %v2455_v27 = vpack.c.bf16 %v3070_v54, %v3070_v54  ;;  %v2460_v36 = vpack.c.bf16 %v3072_v48, %v3072_v48  ;;  %v2465_v22 = vpack.c.bf16 %v3073_v55, %v3073_v55  ;;  %v3077_v57 = vmax.f32 %v2138_v2, 0.0 }
  0xb7   : > { %v2470_v60 = vpack.c.bf16 %v3074_v56, %v3074_v56  ;;  %v2475_v54 = vpack.c.bf16 %v3075_v26, %v3075_v26  ;;  %v3079_v23 = vmax.f32 %v2144_v9, 0.0  ;;  %v3082_v44 = vmax.f32 %v3081_v49, 0.0 }
  0xb8   : > { %3071 = vst [vmem:[#allocation31_spill] sm:$0xff] %v2455_v27  ;;  %v2480_v48 = vpack.c.bf16 %v3077_v57, %v3077_v57  ;;  %v3085_v19 = vmax.f32 %v3084_v45, 0.0 }
  0xb9   : > { %3076 = vst [vmem:[#allocation32_spill] sm:$0xff] %v2475_v54  ;;  %v2485_v55 = vpack.c.bf16 %v3079_v23, %v3079_v23  ;;  %v2490_v56 = vpack.c.bf16 %v3082_v44, %v3082_v44  ;;  %v3087_v54 = vld [vmem:[#allocation8_spill] sm:$0xff] }
  0xba   : > { %3078 = vst [vmem:[#allocation33_spill] sm:$0xff] %v2480_v48  ;;  %v2495_v26 = vpack.c.bf16 %v3085_v19, %v3085_v19  ;;  %v3088_v2 = vmax.f32 %v3087_v54, 0.0  ;;  %v3090_v48 = vld [vmem:[#allocation9_spill] sm:$0xff] }
  0xbb   : > { %3080 = vst [vmem:[#allocation3_spill] sm:$0xff] %v2485_v55  ;;  %3083 = vst [vmem:[#allocation4_spill] sm:$0xff] %v2490_v56  ;;  %v3091_v9 = vmax.f32 %v3090_v48, 0.0  ;;  %v3093_v55 = vld [vmem:[#allocation10_spill] sm:$0xff]  ;;  %v3096_v56 = vld [vmem:[#allocation11_spill] sm:$0xff] }
  0xbc   : > { %3086 = vst [vmem:[#allocation5_spill] sm:$0xff] %v2495_v26  ;;  %v2500_v57 = vpack.c.bf16 %v3088_v2, %v3088_v2  ;;  %v3094_v49 = vmax.f32 %v3093_v55, 0.0  ;;  %v3097_v45 = vmax.f32 %v3096_v56, 0.0  ;;  %v3098_v26 = vld [vmem:[#allocation12_spill] sm:$0xff] }
  0xbd   : > { %v2505_v23 = vpack.c.bf16 %v3091_v9, %v3091_v9  ;;  %v3099_v54 = vmax.f32 %v3098_v26, 0.0  ;;  %v3106_v26 = vmax.f32 %v3024_v32, 0.0  ;;  %v3111_v32 = vmax.f32 %v3028_v37, 0.0 }
  0xbe   : > { %3089 = vst [vmem:[#allocation35_spill] sm:$0xff] %v2500_v57  ;;  %v2510_v44 = vpack.c.bf16 %v3094_v49, %v3094_v49  ;;  %v2515_v19 = vpack.c.bf16 %v3097_v45, %v3097_v45  ;;  %v3100_v57 = vld [vmem:[#allocation13_spill] sm:$0xff]  ;;  %v3115_v37 = vmax.f32 %v3032_v63, 0.0  ;;  %v3119_v63 = vmax.f32 %v2234_v58, 0.0 }
  0xbf   : > { %3092 = vst [vmem:[#allocation15_spill] sm:$0xff] %v2505_v23  ;;  %v2520_v2 = vpack.c.bf16 %v3099_v54, %v3099_v54  ;;  %v3101_v48 = vmax.f32 %v3100_v57, 0.0  ;;  %v3102_v23 = vld [vmem:[#allocation14_spill] sm:$0xff]  ;;  %v2540_v54 = vpack.c.bf16 %v3106_v26, %v3106_v26  ;;  %v3107_v57 = vmax.f32 %v3025_v14, 0.0 }
  0xc0   : > { %3095 = vst [vmem:[#allocation16_spill] sm:$0xff] %v2510_v44  ;;  %v3103_v55 = vmax.f32 %v3102_v23, 0.0  ;;  %v3104_v44 = vld [vmem:[#allocation34_spill] sm:$0xff]  ;;  %v3108_v23 = vmax.f32 %v3026_v3, 0.0  ;;  %v2560_v26 = vpack.c.bf16 %v3111_v32, %v3111_v32  ;;  %v3112_v14 = vmax.f32 %v3029_v24, 0.0  ;;  %v3128_v50 = vld [vmem:[#allocation32_spill] sm:$0xff] }
  0xc1   : > { %v2525_v9 = vpack.c.bf16 %v3101_v48, %v3101_v48  ;;  %v3105_v56 = vmax.f32 %v3104_v44, 0.0  ;;  %v2545_v48 = vpack.c.bf16 %v3107_v57, %v3107_v57  ;;  %v3110_v44 = vmax.f32 %v3027_v15, 0.0  ;;  %v3129_v53 = vld [vmem:[#allocation33_spill] sm:$0xff] }
  0xc2   : > { %v2530_v49 = vpack.c.bf16 %v3103_v55, %v3103_v55  ;;  %v2550_v55 = vpack.c.bf16 %v3108_v23, %v3108_v23  ;;  %v2565_v57 = vpack.c.bf16 %v3112_v14, %v3112_v14  ;;  %v3113_v3 = vmax.f32 %v3030_v47, 0.0  ;;  %v3130_v10 = vld [vmem:[#allocation3_spill] sm:$0xff]  ;;  %v3131_v59 = vld [vmem:[#allocation4_spill] sm:$0xff] }
  0xc3   : > { %v2535_v45 = vpack.c.bf16 %v3105_v56, %v3105_v56  ;;  %v2555_v56 = vpack.c.bf16 %v3110_v44, %v3110_v44  ;;  %v3114_v15 = vmax.f32 %v3031_v52, 0.0  ;;  %v2580_v32 = vpack.c.bf16 %v3115_v37, %v3115_v37  ;;  %v3132_v18 = vld [vmem:[#allocation5_spill] sm:$0xff] }
  0xc4   : > { %3109 = vst [vmem:[#allocation17_spill] sm:$0xff] %v2550_v55  ;;  %v2570_v23 = vpack.c.bf16 %v3113_v3, %v3113_v3  ;;  %v3116_v24 = vmax.f32 %v3033_v62, 0.0  ;;  %v3117_v47 = vmax.f32 %v3034_v0, 0.0  ;;  %v3118_v52 = vmax.f32 %v2232_v61, 0.0 }
  0xc5   : > { %v2575_v44 = vpack.c.bf16 %v3114_v15, %v3114_v15  ;;  %v2600_v37 = vpack.c.bf16 %v3119_v63, %v3119_v63  ;;  %v3120_v62 = vmax.f32 %v2238_v16, 0.0  ;;  %v3121_v0 = vmax.f32 %v2240_v34, 0.0  ;;  %v3133_v5 = vld [vmem:[#allocation35_spill] sm:$0xff] }
  0xc6   : > { %v2585_v14 = vpack.c.bf16 %v3116_v24, %v3116_v24  ;;  %v2590_v3 = vpack.c.bf16 %v3117_v47, %v3117_v47  ;;  %v2595_v15 = vpack.c.bf16 %v3118_v52, %v3118_v52  ;;  %v3122_v61 = vmax.f32 %v2242_v29, 0.0  ;;  %v3134_v40 = vld [vmem:[#allocation15_spill] sm:$0xff] }
  0xc7   : > { %v2605_v24 = vpack.c.bf16 %v3120_v62, %v3120_v62  ;;  %v2610_v47 = vpack.c.bf16 %v3121_v0, %v3121_v0  ;;  %v3124_v58 = vmax.f32 %v2244_v21, 0.0  ;;  %v3125_v16 = vmax.f32 %v2252_v8, 0.0  ;;  %v3135_v27 = vld [vmem:[#allocation16_spill] sm:$0xff] }
  0xc8   : > { %v2615_v52 = vpack.c.bf16 %v3122_v61, %v3122_v61  ;;  %v3127_v34 = vmax.f32 %v2254_v41, 0.0  ;;  %v1174_v8 = vunpack.c.l.b16 %v2440_v30  ;;  %v1197_v41 = vunpack.c.l.b16 %v2555_v56 }
  0xc9   : > { %v2620_v63 = vpack.c.bf16 %v3124_v58, %v3124_v58  ;;  %v2625_v62 = vpack.c.bf16 %v3125_v16, %v3125_v16  ;;  %v1173_v58 = vunpack.c.l.b16 %v2435_v12  ;;  %v1175_v16 = vunpack.c.l.b16 %v2445_v6 }
  0xca   : > { %3123 = vst [vmem:[#allocation18_spill] sm:$0xff] %v2615_v52  ;;  %v2630_v0 = vpack.c.bf16 %v3127_v34, %v3127_v34  ;;  %v1198_v34 = vunpack.c.l.b16 %v2560_v26  ;;  %v1201_v52 = vunpack.c.l.b16 %v2575_v44  ;;  %v1205_v6 = vunpack.c.l.b16 %v2595_v15 }
  0xcb   : > { %3126 = vst [vmem:[#allocation19_spill] sm:$0xff] %v2625_v62  ;;  %v1166_v62 = vunpack.c.l.b16 %v2400_v11  ;;  %v1176_v11 = vunpack.c.l.b16 %v2450_v43  ;;  %v1206_v43 = vunpack.c.l.b16 %v2600_v37  ;;  %v1207_v56 = vunpack.c.l.b16 %v2605_v24 }
  0xcc   : > { %v1208_v26 = vunpack.c.l.b16 %v2610_v47  ;;  %v3138_v15 = vunpack.c.l.b16 %v2315_v39  ;;  %v3139_v37 = vunpack.c.l.b16 %v2320_v28  ;;  %v3141_v12 = vunpack.c.l.b16 %v2355_v25 }
  0xcd   : > { %v3142_v30 = vunpack.c.l.b16 %v2360_v38  ;;  %v3143_v39 = vunpack.c.l.b16 %v2330_v20  ;;  %v1241_v25 = vsel %vm1213_vm1, %v1174_v8, %v1173_v58  ;;  %v3146_v38 = vunpack.c.l.b16 %v2335_v51 }
  0xce   : > { %v1214_v24 = vsel %vm1213_vm1, %v3139_v37, %v3138_v15  ;;  %v3144_v15 = vunpack.c.l.b16 %v2365_v31  ;;  %v3145_v37 = vunpack.c.l.b16 %v2395_v4  ;;  %v3147_v20 = vunpack.c.l.b16 %v2370_v13 }
  0xcf   : > { %v1227_v61 = vsel %vm1213_vm1, %v3142_v30, %v3141_v12  ;;  %v3148_v31 = vunpack.c.l.b16 %v2405_v42  ;;  %v3149_v4 = vunpack.c.l.b16 %v2340_v1  ;;  %v3150_v58 = vunpack.c.l.b16 %v2375_v7 }
  0xd0   : > { %v3151_v8 = vunpack.c.l.b16 %v2410_v46  ;;  %v3152_v42 = vunpack.c.l.b16 %v2345_v17 }
  0xd1   : > { %v3136_v55 = vld [vmem:[#allocation18_spill] sm:$0xff] }
  0xd2   : > { %v1209_v29 = vunpack.c.l.b16 %v3136_v55  ;;  %v3137_v21 = vld [vmem:[#allocation19_spill] sm:$0xff]  ;;  %v3140_v55 = vunpack.c.l.b16 %v2325_v33  ;;  %v1228_v33 = vsel %vm1215_vm2, %v3144_v15, %v1227_v61  ;;  %v1242_v61 = vsel %vm1215_vm2, %v1175_v16, %v1241_v25  ;;  %v3160_v25 = vld [vmem:[#allocation26_spill] sm:$0xff] }
  0xd3   : > { %v1229_v30 = vsel %vm1217_vm3, %v3147_v20, %v1228_v33  ;;  %v3153_v16 = vunpack.c.l.b16 %v2380_v35  ;;  %v3156_v33 = vld [vmem:[#allocation31_spill] sm:$0xff] }
  0xd4   : > { %v1216_v47 = vsel %vm1215_vm2, %v3140_v55, %v1214_v24  ;;  %v1234_v24 = vsel %vm1213_vm1, %v1166_v62, %v3145_v37  ;;  %v1230_v51 = vsel %vm1219_vm4, %v3150_v58, %v1229_v30  ;;  %v3157_v37 = vunpack.c.l.b16 %v3156_v33  ;;  %v3167_v58 = vld [vmem:[#allocation29_spill] sm:$0xff] }
  0xd5   : > { %v1218_v28 = vsel %vm1217_vm3, %v3143_v39, %v1216_v47  ;;  %v1235_v55 = vsel %vm1215_vm2, %v3148_v31, %v1234_v24  ;;  %v1243_v47 = vsel %vm1217_vm3, %v1176_v11, %v1242_v61  ;;  %v1231_v1 = vsel %vm1221_vm5, %v3153_v16, %v1230_v51  ;;  %v3158_v11 = vld [vmem:[#allocation25_spill] sm:$0xff]  ;;  %v3165_v61 = vld [vmem:[#allocation27_spill] sm:$0xff]  ;;  %v3172_v16 = vld [vmem:[#allocation30_spill] sm:$0xff] }
  0xd6   : > { %v1220_v12 = vsel %vm1219_vm4, %v3146_v38, %v1218_v28  ;;  %v1236_v13 = vsel %vm1217_vm3, %v3151_v8, %v1235_v55  ;;  %v3154_v28 = vld [vmem:[#allocation28_spill] sm:$0xff]  ;;  %v1244_v46 = vsel %vm1219_vm4, %v3157_v37, %v1243_v47  ;;  %v3159_v24 = vunpack.c.l.b16 %v3158_v11 }
  0xd7   : > { %v1222_v62 = vsel %vm1221_vm5, %v3149_v4, %v1220_v12  ;;  %v3155_v15 = vunpack.c.l.b16 %v3154_v28  ;;  %v3161_v38 = vunpack.c.l.b16 %v3160_v25  ;;  %v3162_v12 = vld [vmem:[#allocation2_spill] sm:$0xff]  ;;  %v3164_v31 = vunpack.c.l.b16 %v2460_v36 }
  0xd8   : > { %v1224_v39 = vsel %vm1223_vm6, %v3152_v42, %v1222_v62  ;;  %v3163_v20 = vunpack.c.l.b16 %v3162_v12  ;;  %v3166_v4 = vunpack.c.l.b16 %v3165_v61  ;;  %v3168_v51 = vunpack.c.l.b16 %v3167_v58  ;;  %v3192_v61 = vld [vmem:[#allocation17_spill] sm:$0xff] }
  0xd9   : > { %v1237_v7 = vsel %vm1219_vm4, %v3155_v15, %v1236_v13  ;;  %v1226_v17 = vsel %vm1225_vm7, %v3159_v24, %v1224_v39  ;;  %v1232_v35 = vsel %vm1223_vm6, %v3161_v38, %v1231_v1  ;;  %v1245_v55 = vsel %vm1221_vm5, %v3164_v31, %v1244_v46 }
  0xda   : > { %v1238_v30 = vsel %vm1221_vm5, %v3163_v20, %v1237_v7  ;;  %v1233_v62 = vsel %vm1225_vm7, %v3166_v4, %v1232_v35  ;;  %v3169_v13 = vunpack.c.l.b16 %v2465_v22  ;;  %v3170_v42 = vunpack.c.l.b16 %v3128_v50 }
  0xdb   : > { %v1239_v8 = vsel %vm1223_vm6, %v3168_v51, %v1238_v30  ;;  %v3171_v39 = vunpack.c.l.b16 %v3129_v53  ;;  %v3173_v1 = vunpack.c.l.b16 %v3172_v16  ;;  %v3174_v15 = vunpack.c.l.b16 %v2470_v60 }
  0xdc   : > { %v1246_v47 = vsel %vm1223_vm6, %v3169_v13, %v1245_v55  ;;  %v3175_v33 = vunpack.c.l.b16 %v3130_v10  ;;  %v3176_v37 = vunpack.c.l.b16 %v2515_v19  ;;  %v3177_v50 = vunpack.c.l.b16 %v2520_v2 }
  0xdd   : > { %v1248_v36 = vsel %vm1213_vm1, %v3171_v39, %v3170_v42  ;;  %v1240_v28 = vsel %vm1225_vm7, %v3173_v1, %v1239_v8  ;;  %v1247_v7 = vsel %vm1225_vm7, %v3174_v15, %v1246_v47  ;;  %v3178_v46 = vunpack.c.l.b16 %v3131_v59 }
  0xde   : > { %v1249_v22 = vsel %vm1215_vm2, %v3175_v33, %v1248_v36  ;;  %v1255_v53 = vsel %vm1213_vm1, %v3177_v50, %v3176_v37  ;;  %v3179_v24 = vunpack.c.l.b16 %v2525_v9  ;;  %v1262_v25 = vsel %vm1213_vm1, %v1198_v34, %v1197_v41 }
  0xdf   : > { %v1250_v11 = vsel %vm1217_vm3, %v3178_v46, %v1249_v22  ;;  %v1269_v10 = vsel %vm1213_vm1, %v1206_v43, %v1205_v6  ;;  %v3180_v38 = vunpack.c.l.b16 %v3132_v18  ;;  %v3181_v2 = vunpack.c.l.b16 %v2530_v49 }
  0xe0   : > { %v1256_v60 = vsel %vm1215_vm2, %v3179_v24, %v1255_v53  ;;  %v3182_v59 = vunpack.c.l.b16 %v2565_v57  ;;  %v1270_v9 = vsel %vm1215_vm2, %v1207_v56, %v1269_v10  ;;  %v3183_v20 = vunpack.c.l.b16 %v3133_v5 }
  0xe1   : > { %v1251_v19 = vsel %vm1219_vm4, %v3180_v38, %v1250_v11  ;;  %v1257_v35 = vsel %vm1217_vm3, %v3181_v2, %v1256_v60  ;;  %v3184_v34 = vunpack.c.l.b16 %v2535_v45  ;;  %v3185_v6 = vunpack.c.l.b16 %v2570_v23 }
  0xe2   : > { %v1263_v12 = vsel %vm1215_vm2, %v3182_v59, %v1262_v25  ;;  %v1252_v41 = vsel %vm1221_vm5, %v3183_v20, %v1251_v19  ;;  %v1271_v43 = vsel %vm1217_vm3, %v1208_v26, %v1270_v9  ;;  %v3186_v57 = vunpack.c.l.b16 %v3134_v40 }
  0xe3   : > { %v1258_v18 = vsel %vm1219_vm4, %v3184_v34, %v1257_v35  ;;  %v1264_v49 = vsel %vm1217_vm3, %v3185_v6, %v1263_v12  ;;  %v3187_v56 = vunpack.c.l.b16 %v2540_v54  ;;  %v1272_v31 = vsel %vm1219_vm4, %v1209_v29, %v1271_v43 }
  0xe4   : > { %v1253_v30 = vsel %vm1223_vm6, %v3186_v57, %v1252_v41  ;;  %v1265_v45 = vsel %vm1219_vm4, %v1201_v52, %v1264_v49  ;;  %v3188_v23 = vunpack.c.l.b16 %v3135_v27  ;;  %v3189_v26 = vunpack.c.l.b16 %v2545_v48 }
  0xe5   : > { %v1259_v5 = vsel %vm1221_vm5, %v3187_v56, %v1258_v18  ;;  %v3190_v55 = vunpack.c.l.b16 %v2580_v32  ;;  %v3191_v52 = vunpack.c.l.b16 %v2620_v63  ;;  %v3193_v4 = vunpack.c.l.b16 %v3192_v61 }
  0xe6   : > { %v1254_v40 = vsel %vm1225_vm7, %v3188_v23, %v1253_v30  ;;  %v1260_v54 = vsel %vm1223_vm6, %v3189_v26, %v1259_v5  ;;  %v3194_v27 = vunpack.c.l.b16 %v2585_v14  ;;  %v3195_v48 = vunpack.c.l.b16 %v3137_v21 }
  0xe7   : > { %v1266_v44 = vsel %vm1221_vm5, %v3190_v55, %v1265_v45  ;;  %v1273_v29 = vsel %vm1221_vm5, %v3191_v52, %v1272_v31  ;;  %v1261_v58 = vsel %vm1225_vm7, %v3193_v4, %v1260_v54  ;;  %v1276_v13 = vpack.c.b16 %v1226_v17, %v1226_v17 }
  0xe8   : > { %v1267_v51 = vsel %vm1223_vm6, %v3194_v27, %v1266_v44  ;;  %v1274_v8 = vsel %vm1223_vm6, %v3195_v48, %v1273_v29  ;;  %v3196_v32 = vunpack.c.l.b16 %v2590_v3  ;;  %v3197_v63 = vunpack.c.l.b16 %v2630_v0 }
  0xe9   : > { %v1277_v39 = vpack.c.b16 %v1233_v62, %v1233_v62  ;;  %v1278_v36 = vpack.c.b16 %v1240_v28, %v1240_v28  ;;  %v1279_v16 = vpack.c.b16 %v1247_v7, %v1247_v7  ;;  %v1280_v1 = vpack.c.b16 %v1254_v40, %v1254_v40  ;;  %1292 = vst [vmem:[%s172_s27] sm:$0xf] %v1276_v13 }
  0xea   : > { %v1268_v47 = vsel %vm1225_vm7, %v3196_v32, %v1267_v51  ;;  %v1275_v42 = vsel %vm1225_vm7, %v3197_v63, %v1274_v8  ;;  %v1281_v14 = vpack.c.b16 %v1261_v58, %v1261_v58 }
  0xeb   : > { %v1282_v15 = vpack.c.b16 %v1268_v47, %v1268_v47  ;;  %v1283_v33 = vpack.c.b16 %v1275_v42, %v1275_v42  ;;  %1293 = vst [vmem:[%s172_s27 + $0x4] sm:$0xf] %v1277_v39  ;;  %1294 = vst [vmem:[%s172_s27 + $0x8] sm:$0xf] %v1278_v36 }
  0xec   : > { %1295 = vst [vmem:[%s172_s27 + $0xc] sm:$0xf] %v1279_v16  ;;  %1296 = vst [vmem:[%s172_s27 + $0x10] sm:$0xf] %v1280_v1 }
  0xed   : > { %1297 = vst [vmem:[%s172_s27 + $0x14] sm:$0xf] %v1281_v14  ;;  %1298 = vst [vmem:[%s172_s27 + $0x18] sm:$0xf] %v1282_v15 }
  0xee   : > { %1299 = vst [vmem:[%s172_s27 + $0x1c] sm:$0xf] %v1283_v33 }
  0xef PF: > { %s13_s12 = sadd.s32 1, %s1511_s12  }
  0xf0   : > { %p10_p5 = scmp.ge.s32.totalorder %s13_s12, 4  }
  0xf2   :  { %12 = sbr.rel (!%p10_p5) target bundleno = 1 (0x1), region = 62 }

// kernel: bn_max_relu_conv.3
= control target key start
LH: loop header
LB: loop body
LE: loop exit
PB: predicated region body
PF: predicated region fallthrough
CT: control target
= control target key end

     0   :  { %s3281_s12 = smov 0   ;;  %s3283_s13 = smov 0   ;;  %s3869_s0 = inlined_call_operand.vmem [shape: bf16[2,10,10,128], index: 0, kind: input, shape index: {}]   ;;  %s3870_s1 = inlined_call_operand.vmem [shape: bf16[3,3,128,128], index: 1, kind: input, shape index: {}]   ;;  %s3871_s2 = inlined_call_operand.vmem [shape: f32[1,128], index: 2, kind: input, shape index: {}]   ;;  %s3872_s3 = inlined_call_operand.vmem [shape: f32[2,64,128], index: 3, kind: output, shape index: {}]  }
   0x1   :  { %s3285_s14 = smov 0  }
   0x2 LB: > { %s32_s15 = sadd.s32 1, %s3255_s13  ;;  %p2392_p0 = scmp.ge.s32.totalorder %s3259_s14, 1  ;;  %s3259_s14 = sphi %s3285_s14, %s13_s14   ;;  %s3255_s13 = sphi %s3283_s13, %s3878_s13   ;;  %s3251_s12 = sphi %s3281_s12, %s3877_s12  }
   0x3   : > { %p34_p1 = scmp.ge.s32.totalorder %s32_s15, 2  ;;  %p187_p2 = scmp.lt.s32.totalorder %s3259_s14, 3 }
   0x5   : > { %s3880_s15 = smov (%p34_p1, %s32_s15), 0  ;;  %p188_p3 = pnand %p2392_p0, %p187_p2 }
   0x6   : > { %v3153_v0 = vld [vmem:[%s3870_s1 + $0x40] sm:$0xff] (!%p188_p3)   ;;  %p228_p4 = scmp.lt.s32.totalorder (!%p188_p3), %s3251_s12, 1  ;;  %v3155_v2 = vld [vmem:[%s3870_s1 + $0x48] sm:$0xff] (!%p188_p3)   ;;  %v3157_v4 = vld [vmem:[%s3870_s1 + $0x50] sm:$0xff] (!%p188_p3)   ;;  %vm308_vm0 = vsmask.f32 (!%p188_p3), 3328 }
   0x7   : > { %191 = sbr.rel (%p188_p3) target bundleno = 393 (0x189), region = 32  ;;  %v3154_v1 = vld [vmem:[%s3870_s1 + $0x100] sm:$0xff] (!%p188_p3)   ;;  %2832 = vmatprep.subr.bf16.mxu1 (!%p188_p3), %v3153_v0  ;;  %v3156_v3 = vld [vmem:[%s3870_s1 + $0x108] sm:$0xff] (!%p188_p3)   ;;  %v3158_v5 = vld [vmem:[%s3870_s1 + $0x110] sm:$0xff] (!%p188_p3)   ;;  %vm309_vm1 = vsmask.f32 (!%p188_p3), 7440 }
   0x8   : > { %2928 = vmatprep.subr.bf16.mxu0 (!%p188_p3), %v3154_v1  ;;  %2833 = vmatpush3.bf16.msra.mxu1 (!%p188_p3), %v3153_v0  ;;  %v3159_v6 = vld [vmem:[%s3870_s1 + $0x58] sm:$0xff] (!%p188_p3)   ;;  %v3161_v8 = vld [vmem:[%s3870_s1 + $0x60] sm:$0xff] (!%p188_p3)   ;;  %v3163_v10 = vld [vmem:[%s3870_s1 + $0x68] sm:$0xff] (!%p188_p3)   ;;  %vm730_vm3 = vcmask (!%p188_p3), 1042432   ;;  %vm731_vm4 = vcmask (!%p188_p3), 1046532  }
   0x9   : > { %2929 = vmatpush3.bf16.msra.mxu0 (!%p188_p3), %v3154_v1  ;;  %2834 = vmatprep.subr.bf16.mxu1 (!%p188_p3), %v3155_v2  ;;  %v3160_v7 = vld [vmem:[%s3870_s1 + $0x118] sm:$0xff] (!%p188_p3)   ;;  %v3162_v9 = vld [vmem:[%s3870_s1 + $0x120] sm:$0xff] (!%p188_p3)   ;;  %v3164_v14 = vld [vmem:[%s3870_s1 + $0x128] sm:$0xff] (!%p188_p3)  }
   0xa   : > { %2930 = vmatprep.subr.bf16.mxu0 (!%p188_p3), %v3156_v3  ;;  %v3165_v22 = vld [vmem:[%s3870_s1 + $0x70] sm:$0xff] (!%p188_p3)   ;;  %v3167_v37 = vld [vmem:[%s3870_s1 + $0x78] sm:$0xff] (!%p188_p3)   ;;  %vm3380_vm2 = vmor (!%p188_p3), %vm308_vm0, %vm309_vm1 }
   0xb   : > { %v3166_v23 = vld [vmem:[%s3870_s1 + $0x130] sm:$0xff] (!%p188_p3)   ;;  %v3168_v47 = vld [vmem:[%s3870_s1 + $0x138] sm:$0xff] (!%p188_p3)   ;;  %v3169_v63 = vld [vmem:[%s3870_s1] sm:$0xff] (!%p188_p3)  }
   0xc   : > { %2835 = vmatpush3.bf16.msra.mxu1 (!%p188_p3), %v3155_v2  ;;  %v3412_v1 = vld [vmem:[%s3870_s1 + $0x140] sm:$0xff] (!%p188_p3)   ;;  %vm3554_vm5 = vmor (!%p188_p3), %vm730_vm3, %vm731_vm4 }
   0xd   : > { %2931 = vmatpush3.bf16.msra.mxu0 (!%p188_p3), %v3156_v3  ;;  %2836 = vmatprep.subr.bf16.mxu1 (!%p188_p3), %v3157_v4  ;;  %v3233_v38 = vld [vmem:[%s3870_s1 + $0x220] sm:$0xff] (!%p188_p3)  }
   0xe   : > { %s3882_s12 = smov (!%p228_p4, %s3251_s12), 1  ;;  %2932 = vmatprep.subr.bf16.mxu0 %v3158_v5 }
   0xf   : > { %s3128_s5 = smul.u32 80, %s3882_s12 }
  0x10   : > { %2837 = vmatpush3.bf16.msra.mxu1 %v3157_v4 }
  0x11   : > { %2933 = vmatpush3.bf16.msra.mxu0 %v3158_v5  ;;  %2838 = vmatprep.subr.bf16.mxu1 %v3159_v6  ;;  %s3335_s16 = scalar_lea.vmem %s3869_s0, %s3128_s5 }
  0x12   : > { %2934 = vmatprep.subr.bf16.mxu0 %v3160_v7  ;;  %v3341_v11 = vld [vmem:[%s3335_s16] sm:$0xf]  ;;  %v3344_v12 = vld [vmem:[%s3335_s16 + $0x8] sm:$0xf]  ;;  %v3347_v13 = vld [vmem:[%s3335_s16 + $0x4] sm:$0x1] }
  0x13   : > { %v3353_v15 = vld [vmem:[%s3335_s16 + $0xc] sm:$0x1]  ;;  %v312_v16 = vshrl.u32 %v3341_v11, 16  ;;  %v315_v17 = vshll.u32 %v3341_v11, 16  ;;  %v321_v18 = vshll.u32 %v3347_v13, 16  ;;  %v326_v19 = vshrl.u32 %v3344_v12, 16 }
  0x14   : > { %2839 = vmatpush3.bf16.msra.mxu1 %v3159_v6  ;;  %v329_v20 = vshll.u32 %v3344_v12, 16  ;;  %v335_v21 = vshll.u32 %v3353_v15, 16  ;;  %v2509_v30 = vld [vmem:[%s3335_s16 + $0x8] sm:$0xf]  ;;  %v3369_v31 = vld [vmem:[%s3335_s16 + $0xc] sm:$0x1] }
  0x15   : > { %2935 = vmatpush3.bf16.msra.mxu0 %v3160_v7  ;;  %2840 = vmatprep.subr.bf16.mxu1 %v3161_v8  ;;  %v314_v24 = vrot.slane %v312_v16, 4  ;;  %v317_v25 = vrot.slane %v315_v17, 5  ;;  %v323_v26 = vrot.slane %v321_v18, 5  ;;  %v328_v27 = vrot.slane %v326_v19, 4  ;;  %v2511_v33 = vld [vmem:[%s3335_s16 + $0x10] sm:$0xf] }
  0x16   : > { %2936 = vmatprep.subr.bf16.mxu0 %v3162_v9  ;;  %v331_v28 = vrot.slane %v329_v20, 5  ;;  %v337_v29 = vrot.slane %v335_v21, 5  ;;  %v3373_v34 = vld [vmem:[%s3335_s16 + $0x14] sm:$0x1]  ;;  %v1107_v35 = vshrl.u32 %v2509_v30, 16  ;;  %v1110_v36 = vshll.u32 %v2509_v30, 16 }
  0x17   : > { %v318_v32 = vor.u32 %v317_v25, %v314_v24  ;;  %v1116_v40 = vshll.u32 %v3369_v31, 16  ;;  %v1121_v41 = vshrl.u32 %v2511_v33, 16  ;;  %v1124_v42 = vshll.u32 %v2511_v33, 16  ;;  %v3390_v51 = vld [vmem:[%s3335_s16 + $0x10] sm:$0xf] }
  0x18   : > { %2841 = vmatpush3.bf16.msra.mxu1 %v3161_v8  ;;  %v332_v39 = vor.u32 %v331_v28, %v328_v27  ;;  %v1109_v44 = vrot.slane %v1107_v35, 4  ;;  %v1112_v45 = vrot.slane %v1110_v36, 5  ;;  %v1130_v46 = vshll.u32 %v3373_v34, 16  ;;  %v3395_v55 = vld [vmem:[%s3335_s16 + $0x18] sm:$0xf] }
  0x19   : > { %2937 = vmatpush3.bf16.msra.mxu0 %v3162_v9  ;;  %2842 = vmatprep.subr.bf16.mxu1 %v3163_v10  ;;  %v319_v43 = vrot.slane %v318_v32, 4  ;;  %v1123_v49 = vrot.slane %v1121_v41, 4  ;;  %v1126_v50 = vrot.slane %v1124_v42, 5  ;;  %v1118_v54 = vrot.slane %v1116_v40, 5  ;;  %v3398_v56 = vld [vmem:[%s3335_s16 + $0x14] sm:$0x1] }
  0x1a   : > { %2938 = vmatprep.subr.bf16.mxu0 %v3164_v14  ;;  %v333_v48 = vrot.slane %v332_v39, 4  ;;  %v1113_v53 = vor.u32 %v1112_v45, %v1109_v44  ;;  %v1132_v59 = vrot.slane %v1130_v46, 5  ;;  %v3403_v60 = vld [vmem:[%s3335_s16 + $0x1c] sm:$0x1]  ;;  %v340_v61 = vshrl.u32 %v3390_v51, 16 }
  0x1b   : > { %v324_v52 = vsel %vm3380_vm2, %v319_v43, %v323_v26  ;;  %v1127_v58 = vor.u32 %v1126_v50, %v1123_v49  ;;  %v343_v2 = vshll.u32 %v3390_v51, 16  ;;  %v349_v3 = vshll.u32 %v3398_v56, 16  ;;  %v2513_v8 = vld [vmem:[%s3335_s16 + $0x18] sm:$0xf]  ;;  %v3423_v16 = vld [vmem:[%s3335_s16 + $0x1c] sm:$0x1] }
  0x1c   : > { %2843 = vmatpush3.bf16.msra.mxu1 %v3163_v10  ;;  %v338_v57 = vsel %vm3380_vm2, %v333_v48, %v337_v29  ;;  %v1114_v0 = vrot.slane %v1113_v53, 4  ;;  %v342_v5 = vrot.slane %v340_v61, 4  ;;  %v354_v6 = vshrl.u32 %v3395_v55, 16  ;;  %v2515_v17 = vld [vmem:[%s3335_s16 + $0x20] sm:$0xf]  ;;  %v3171_v43 = vld [vmem:[%s3870_s1 + $0x8] sm:$0xff]  }
  0x1d   : > { %2939 = vmatpush3.bf16.msra.mxu0 %v3164_v14  ;;  %2844 = vmatprep.subr.bf16.mxu1 %v3165_v22  ;;  %v2413_v62 = vcombine.low %v324_v52, %v338_v57  ;;  %v1128_v4 = vrot.slane %v1127_v58, 4  ;;  %v357_v7 = vshll.u32 %v3395_v55, 16  ;;  %v345_v10 = vrot.slane %v343_v2, 5  ;;  %v3429_v21 = vld [vmem:[%s3335_s16 + $0x24] sm:$0x1] }
  0x1e   : > { %2940 = vmatprep.subr.bf16.mxu0 %v3166_v23  ;;  %v1119_v9 = vsel %vm3380_vm2, %v1114_v0, %v1118_v54  ;;  %v363_v14 = vshll.u32 %v3403_v60, 16  ;;  %v356_v19 = vrot.slane %v354_v6, 4  ;;  %v351_v24 = vrot.slane %v349_v3, 5  ;;  %v3172_v54 = vld [vmem:[%s3870_s1 + $0x148] sm:$0xff]   ;;  %v3459_v0 = vld [vmem:[%s3335_s16 + $0x24] sm:$0x1] }
  0x1f   : > { %2848 = vmatprep.mubr.bf16.mxu1 %v2413_v62  ;;  %v1133_v18 = vsel %vm3380_vm2, %v1128_v4, %v1132_v59  ;;  %v359_v20 = vrot.slane %v357_v7, 5  ;;  %v1135_v27 = vshrl.u32 %v2513_v8, 16  ;;  %v1138_v28 = vshll.u32 %v2513_v8, 16  ;;  %v3173_v59 = vld [vmem:[%s3870_s1 + $0x10] sm:$0xff]   ;;  %v3453_v62 = vld [vmem:[%s3335_s16 + $0x20] sm:$0xf] }
  0x20   : > { %2845 = vmatpush3.bf16.msra.mxu1 %v3165_v22  ;;  %v2541_v22 = vcombine.low %v1119_v9, %v1133_v18  ;;  %v365_v25 = vrot.slane %v363_v14, 5  ;;  %v1144_v29 = vshll.u32 %v3423_v16, 16  ;;  %v1149_v32 = vshrl.u32 %v2515_v17, 16  ;;  %v3462_v2 = vld [vmem:[%s3335_s16 + $0x2c] sm:$0x1]  ;;  %v3174_v9 = vld [vmem:[%s3870_s1 + $0x150] sm:$0xff]  }
  0x21   : > { %2941 = vmatpush3.bf16.msra.mxu0 %v3166_v23  ;;  %2846 = vmatprep.subr.bf16.mxu1 %v3167_v37  ;;  %v346_v23 = vor.u32 %v345_v10, %v342_v5  ;;  %v360_v26 = vor.u32 %v359_v20, %v356_v19  ;;  %v1152_v33 = vshll.u32 %v2515_v17, 16  ;;  %v1158_v35 = vshll.u32 %v3429_v21, 16  ;;  %v3175_v10 = vld [vmem:[%s3870_s1 + $0x18] sm:$0xff]  }
  0x22   : > { %2942 = vmatprep.subr.bf16.mxu0 %v3168_v47  ;;  %2944 = vmatprep.mubr.bf16.mxu0 %v2541_v22  ;;  %v1140_v39 = vrot.slane %v1138_v28, 5  ;;  %v1151_v41 = vrot.slane %v1149_v32, 4  ;;  %v1146_v46 = vrot.slane %v1144_v29, 5  ;;  %v1398_v57 = vrot.slane %v3369_v31, 5  ;;  %v3176_v29 = vld [vmem:[%s3870_s1 + $0x158] sm:$0xff]  }
  0x23   : > { %v347_v30 = vrot.slane %v346_v23, 4  ;;  %v361_v36 = vrot.slane %v360_v26, 4  ;;  %v1154_v42 = vrot.slane %v1152_v33, 5  ;;  %v368_v3 = vshrl.u32 %v3453_v62, 16  ;;  %v2517_v23 = vld [vmem:[%s3335_s16 + $0x28] sm:$0xf] }
  0x24   : > { %2847 = vmatpush3.bf16.msra.mxu1 %v3167_v37  ;;  %v1137_v37 = vrot.slane %v1135_v27, 4  ;;  %v371_v4 = vshll.u32 %v3453_v62, 16  ;;  %v377_v5 = vshll.u32 %v3459_v0, 16  ;;  %v391_v8 = vshll.u32 %v3462_v2, 16  ;;  %v3483_v26 = vld [vmem:[%s3335_s16 + $0x34] sm:$0x1] }
  0x25   : > { %2943 = vmatpush3.bf16.msra.mxu0 %v3168_v47  ;;  %2856 = vmatprep.subr.bf16.mxu1 %v3169_v63  ;;  %v352_v40 = vsel %vm3380_vm2, %v347_v30, %v351_v24  ;;  %v366_v44 = vsel %vm3380_vm2, %v361_v36, %v365_v25  ;;  %v1160_v47 = vrot.slane %v1158_v35, 5  ;;  %v1155_v49 = vor.u32 %v1154_v42, %v1151_v41  ;;  %v3479_v24 = vld [vmem:[%s3335_s16 + $0x2c] sm:$0x1]  ;;  %v2519_v25 = vld [vmem:[%s3335_s16 + $0x30] sm:$0xf]  ;;  %v3177_v30 = vld [vmem:[%s3870_s1 + $0x20] sm:$0xff]  }
  0x26   : > { %2952 = vmatprep.subr.bf16.mxu0 %v3412_v1  ;;  %v1141_v45 = vor.u32 %v1140_v39, %v1137_v37  ;;  %v2414_v48 = vcombine.low %v352_v40, %v366_v44  ;;  %v370_v14 = vrot.slane %v368_v3, 4  ;;  %v373_v17 = vrot.slane %v371_v4, 5 }
  0x27   : > { %v1156_v52 = vrot.slane %v1155_v49, 4  ;;  %v379_v18 = vrot.slane %v377_v5, 5  ;;  %v393_v22 = vrot.slane %v391_v8, 5  ;;  %v1163_v27 = vshrl.u32 %v2517_v23, 16  ;;  %v2521_v5 = vld [vmem:[%s3335_s16 + $0x38] sm:$0xf] }
  0x28   : > { %v1142_v50 = vrot.slane %v1141_v45, 4  ;;  %2849 = vmatmul.mubr.bf16.vlgmr.msra.gmra.mrb[0].mxu1 %v2414_v48  ;;  %v1166_v28 = vshll.u32 %v2517_v23, 16  ;;  %v1172_v33 = vshll.u32 %v3479_v24, 16  ;;  %v1177_v35 = vshrl.u32 %v2519_v25, 16 }
  0x29   : > { %2857 = vmatpush3.bf16.msra.mxu1 %v3169_v63  ;;  %v1161_v58 = vsel %vm3380_vm2, %v1156_v52, %v1160_v47  ;;  %v3456_v63 = vld [vmem:[%s3335_s16 + $0x28] sm:$0xf]  ;;  %v1180_v36 = vshll.u32 %v2519_v25, 16  ;;  %v1165_v39 = vrot.slane %v1163_v27, 4  ;;  %v1186_v41 = vshll.u32 %v3483_v26, 16 }
  0x2a   : > { %v1147_v53 = vsel %vm3380_vm2, %v1142_v50, %v1146_v46  ;;  %2858 = vmatprep.subr.bf16.mxu1 %v3171_v43  ;;  %v382_v6 = vshrl.u32 %v3456_v63, 16  ;;  %v385_v7 = vshll.u32 %v3456_v63, 16  ;;  %v1168_v40 = vrot.slane %v1166_v28, 5  ;;  %v3494_v46 = vld [vmem:[%s3335_s16 + $0x30] sm:$0xf] }
  0x2b   : > { %v2542_v61 = vcombine.low %v1147_v53, %v1161_v58  ;;  %v1179_v44 = vrot.slane %v1177_v35, 4  ;;  %v1182_v45 = vrot.slane %v1180_v36, 5  ;;  %v1188_v49 = vrot.slane %v1186_v41, 5  ;;  %v3499_v50 = vld [vmem:[%s3335_s16 + $0x38] sm:$0xf] }
  0x2c   : > { %v384_v19 = vrot.slane %v382_v6, 4  ;;  %v387_v20 = vrot.slane %v385_v7, 5  ;;  %v1169_v48 = vor.u32 %v1168_v40, %v1165_v39  ;;  %v3502_v52 = vld [vmem:[%s3335_s16 + $0x34] sm:$0x1]  ;;  %v396_v53 = vshrl.u32 %v3494_v46, 16  ;;  %v3179_v6 = vld [vmem:[%s3870_s1 + $0x28] sm:$0xff]  }
  0x2d   : > { %2945 = vmatmul.mubr.bf16.vlgmr.msra.gmra.mrb[0].mxu0 %v2542_v61  ;;  %2859 = vmatpush3.bf16.msra.mxu1 %v3171_v43  ;;  %v1174_v43 = vrot.slane %v1172_v33, 5  ;;  %v3511_v61 = vld [vmem:[%s3335_s16 + $0x3c] sm:$0x1]  ;;  %v399_v3 = vshll.u32 %v3494_v46, 16  ;;  %v405_v4 = vshll.u32 %v3502_v52, 16  ;;  %v1191_v28 = vshrl.u32 %v2521_v5, 16 }
  0x2e   : > { %2953 = vmatpush3.bf16.msra.mxu0 %v3412_v1  ;;  %2860 = vmatprep.subr.bf16.mxu1 %v3173_v59  ;;  %v374_v1 = vor.u32 %v373_v17, %v370_v14  ;;  %v388_v32 = vor.u32 %v387_v20, %v384_v19  ;;  %v1170_v8 = vrot.slane %v1169_v48, 4  ;;  %v410_v14 = vshrl.u32 %v3499_v50, 16  ;;  %v3521_v17 = vld [vmem:[%s3335_s16 + $0x3c] sm:$0x1]  ;;  %v3529_v27 = vld [vmem:[%s3335_s16 + $0x44] sm:$0x1] }
  0x2f   : > { %2954 = vmatprep.subr.bf16.mxu0 %v3172_v54  ;;  %v401_v19 = vrot.slane %v399_v3, 5  ;;  %v407_v20 = vrot.slane %v405_v4, 5  ;;  %v419_v25 = vshll.u32 %v3511_v61, 16  ;;  %v1194_v36 = vshll.u32 %v2521_v5, 16 }
  0x30   : > { %v375_v37 = vrot.slane %v374_v1, 4  ;;  %v389_v42 = vrot.slane %v388_v32, 4  ;;  %v1175_v23 = vsel %vm3380_vm2, %v1170_v8, %v1174_v43  ;;  %v412_v1 = vrot.slane %v410_v14, 4 }
  0x31   : > { %2861 = vmatpush3.bf16.msra.mxu1 %v3173_v59  ;;  %v1183_v59 = vor.u32 %v1182_v45, %v1179_v44  ;;  %v421_v40 = vrot.slane %v419_v25, 5  ;;  %v1193_v41 = vrot.slane %v1191_v28, 4  ;;  %v1196_v45 = vrot.slane %v1194_v36, 5  ;;  %v2555_v25 = vld [vmem:[%s3335_s16 + $0x18] sm:$0xe] }
  0x32   : > { %2955 = vmatpush3.bf16.msra.mxu0 %v3172_v54  ;;  %2862 = vmatprep.subr.bf16.mxu1 %v3175_v10  ;;  %v380_v47 = vsel %vm3380_vm2, %v375_v37, %v379_v18  ;;  %v3178_v54 = vld [vmem:[%s3870_s1 + $0x160] sm:$0xff]   ;;  %v394_v58 = vsel %vm3380_vm2, %v389_v42, %v393_v22  ;;  %v413_v22 = vshll.u32 %v3499_v50, 16  ;;  %v3181_v37 = vld [vmem:[%s3870_s1 + $0x30] sm:$0xff]   ;;  %v1200_v42 = vshll.u32 %v3521_v17, 16  ;;  %v3184_v28 = vld [vmem:[%s3870_s1 + $0x178] sm:$0xff]  }
  0x33   : > { %2956 = vmatprep.subr.bf16.mxu0 %v3174_v9  ;;  %v2415_v7 = vcombine.low %v380_v47, %v394_v58  ;;  %v1184_v18 = vrot.slane %v1183_v59, 4  ;;  %v1402_v47 = vrot.slane %v3373_v34, 5  ;;  %v1406_v48 = vrot.slane %v3423_v16, 5  ;;  %v3182_v58 = vld [vmem:[%s3870_s1 + $0x170] sm:$0xff]  }
  0x34   : > { %v415_v35 = vrot.slane %v413_v22, 5  ;;  %v1197_v4 = vor.u32 %v1196_v45, %v1193_v41  ;;  %v1202_v34 = vrot.slane %v1200_v42, 5  ;;  %v1410_v22 = vrot.slane %v3429_v21, 5  ;;  %v3187_v41 = vld [vmem:[%s3870_s1 + $0x180] sm:$0xff]  }
  0x35   : > { %2863 = vmatpush3.bf16.msra.mxu1 %v3175_v10  ;;  %v398_v10 = vrot.slane %v396_v53, 4  ;;  %2852 = vmatprep.mubr.bf16.mxu1 %v2415_v7  ;;  %v1189_v32 = vsel %vm3380_vm2, %v1184_v18, %v1188_v49  ;;  %v1214_v53 = vshll.u32 %v3529_v27, 16  ;;  %v2553_v7 = vld [vmem:[%s3335_s16 + $0x8] sm:$0xe]  ;;  %v2563_v36 = vrot.slane %v2555_v25, 9 }
  0x36   : > { %2957 = vmatpush3.bf16.msra.mxu0 %v3174_v9  ;;  %2864 = vmatprep.subr.bf16.mxu1 %v3177_v30  ;;  %v2523_v9 = vld [vmem:[%s3335_s16 + $0x40] sm:$0xf]  ;;  %v2543_v39 = vcombine.low %v1175_v23, %v1189_v32  ;;  %v416_v44 = vor.u32 %v415_v35, %v412_v1  ;;  %v2561_v14 = vrot.slane %v2553_v7, 9  ;;  %v1198_v18 = vrot.slane %v1197_v4, 4 }
  0x37   : > { %2958 = vmatprep.subr.bf16.mxu0 %v3176_v29  ;;  %v402_v33 = vor.u32 %v401_v19, %v398_v10  ;;  %v1208_v49 = vshll.u32 %v2523_v9, 16  ;;  %v2554_v10 = vld [vmem:[%s3335_s16 + $0x10] sm:$0xe]  ;;  %v2425_v19 = vcombine.low %v3341_v11, %v3344_v12  ;;  %v1216_v1 = vrot.slane %v1214_v53, 5  ;;  %v2556_v12 = vld [vmem:[%s3335_s16 + $0x20] sm:$0xe] }
  0x38   : > { %2948 = vmatprep.mubr.bf16.mxu0 %v2543_v39  ;;  %v417_v3 = vrot.slane %v416_v44, 4  ;;  %v1399_v32 = vsel %vm3554_vm5, %v2561_v14, %v1398_v57  ;;  %v1203_v21 = vsel %vm3380_vm2, %v1198_v18, %v1202_v34  ;;  %v3186_v35 = vld [vmem:[%s3870_s1 + $0x80] sm:$0xff]   ;;  %v1407_v42 = vsel %vm3554_vm5, %v2563_v36, %v1406_v48  ;;  %v3191_v44 = vld [vmem:[%s3870_s1 + $0x90] sm:$0xff]  }
  0x39   : > { %2865 = vmatpush3.bf16.msra.mxu1 %v3177_v30  ;;  %v3180_v30 = vld [vmem:[%s3870_s1 + $0x168] sm:$0xff]   ;;  %v403_v43 = vrot.slane %v402_v33, 4  ;;  %v1210_v16 = vrot.slane %v1208_v49, 5  ;;  %v1414_v45 = vrot.slane %v3479_v24, 5  ;;  %v1422_v53 = vrot.slane %v3521_v17, 5  ;;  %v3195_v18 = vld [vmem:[%s3870_s1 + $0xa0] sm:$0xff]  }
  0x3a   : > { %2959 = vmatpush3.bf16.msra.mxu0 %v3176_v29  ;;  %2866 = vmatprep.subr.bf16.mxu1 %v3179_v6  ;;  %v1205_v29 = vshrl.u32 %v2523_v9, 16  ;;  %v1426_v24 = vrot.slane %v3529_v27, 5  ;;  %v739_v34 = vrot.slane %v3353_v15, 5  ;;  %v743_v17 = vrot.slane %v3398_v56, 5  ;;  %v707_v15 = vld [vmem:[%s3335_s16 + $0x8] sm:$0xe] }
  0x3b   : > { %2960 = vmatprep.subr.bf16.mxu0 %v3178_v54  ;;  %v408_v59 = vsel %vm3380_vm2, %v403_v43, %v407_v20  ;;  %v2562_v20 = vrot.slane %v2554_v10, 9  ;;  %v3189_v43 = vld [vmem:[%s3870_s1 + $0x88] sm:$0xff]   ;;  %v3192_v10 = vld [vmem:[%s3870_s1 + $0x190] sm:$0xff]   ;;  %v2438_v14 = vrot.slane %v707_v15, 9  ;;  %v751_v36 = vrot.slane %v3459_v0, 5  ;;  %v3205_v0 = vld [vmem:[%s3870_s1 + $0xc0] sm:$0xff]  }
  0x3c   : > { %v1207_v5 = vrot.slane %v1205_v29, 4  ;;  %v1418_v29 = vrot.slane %v3483_v26, 5  ;;  %v2428_v26 = vcombine.low %v3494_v46, %v3499_v50  ;;  %v3193_v46 = vld [vmem:[%s3870_s1 + $0x98] sm:$0xff]   ;;  %v3210_v15 = vld [vmem:[%s3870_s1 + $0x1c8] sm:$0xff]  }
  0x3d   : > { %2867 = vmatpush3.bf16.msra.mxu1 %v3179_v6  ;;  %v3183_v6 = vld [vmem:[%s3870_s1 + $0x38] sm:$0xff]   ;;  %v1403_v11 = vsel %vm3554_vm5, %v2562_v20, %v1402_v47 }
  0x3e   : > { %2961 = vmatpush3.bf16.msra.mxu0 %v3178_v54  ;;  %2868 = vmatprep.subr.bf16.mxu1 %v3181_v37  ;;  %v422_v54 = vsel %vm3380_vm2, %v417_v3, %v421_v40  ;;  %v1211_v23 = vor.u32 %v1210_v16, %v1207_v5  ;;  %v2585_v57 = vcombine.low %v1399_v32, %v1403_v11  ;;  %v706_v16 = vld [vmem:[%s3335_s16] sm:$0xe]  ;;  %v3194_v20 = vld [vmem:[%s3870_s1 + $0x198] sm:$0xff]  }
  0x3f   : > { %2962 = vmatprep.subr.bf16.mxu0 %v3180_v30  ;;  %v2416_v9 = vcombine.low %v408_v59, %v422_v54  ;;  %v2426_v40 = vcombine.low %v3390_v51, %v3395_v55  ;;  %v2427_v51 = vcombine.low %v3453_v62, %v3456_v63  ;;  %v735_v55 = vrot.slane %v3347_v13, 5  ;;  %v3190_v62 = vld [vmem:[%s3870_s1 + $0x188] sm:$0xff]   ;;  %v2558_v63 = vld [vmem:[%s3335_s16 + $0x30] sm:$0xe]  ;;  %v2560_v59 = vld [vmem:[%s3335_s16 + $0x40] sm:$0xe] }
  0x40   : > { %v1212_v33 = vrot.slane %v1211_v23, 4  ;;  %v2557_v13 = vld [vmem:[%s3335_s16 + $0x28] sm:$0xe]  ;;  %v2566_v49 = vrot.slane %v2558_v63, 9  ;;  %v2568_v7 = vrot.slane %v2560_v59, 9  ;;  %v2437_v56 = vrot.slane %v706_v16, 9 }
  0x41   : > { %2869 = vmatpush3.bf16.msra.mxu1 %v3181_v37  ;;  %v2564_v37 = vrot.slane %v2556_v12, 9  ;;  %v2565_v48 = vrot.slane %v2557_v13, 9  ;;  %v747_v54 = vrot.slane %v3403_v60, 5  ;;  %v708_v23 = vld [vmem:[%s3335_s16 + $0x10] sm:$0xe] }
  0x42   : > { %2963 = vmatpush3.bf16.msra.mxu0 %v3180_v30  ;;  %2853 = vmatmul.mubr.bf16.gmra.mrb[4].mxu1 %v2416_v9  ;;  %v1217_v31 = vsel %vm3380_vm2, %v1212_v33, %v1216_v1  ;;  %v1419_v4 = vsel %vm3554_vm5, %v2566_v49, %v1418_v29  ;;  %v740_v9 = vsel %vm3554_vm5, %v2438_v14, %v739_v34  ;;  %v709_v60 = vld [vmem:[%s3335_s16 + $0x18] sm:$0xe]  ;;  %v2439_v25 = vrot.slane %v708_v23, 9  ;;  %v3197_v33 = vld [vmem:[%s3870_s1 + $0xa8] sm:$0xff]  }
  0x43   : > { %2964 = vmatprep.subr.bf16.mxu0 %v3182_v58  ;;  %2870 = vmatprep.subr.bf16.mxu1 %v3183_v6  ;;  %v2544_v39 = vcombine.low %v1203_v21, %v1217_v31  ;;  %v1411_v30 = vsel %vm3554_vm5, %v2564_v37, %v1410_v22  ;;  %v1415_v3 = vsel %vm3554_vm5, %v2565_v48, %v1414_v45  ;;  %v3206_v32 = vld [vmem:[%s3335_s16 + $0x10] ss:$8 sps:$4 sm:$0xff]   ;;  %v759_v29 = vrot.slane %v3502_v52, 5  ;;  %v3209_v49 = vld [vmem:[%s3870_s1 + $0xc8] sm:$0xff]  }
  0x44   : > { %2872 = vmatprep.mubr.bf16.mxu1 %v2425_v19  ;;  %v2586_v47 = vcombine.low %v1407_v42, %v1411_v30  ;;  %v2587_v27 = vcombine.low %v1415_v3, %v1419_v4  ;;  %v736_v19 = vsel %vm3554_vm5, %v2437_v56, %v735_v55  ;;  %v744_v11 = vsel %vm3554_vm5, %v2439_v25, %v743_v17  ;;  %v3200_v31 = vld [vmem:[%s3870_s1 + $0xb0] sm:$0xff]   ;;  %v3203_v37 = vld [vmem:[%s3870_s1 + $0xb8] sm:$0xff]   ;;  %v2639_v25 = vld [vmem:[%s3335_s16 + $0x28] sm:$0xf] }
  0x45   : > { %2871 = vmatpush3.bf16.msra.mxu1 %v3183_v6  ;;  %2949 = vmatmul.mubr.bf16.gmra.mrb[4].mxu0 %v2544_v39  ;;  %v1427_v6 = vsel %vm3554_vm5, %v2568_v7, %v1426_v24  ;;  %v2461_v1 = vcombine.low %v736_v19, %v740_v9  ;;  %v710_v39 = vld [vmem:[%s3335_s16 + $0x20] sm:$0xe]  ;;  %v3204_v45 = vld [vmem:[%s3870_s1 + $0x1b8] sm:$0xff]   ;;  %v3693_v24 = vld [vmem:[%s3335_s16 + $0x14] sm:$0x1] }
  0x46   : > { %2965 = vmatpush3.bf16.msra.mxu0 %v3182_v58  ;;  %2880 = vmatprep.subr.bf16.mxu1 %v3186_v35  ;;  %v2559_v58 = vld [vmem:[%s3335_s16 + $0x38] sm:$0xe]  ;;  %v2441_v42 = vrot.slane %v710_v39, 9  ;;  %v1779_v59 = vshll.u32 %v3693_v24, 16  ;;  %v3208_v7 = vld [vmem:[%s3335_s16 + $0x20] ss:$8 sps:$4 sm:$0xff]  }
  0x47   : > { %2966 = vmatprep.subr.bf16.mxu0 %v3184_v28  ;;  %2968 = vmatprep.mubr.bf16.mxu0 %v2585_v57  ;;  %v2567_v5 = vrot.slane %v2559_v58, 9  ;;  %v3198_v57 = vld [vmem:[%s3870_s1 + $0x1a8] sm:$0xff]   ;;  %v2635_v52 = vld [vmem:[%s3335_s16 + $0x18] sm:$0xf]  ;;  %v3212_v9 = vld [vmem:[%s3870_s1 + $0x1d0] sm:$0xff]  }
  0x48   : > { %v1784_v3 = vshrl.u32 %v2635_v52, 16  ;;  %v1787_v4 = vshll.u32 %v2635_v52, 16  ;;  %v3219_v56 = vld [vmem:[%s3335_s16 + $0x30] ss:$8 sps:$4 sm:$0xff]   ;;  %v3218_v52 = vld [vmem:[%s3870_s1 + $0x1e8] sm:$0xff]  }
  0x49   : > { %v1423_v50 = vsel %vm3554_vm5, %v2567_v5, %v1422_v53  ;;  %v2633_v53 = vld [vmem:[%s3335_s16 + $0x10] sm:$0xf]  ;;  %v3213_v23 = vld [vmem:[%s3870_s1 + $0xd8] sm:$0xff]  }
  0x4a   : > { %2967 = vmatpush3.bf16.msra.mxu0 %v3184_v28  ;;  %2873 = vmatmul.mubr.bf16.vlgmr.msra.gmra.mrb[0].mxu1 %v2426_v40  ;;  %v2588_v22 = vcombine.low %v1423_v50, %v1427_v6  ;;  %v2440_v28 = vrot.slane %v709_v60, 9  ;;  %v711_v40 = vld [vmem:[%s3335_s16 + $0x28] sm:$0xe]  ;;  %v1773_v58 = vshll.u32 %v2633_v53, 16  ;;  %v1786_v50 = vrot.slane %v1784_v3, 4 }
  0x4b   : > { %2976 = vmatprep.subr.bf16.mxu0 %v3187_v41  ;;  %2881 = vmatpush3.bf16.msra.mxu1 %v3186_v35  ;;  %v3196_v35 = vld [vmem:[%s3870_s1 + $0x1a0] sm:$0xff]   ;;  %v2442_v30 = vrot.slane %v711_v40, 9  ;;  %v1789_v6 = vrot.slane %v1787_v4, 5 }
  0x4c   : > { %2882 = vmatprep.subr.bf16.mxu1 %v3189_v43  ;;  %2876 = vmatprep.mubr.bf16.mxu1 %v2427_v51  ;;  %v748_v12 = vsel %vm3554_vm5, %v2440_v28, %v747_v54  ;;  %v712_v51 = vld [vmem:[%s3335_s16 + $0x30] sm:$0xe]  ;;  %v1775_v16 = vrot.slane %v1773_v58, 5  ;;  %v1781_v54 = vrot.slane %v1779_v59, 5 }
  0x4d   : > { %2969 = vmatmul.mubr.bf16.vlgmr.msra.gmra.mrb[0].mxu0 %v2586_v47  ;;  %v2462_v21 = vcombine.low %v744_v11, %v748_v12  ;;  %v763_v47 = vrot.slane %v3511_v61, 5  ;;  %v2443_v63 = vrot.slane %v712_v51, 9  ;;  %v3697_v61 = vld [vmem:[%s3335_s16 + $0x1c] sm:$0x1]  ;;  %v3221_v11 = vld [vmem:[%s3335_s16 + $0x40] ss:$8 sps:$4 sm:$0xff]  }
  0x4e   : > { %2977 = vmatpush3.bf16.msra.mxu0 %v3187_v41  ;;  %2972 = vmatprep.mubr.bf16.mxu0 %v2587_v27  ;;  %v755_v41 = vrot.slane %v3462_v2, 5  ;;  %v752_v2 = vsel %vm3554_vm5, %v2441_v42, %v751_v36  ;;  %v1793_v5 = vshll.u32 %v3697_v61, 16  ;;  %v2641_v12 = vld [vmem:[%s3335_s16 + $0x30] sm:$0xf]  ;;  %v1815_v36 = vshll.u32 %v2639_v25, 16 }
  0x4f   : > { %2883 = vmatpush3.bf16.msra.mxu1 %v3189_v43  ;;  %2978 = vmatprep.subr.bf16.mxu0 %v3190_v62  ;;  %v3201_v43 = vld [vmem:[%s3870_s1 + $0x1b0] sm:$0xff]   ;;  %v760_v34 = vsel %vm3554_vm5, %v2443_v63, %v759_v29  ;;  %v1826_v40 = vshrl.u32 %v2641_v12, 16  ;;  %v3742_v51 = vld [vmem:[%s3335_s16 + $0x24] sm:$0x1] }
  0x50   : > { %2884 = vmatprep.subr.bf16.mxu1 %v3191_v44  ;;  %v756_v55 = vsel %vm3554_vm5, %v2442_v30, %v755_v41  ;;  %v1795_v19 = vrot.slane %v1793_v5, 5  ;;  %v1829_v41 = vshll.u32 %v2641_v12, 16  ;;  %v1817_v29 = vrot.slane %v1815_v36, 5  ;;  %v2647_v5 = vld [vmem:[%s3335_s16 + $0x48] sm:$0xf]  ;;  %v3224_v12 = vld [vmem:[%s3870_s1 + $0x1f8] sm:$0xff]  }
  0x51   : > { %v2463_v13 = vcombine.low %v752_v2, %v756_v55  ;;  %v3745_v2 = vld [vmem:[%s3335_s16 + $0x2c] sm:$0x1]  ;;  %v1807_v58 = vshll.u32 %v3742_v51, 16 }
  0x52   : > { %2877 = vmatmul.mubr.bf16.gmra.mrb[4].mxu1 %v2428_v26  ;;  %2979 = vmatpush3.bf16.msra.mxu0 %v3190_v62  ;;  %v3207_v62 = vld [vmem:[%s3870_s1 + $0x1c0] sm:$0xff]   ;;  %v1770_v26 = vshrl.u32 %v2633_v53, 16  ;;  %v1831_v63 = vrot.slane %v1829_v41, 5  ;;  %v1821_v59 = vshll.u32 %v3745_v2, 16 }
  0x53   : > { %2885 = vmatpush3.bf16.msra.mxu1 %v3191_v44  ;;  %2980 = vmatprep.subr.bf16.mxu0 %v3192_v10  ;;  %v713_v44 = vld [vmem:[%s3335_s16 + $0x38] sm:$0xe]  ;;  %v2645_v53 = vld [vmem:[%s3335_s16 + $0x40] sm:$0xf] }
  0x54   : > { %2886 = vmatprep.subr.bf16.mxu1 %v3193_v46  ;;  %2896 = vmatprep.mubr.bf16.mxu1 %v2461_v1  ;;  %v2444_v48 = vrot.slane %v713_v44, 9  ;;  %v1772_v27 = vrot.slane %v1770_v26, 4  ;;  %v2637_v1 = vld [vmem:[%s3335_s16 + $0x20] sm:$0xf]  ;;  %v3220_v26 = vld [vmem:[%s3870_s1 + $0xf0] sm:$0xff]  }
  0x55   : > { %2973 = vmatmul.mubr.bf16.gmra.mrb[4].mxu0 %v2588_v22 }
  0x56   : > { %2981 = vmatpush3.bf16.msra.mxu0 %v3192_v10  ;;  %2992 = vmatprep.mubr.bf16.mxu0 %v3206_v32  ;;  %v764_v17 = vsel %vm3554_vm5, %v2444_v48, %v763_v47  ;;  %v1776_v10 = vor.u32 %v1775_v16, %v1772_v27  ;;  %v3748_v47 = vld [vmem:[%s3335_s16 + $0x34] sm:$0x1]  ;;  %v1857_v27 = vshll.u32 %v2645_v53, 16 }
  0x57   : > { %2887 = vmatpush3.bf16.msra.mxu1 %v3193_v46  ;;  %2982 = vmatprep.subr.bf16.mxu0 %v3194_v20  ;;  %v3211_v46 = vld [vmem:[%s3870_s1 + $0xd0] sm:$0xff]   ;;  %v2464_v14 = vcombine.low %v760_v34, %v764_v17  ;;  %v1835_v3 = vshll.u32 %v3748_v47, 16  ;;  %v1854_v17 = vshrl.u32 %v2645_v53, 16  ;;  %v2678_v53 = vld [vmem:[%s3335_s16 + $0x18] sm:$0xe] }
  0x58   : > { %2888 = vmatprep.subr.bf16.mxu1 %v3195_v18  ;;  %v1777_v22 = vrot.slane %v1776_v10, 4 }
  0x5a   : > { %2983 = vmatpush3.bf16.msra.mxu0 %v3194_v20  ;;  %v3225_v20 = vld [vmem:[%s3335_s16 + $0x8] ss:$8 sps:$4 sm:$0xff]   ;;  %v1782_v28 = vsel %vm3380_vm2, %v1777_v22, %v1781_v54 }
  0x5b   : > { %2889 = vmatpush3.bf16.msra.mxu1 %v3195_v18  ;;  %2984 = vmatprep.subr.bf16.mxu0 %v3196_v35  ;;  %v1790_v18 = vor.u32 %v1789_v6, %v1786_v50  ;;  %v1868_v50 = vshrl.u32 %v2647_v5, 16  ;;  %v1871_v6 = vshll.u32 %v2647_v5, 16  ;;  %v2686_v5 = vrot.slane %v2678_v53, 9 }
  0x5c   : > { %2890 = vmatprep.subr.bf16.mxu1 %v3197_v33 }
  0x5d   : > { %v1791_v60 = vrot.slane %v1790_v18, 4  ;;  %v1823_v18 = vrot.slane %v1821_v59, 5  ;;  %v3230_v59 = vld [vmem:[%s3335_s16 + $0x38] ss:$8 sps:$4 sm:$0xff]  }
  0x5e   : > { %2985 = vmatpush3.bf16.msra.mxu0 %v3196_v35  ;;  %v1798_v35 = vshrl.u32 %v2637_v1, 16 }
  0x5f   : > { %2891 = vmatpush3.bf16.msra.mxu1 %v3197_v33  ;;  %2986 = vmatprep.subr.bf16.mxu0 %v3198_v57  ;;  %v1796_v32 = vsel %vm3380_vm2, %v1791_v60, %v1795_v19  ;;  %v3215_v33 = vld [vmem:[%s3870_s1 + $0xe0] sm:$0xff]   ;;  %v3775_v60 = vld [vmem:[%s3335_s16 + $0x4c] sm:$0x1] }
  0x60   : > { %2892 = vmatprep.subr.bf16.mxu1 %v3200_v31  ;;  %v2665_v39 = vcombine.low %v1782_v28, %v1796_v32  ;;  %v1800_v55 = vrot.slane %v1798_v35, 4  ;;  %v1870_v28 = vrot.slane %v1868_v50, 4  ;;  %v1873_v32 = vrot.slane %v1871_v6, 5  ;;  %v3226_v35 = vld [vmem:[%s3335_s16 + $0x18] ss:$8 sps:$4 sm:$0xff]   ;;  %v3234_v6 = vld [vmem:[%s3870_s1 + $0x228] sm:$0xff]  }
  0x62   : > { %2987 = vmatpush3.bf16.msra.mxu0 %v3198_v57  ;;  %v1812_v57 = vshrl.u32 %v2639_v25, 16  ;;  %v1859_v25 = vrot.slane %v1857_v27, 5 }
  0x63   : > { %2893 = vmatpush3.bf16.msra.mxu1 %v3200_v31  ;;  %2988 = vmatprep.subr.bf16.mxu0 %v3201_v43  ;;  %v1801_v31 = vshll.u32 %v2637_v1, 16  ;;  %v1856_v1 = vrot.slane %v1854_v17, 4 }
  0x64   : > { %2894 = vmatprep.subr.bf16.mxu1 %v3203_v37 }
  0x65   : > { %v1803_v44 = vrot.slane %v1801_v31, 5 }
  0x66   : > { %2989 = vmatpush3.bf16.msra.mxu0 %v3201_v43  ;;  %v3216_v43 = vld [vmem:[%s3870_s1 + $0x1e0] sm:$0xff]  }
  0x67   : > { %2895 = vmatpush3.bf16.msra.mxu1 %v3203_v37  ;;  %2990 = vmatprep.subr.bf16.mxu0 %v3204_v45  ;;  %v3214_v37 = vld [vmem:[%s3870_s1 + $0x1d8] sm:$0xff]  }
  0x68   : > { %2904 = vmatprep.subr.bf16.mxu1 %v3205_v0 }
  0x6a   : > { %2897 = vmatmul.mubr.bf16.vlgmr.msra.gmra.mrb[0].mxu1 %v2462_v21  ;;  %2991 = vmatpush3.bf16.msra.mxu0 %v3204_v45  ;;  %v2643_v21 = vld [vmem:[%s3335_s16 + $0x38] sm:$0xf]  ;;  %v1814_v45 = vrot.slane %v1812_v57, 4 }
  0x6b   : > { %2905 = vmatpush3.bf16.msra.mxu1 %v3205_v0  ;;  %2900 = vmatprep.mubr.bf16.mxu1 %v2463_v13  ;;  %v1840_v42 = vshrl.u32 %v2643_v21, 16  ;;  %v1843_v30 = vshll.u32 %v2643_v21, 16  ;;  %v3217_v0 = vld [vmem:[%s3870_s1 + $0xe8] sm:$0xff]   ;;  %v1828_v13 = vrot.slane %v1826_v40, 4  ;;  %v2681_v21 = vld [vmem:[%s3335_s16 + $0x30] sm:$0xe] }
  0x6c   : > { %2906 = vmatprep.subr.bf16.mxu1 %v3209_v49  ;;  %3000 = vmatprep.subr.bf16.mxu0 %v3207_v62  ;;  %v1818_v34 = vor.u32 %v1817_v29, %v1814_v45 }
  0x6d   : > { %2993 = vmatmul.mubr.bf16.vlgmr.msra.gmra.mrb[0].mxu0 %v3208_v7  ;;  %v1842_v48 = vrot.slane %v1840_v42, 4  ;;  %v1804_v7 = vor.u32 %v1803_v44, %v1800_v55  ;;  %v1832_v16 = vor.u32 %v1831_v63, %v1828_v13  ;;  %v1860_v42 = vor.u32 %v1859_v25, %v1856_v1 }
  0x6e   : > { %3001 = vmatpush3.bf16.msra.mxu0 %v3207_v62  ;;  %2996 = vmatprep.mubr.bf16.mxu0 %v3219_v56  ;;  %v3751_v62 = vld [vmem:[%s3335_s16 + $0x3c] sm:$0x1]  ;;  %v3222_v56 = vld [vmem:[%s3870_s1 + $0x1f0] sm:$0xff]   ;;  %v1819_v54 = vrot.slane %v1818_v34, 4  ;;  %v2077_v55 = vrot.slane %v3748_v47, 5  ;;  %v2069_v25 = vrot.slane %v3742_v51, 5 }
  0x6f   : > { %2907 = vmatpush3.bf16.msra.mxu1 %v3209_v49  ;;  %3002 = vmatprep.subr.bf16.mxu0 %v3210_v15  ;;  %v1845_v49 = vrot.slane %v1843_v30, 5  ;;  %v1849_v4 = vshll.u32 %v3751_v62, 16  ;;  %v1805_v10 = vrot.slane %v1804_v7, 4  ;;  %v1833_v19 = vrot.slane %v1832_v16, 4  ;;  %v3232_v16 = vld [vmem:[%s3870_s1 + $0x218] sm:$0xff]  }
  0x70   : > { %2908 = vmatprep.subr.bf16.mxu1 %v3211_v46  ;;  %v1824_v57 = vsel %vm3380_vm2, %v1819_v54, %v1823_v18  ;;  %v1874_v30 = vor.u32 %v1873_v32, %v1870_v28  ;;  %v2081_v45 = vrot.slane %v3751_v62, 5  ;;  %v2065_v7 = vrot.slane %v3697_v61, 5 }
  0x71   : > { %v2089_v54 = vrot.slane %v3775_v60, 5  ;;  %v2073_v32 = vrot.slane %v3745_v2, 5 }
  0x72   : > { %2901 = vmatmul.mubr.bf16.gmra.mrb[4].mxu1 %v2464_v14  ;;  %3003 = vmatpush3.bf16.msra.mxu0 %v3210_v15  ;;  %v3223_v15 = vld [vmem:[%s3870_s1 + $0xf8] sm:$0xff]   ;;  %v1809_v14 = vrot.slane %v1807_v58, 5  ;;  %v3231_v58 = vld [vmem:[%s3870_s1 + $0x210] sm:$0xff]   ;;  %v2066_v61 = vsel %vm3554_vm5, %v2686_v5, %v2065_v7 }
  0x73   : > { %2909 = vmatpush3.bf16.msra.mxu1 %v3211_v46  ;;  %2920 = vmatprep.mubr.bf16.mxu1 %v3225_v20  ;;  %v1846_v46 = vor.u32 %v1845_v49, %v1842_v48  ;;  %v1837_v20 = vrot.slane %v1835_v3, 5  ;;  %v2677_v49 = vld [vmem:[%s3335_s16 + $0x10] sm:$0xe] }
  0x74   : > { %2910 = vmatprep.subr.bf16.mxu1 %v3213_v23  ;;  %3004 = vmatprep.subr.bf16.mxu0 %v3212_v9  ;;  %v1810_v31 = vsel %vm3380_vm2, %v1805_v10, %v1809_v14  ;;  %v2685_v3 = vrot.slane %v2677_v49, 9  ;;  %v2684_v10 = vld [vmem:[%s3335_s16 + $0x48] sm:$0xe] }
  0x75   : > { %2997 = vmatmul.mubr.bf16.gmra.mrb[4].mxu0 %v3221_v11  ;;  %v1847_v22 = vrot.slane %v1846_v46, 4  ;;  %v3227_v11 = vld [vmem:[%s3870_s1 + $0x200] sm:$0xff]   ;;  %v1838_v40 = vsel %vm3380_vm2, %v1833_v19, %v1837_v20  ;;  %v2666_v29 = vcombine.low %v1810_v31, %v1824_v57  ;;  %v2692_v19 = vrot.slane %v2684_v10, 9  ;;  %v3236_v20 = vld [vmem:[%s3870_s1 + $0x238] sm:$0xff]  }
  0x76   : > { %3005 = vmatpush3.bf16.msra.mxu0 %v3212_v9  ;;  %3016 = vmatprep.mubr.bf16.mxu0 %v2665_v39  ;;  %v1851_v9 = vrot.slane %v1849_v4, 5  ;;  %v3229_v39 = vld [vmem:[%s3335_s16 + $0x28] ss:$8 sps:$4 sm:$0xff]   ;;  %v2061_v4 = vrot.slane %v3693_v24, 5 }
  0x77   : > { %2911 = vmatpush3.bf16.msra.mxu1 %v3213_v23  ;;  %3006 = vmatprep.subr.bf16.mxu0 %v3214_v37  ;;  %v3772_v23 = vld [vmem:[%s3335_s16 + $0x44] sm:$0x1] }
  0x78   : > { %2912 = vmatprep.subr.bf16.mxu1 %v3215_v33  ;;  %v1863_v36 = vshll.u32 %v3772_v23, 16  ;;  %v1852_v41 = vsel %vm3380_vm2, %v1847_v22, %v1851_v9  ;;  %v2062_v24 = vsel %vm3554_vm5, %v2685_v3, %v2061_v4  ;;  %v2085_v14 = vrot.slane %v3772_v23, 5  ;;  %v2679_v22 = vld [vmem:[%s3335_s16 + $0x20] sm:$0xe]  ;;  %v2680_v9 = vld [vmem:[%s3335_s16 + $0x28] sm:$0xe] }
  0x79   : > { %v2667_v13 = vcombine.low %v1838_v40, %v1852_v41  ;;  %v2709_v50 = vcombine.low %v2062_v24, %v2066_v61  ;;  %v2090_v23 = vsel %vm3554_vm5, %v2692_v19, %v2089_v54  ;;  %v2688_v28 = vrot.slane %v2680_v9, 9 }
  0x7a   : > { %3007 = vmatpush3.bf16.msra.mxu0 %v3214_v37  ;;  %v1877_v37 = vshll.u32 %v3775_v60, 16  ;;  %v1865_v63 = vrot.slane %v1863_v36, 5  ;;  %v2687_v60 = vrot.slane %v2679_v22, 9 }
  0x7b   : > { %2913 = vmatpush3.bf16.msra.mxu1 %v3215_v33  ;;  %3008 = vmatprep.subr.bf16.mxu0 %v3216_v43  ;;  %v2682_v33 = vld [vmem:[%s3335_s16 + $0x38] sm:$0xe] }
  0x7c   : > { %2914 = vmatprep.subr.bf16.mxu1 %v3217_v0  ;;  %v2690_v44 = vrot.slane %v2682_v33, 9  ;;  %v1879_v48 = vrot.slane %v1877_v37, 5 }
  0x7e   : > { %3009 = vmatpush3.bf16.msra.mxu0 %v3216_v43  ;;  %v3228_v43 = vld [vmem:[%s3870_s1 + $0x208] sm:$0xff]   ;;  %v2082_v62 = vsel %vm3554_vm5, %v2690_v44, %v2081_v45  ;;  %v2396_v44 = vld [vmem:[%s3871_s2] ss:$0 sm:$0xff] }
  0x7f   : > { %2915 = vmatpush3.bf16.msra.mxu1 %v3217_v0  ;;  %3010 = vmatprep.subr.bf16.mxu0 %v3218_v52  ;;  %v2689_v0 = vrot.slane %v2681_v21, 9  ;;  %v2074_v21 = vsel %vm3554_vm5, %v2688_v28, %v2073_v32 }
  0x80   : > { %2916 = vmatprep.subr.bf16.mxu1 %v3220_v26 }
  0x81   : > { %v2078_v47 = vsel %vm3554_vm5, %v2689_v0, %v2077_v55 }
  0x82   : > { %3011 = vmatpush3.bf16.msra.mxu0 %v3218_v52  ;;  %v1861_v52 = vrot.slane %v1860_v42, 4  ;;  %v2711_v34 = vcombine.low %v2078_v47, %v2082_v62 }
  0x83   : > { %2917 = vmatpush3.bf16.msra.mxu1 %v3220_v26  ;;  %3012 = vmatprep.subr.bf16.mxu0 %v3222_v56  ;;  %v1875_v26 = vrot.slane %v1874_v30, 4 }
  0x84   : > { %2918 = vmatprep.subr.bf16.mxu1 %v3223_v15  ;;  %v1866_v17 = vsel %vm3380_vm2, %v1861_v52, %v1865_v63 }
  0x85   : > { %v1880_v27 = vsel %vm3380_vm2, %v1875_v26, %v1879_v48 }
  0x86   : > { %3013 = vmatpush3.bf16.msra.mxu0 %v3222_v56  ;;  %v2668_v46 = vcombine.low %v1866_v17, %v1880_v27  ;;  %v2683_v56 = vld [vmem:[%s3335_s16 + $0x40] sm:$0xe]  ;;  %s2723_s16 = sshll.u32 %s3882_s12, 6 }
  0x87   : > { %2919 = vmatpush3.bf16.msra.mxu1 %v3223_v15  ;;  %3014 = vmatprep.subr.bf16.mxu0 %v3224_v12  ;;  %v3235_v15 = vld [vmem:[%s3870_s1 + $0x230] sm:$0xff]   ;;  %v2691_v18 = vrot.slane %v2683_v56, 9  ;;  %s255_s8 = scalar_lea.vmem %s3872_s3, %s2723_s16 }
  0x88   : > { %3048 = vmatprep.subr.bf16.mxu1 %v3227_v11 }
  0x89   : > { %v2086_v1 = vsel %vm3554_vm5, %v2691_v18, %v2085_v14 }
  0x8a   : > { %2921 = vmatmul.mubr.bf16.vlgmr.msra.gmra.mrb[0].mxu1 %v3226_v35  ;;  %3015 = vmatpush3.bf16.msra.mxu0 %v3224_v12  ;;  %v2070_v12 = vsel %vm3554_vm5, %v2687_v60, %v2069_v25 }
  0x8b   : > { %3056 = vmatpush3.bf16.msra.mxu1 %v3227_v11  ;;  %2924 = vmatprep.mubr.bf16.mxu1 %v3229_v39  ;;  %v2710_v33 = vcombine.low %v2070_v12, %v2074_v21 }
  0x8c   : > { %3049 = vmatprep.subr.bf16.mxu1 %v3228_v43  ;;  %3024 = vmatprep.subr.bf16.mxu0 %v3227_v11 }
  0x8d   : > { %3017 = vmatmul.mubr.bf16.vlgmr.msra.gmra.mrb[0].mxu0 %v2666_v29 }
  0x8e   : > { %3025 = vmatpush3.bf16.msra.mxu0 %v3227_v11  ;;  %3020 = vmatprep.mubr.bf16.mxu0 %v2667_v13  ;;  %v2712_v11 = vcombine.low %v2086_v1, %v2090_v23 }
  0x8f   : > { %3057 = vmatpush3.bf16.msra.mxu1 %v3228_v43  ;;  %3026 = vmatprep.subr.bf16.mxu0 %v3228_v43 }
  0x90   : > { %3050 = vmatprep.subr.bf16.mxu1 %v3231_v58 }
  0x92   : > { %2925 = vmatmul.mubr.bf16.gmra.mrb[4].mxu1 %v3230_v59  ;;  %3027 = vmatpush3.bf16.msra.mxu0 %v3228_v43 }
  0x93   : > { %3058 = vmatpush3.bf16.msra.mxu1 %v3231_v58  ;;  %3044 = vmatprep.mubr.bf16.mxu1 %v2711_v34 }
  0x94   : > { %3051 = vmatprep.subr.bf16.mxu1 %v3232_v16  ;;  %3028 = vmatprep.subr.bf16.mxu0 %v3231_v58 }
  0x95   : > { %3021 = vmatmul.mubr.bf16.gmra.mrb[4].mxu0 %v2668_v46 }
  0x96   : > { %3029 = vmatpush3.bf16.msra.mxu0 %v3231_v58  ;;  %3040 = vmatprep.mubr.bf16.mxu0 %v2709_v50 }
  0x97   : > { %3059 = vmatpush3.bf16.msra.mxu1 %v3232_v16  ;;  %3030 = vmatprep.subr.bf16.mxu0 %v3232_v16 }
  0x98   : > { %3052 = vmatprep.subr.bf16.mxu1 %v3233_v38 }
  0x9a   : > { %3031 = vmatpush3.bf16.msra.mxu0 %v3232_v16 }
  0x9b   : > { %3060 = vmatpush3.bf16.msra.mxu1 %v3233_v38  ;;  %3032 = vmatprep.subr.bf16.mxu0 %v3233_v38 }
  0x9c   : > { %3053 = vmatprep.subr.bf16.mxu1 %v3234_v6 }
  0x9e   : > { %3033 = vmatpush3.bf16.msra.mxu0 %v3233_v38 }
  0x9f   : > { %3061 = vmatpush3.bf16.msra.mxu1 %v3234_v6  ;;  %3034 = vmatprep.subr.bf16.mxu0 %v3234_v6 }
  0xa0   : > { %3054 = vmatprep.subr.bf16.mxu1 %v3235_v15 }
  0xa2   : > { %3035 = vmatpush3.bf16.msra.mxu0 %v3234_v6 }
  0xa3   : > { %3062 = vmatpush3.bf16.msra.mxu1 %v3235_v15  ;;  %3036 = vmatprep.subr.bf16.mxu0 %v3235_v15 }
  0xa4   : > { %3055 = vmatprep.subr.bf16.mxu1 %v3236_v20 }
  0xa6   : > { %3037 = vmatpush3.bf16.msra.mxu0 %v3235_v15 }
  0xa7   : > { %3063 = vmatpush3.bf16.msra.mxu1 %v3236_v20  ;;  %3038 = vmatprep.subr.bf16.mxu0 %v3236_v20 }
  0xaa   : > { %3045 = vmatmul.mubr.bf16.vlgmr.msra.gmra.mrb[8].mxu1 %v2712_v11  ;;  %3039 = vmatpush3.bf16.msra.mxu0 %v3236_v20 }
  0xad   : > { %3041 = vmatmul.mubr.bf16.vlgmr.msra.gmra.mrb[0].mxu0 %v2710_v33 }
 0x15d   : > { %v2922_v35 = vpop.f32.mrb[0].mxu1 }
 0x15e   : > { %v1051_v51 = vpop.f32.mrb[1].mxu1 }
 0x15f   : > { %v2923_v31 = vpop.f32.mrb[2].mxu1 }
 0x160   : > { %v1054_v2 = vpop.f32.mrb[3].mxu1 }
 0x165   : > { %v2926_v57 = vpop.f32.mrb[4].mxu1 }
 0x166   : > { %v1067_v36 = vpop.f32.mrb[5].mxu1 }
 0x167   : > { %v2927_v37 = vpop.f32.mrb[6].mxu1 }
 0x168   : > { %v1070_v39 = vpop.f32.mrb[7].mxu1  ;;  %v3022_v40 = vpop.f32.mrb[4].mxu0 }
 0x169   : > { %v3068_v41 = vadd.f32 %v3022_v40, %v2926_v57  ;;  %v2012_v42 = vpop.f32.mrb[5].mxu0 }
 0x16a   : > { %v3070_v30 = vadd.f32 %v2012_v42, %v1067_v36  ;;  %v3023_v8 = vpop.f32.mrb[6].mxu0 }
 0x16b   : > { %v3072_v43 = vadd.f32 %v3023_v8, %v2927_v37  ;;  %v2015_v0 = vpop.f32.mrb[7].mxu0 }
 0x16c   : > { %v3074_v55 = vadd.f32 %v2015_v0, %v1070_v39 }
 0x17d   : > { %v3046_v45 = vpop.f32.mrb[8].mxu1 }
 0x17e   : > { %v3069_v29 = vadd.f32 %v3068_v41, %v3046_v45  ;;  %v2222_v13 = vpop.f32.mrb[9].mxu1 }
 0x17f   : > { %v3071_v63 = vadd.f32 %v3070_v30, %v2222_v13  ;;  %v3047_v48 = vpop.f32.mrb[10].mxu1 }
 0x180   : > { %v2259_v49 = vadd.f32 %v3069_v29, %v2396_v44  ;;  %v3073_v53 = vadd.f32 %v3072_v43, %v3047_v48  ;;  %v2225_v52 = vpop.f32.mrb[11].mxu1  ;;  %v3042_v62 = vpop.f32.mrb[0].mxu0 }
 0x181   : > { %v2257_v26 = vadd.f32 %v3071_v63, %v2396_v44  ;;  %v3075_v47 = vadd.f32 %v3074_v55, %v2225_v52  ;;  %v3064_v59 = vadd.f32 %v3042_v62, %v2922_v35  ;;  %v2206_v3 = vpop.f32.mrb[1].mxu0 }
 0x182   : > { %2267 = vst [vmem:[%s255_s8 + $0x30] sm:$0xff] %v2259_v49  ;;  %v2260_v58 = vadd.f32 %v3073_v53, %v2396_v44  ;;  %v3065_v5 = vadd.f32 %v2206_v3, %v1051_v51  ;;  %v3043_v7 = vpop.f32.mrb[2].mxu0 }
 0x183   : > { %2265 = vst [vmem:[%s255_s8 + $0x20] sm:$0xff] %v2257_v26  ;;  %v2258_v4 = vadd.f32 %v3075_v47, %v2396_v44  ;;  %v2255_v34 = vadd.f32 %v3064_v59, %v2396_v44  ;;  %v3066_v17 = vadd.f32 %v3043_v7, %v2923_v31  ;;  %v2209_v27 = vpop.f32.mrb[3].mxu0 }
 0x184   : > { %2268 = vst [vmem:[%s255_s8 + $0x38] sm:$0xff] %v2260_v58  ;;  %v2253_v16 = vadd.f32 %v3065_v5, %v2396_v44  ;;  %v3067_v24 = vadd.f32 %v2209_v27, %v1054_v2 }
 0x185   : > { %2266 = vst [vmem:[%s255_s8 + $0x28] sm:$0xff] %v2258_v4  ;;  %2263 = vst [vmem:[%s255_s8 + $0x10] sm:$0xff] %v2255_v34  ;;  %v2256_v61 = vadd.f32 %v3066_v17, %v2396_v44 }
 0x186   : > { %2261 = vst [vmem:[%s255_s8] sm:$0xff] %v2253_v16  ;;  %v2254_v46 = vadd.f32 %v3067_v24, %v2396_v44 }
 0x187   : > { %2264 = vst [vmem:[%s255_s8 + $0x18] sm:$0xff] %v2256_v61 }
 0x188   : > { %2262 = vst [vmem:[%s255_s8 + $0x8] sm:$0xff] %v2254_v46 }
 0x189 PF: > { %s13_s14 = sadd.s32 1, %s3259_s14   ;;  %s3877_s12 = smov %s3255_s13 }
 0x18a   : > { %p10_p5 = scmp.ge.s32.totalorder %s13_s14, 4   ;;  %s3878_s13 = smov %s3880_s15 }
 0x18c   :  { %12 = sbr.rel (!%p10_p5) target bundleno = 2 (0x2), region = 82 }

</bundles_post_ra>
